<compile_context>
chip_gen: v6e
topology: v6e:2x2x1
jax: 0.10.0
libtpu: 0.0.40
codegen_flags: <defaults>
</compile_context>

<pallas_src>
import math

import jax
import jax.numpy as jnp
from jax import lax
from jax.experimental import pallas as pl
from jax.experimental.pallas import tpu as pltpu


# Static architecture constants (SIG_Extract defaults).
STRIDES = (5, 4, 2, 2, 2)
KERNELS = (10, 8, 4, 4, 4)
PADS = tuple(math.ceil(s / 2) for s in STRIDES)
N_LAYERS = 5
BN_EPS = 1e-5
LANE = 128
ACT_BASE = 8          # 8-aligned sublane row where each staged activation starts


def _round_up(x, m):
    return (x + m - 1) // m * m


def _conv_out_len(t_in, k, s, p):
    return (t_in + 2 * p - k) // s + 1


def _build_kernel(B, T, C, n_classes):
    """Build the fused pallas_call for fixed static shapes."""
    # The phase decomposition of layers 2..5 assumes k == 2*s.
    for i in range(1, N_LAYERS):
        assert KERNELS[i] == 2 * STRIDES[i], (i, KERNELS[i], STRIDES[i])

    C_mid = C // 16
    C_pad = _round_up(C, LANE)
    Cm_pad = _round_up(C_mid, LANE)
    NC_pad = _round_up(n_classes, LANE)
    K0_pad = _round_up(KERNELS[0], LANE)

    # Per-layer output lengths.
    t_out = []
    t_prev = T
    for i in range(N_LAYERS):
        t_prev = _conv_out_len(t_prev, KERNELS[i], STRIDES[i], PADS[i])
        t_out.append(t_prev)
    T1 = t_out[0]

    # Right-pad rows actually read per layer (beyond the previous activation).
    rpads = [0] * N_LAYERS
    for li in range(1, N_LAYERS):
        last_read = (t_out[li] - 1) * STRIDES[li] + KERNELS[li] - 1   # padded index
        rpads[li] = max(0, last_read - (PADS[li] + t_out[li - 1] - 1))

    # Single staging buffer: big enough for the largest staged activation
    # plus its right-pad rows, starting at the 8-aligned ACT_BASE row.
    t_buf = _round_up(
        ACT_BASE + max(t_out[li - 1] + rpads[li] for li in range(1, N_LAYERS)), 8)

    # Per-layer phase offsets into the stacked (NPH, 2*C_pad, C_pad) weights.
    phase_off = []
    off = 0
    for i in range(1, N_LAYERS):
        phase_off.append(off)
        off += STRIDES[i]
    NPH = off

    def kernel(x_ref, w1_ref, wt_ref, sh_ref, sw1_ref, sb1_ref, sw2_ref,
               sb2_ref, fw_ref, fb_ref, out_ref, src):

        def se_apply(act, l):
            # Squeeze-and-Excitation: global average pool over time, 2 1x1 convs.
            pooled = jnp.mean(act, axis=0, keepdims=True)               # (1, C_pad)
            h = jnp.dot(pooled, sw1_ref[l], preferred_element_type=jnp.float32)
            h = jnp.maximum(h + sb1_ref[l], 0.0)                        # (1, Cm_pad)
            g = jnp.dot(h, sw2_ref[l], preferred_element_type=jnp.float32)
            return act * jax.nn.sigmoid(g + sb2_ref[l])

        # Left conv margin rows [0, ACT_BASE): one aligned (8, C_pad) zero
        # store.  Activation / tail stores never touch these rows, so they
        # stay zero for every layer of this grid step.
        src[0:ACT_BASE, :] = jnp.zeros((ACT_BASE, C_pad), jnp.float32)

        # ---- layer 1: one MXU matmul over wrapper-side im2col patches ----
        act = jnp.dot(x_ref[0], w1_ref[...], preferred_element_type=jnp.float32)
        act = jnp.maximum(act + sh_ref[0], 0.0)
        act = se_apply(act, 0)

        # ---- layers 2..5: per-phase merged-tap MXU matmuls (K = 2*C_pad) ----
        for li in range(1, N_LAYERS):
            s_i, p_i, T_i = STRIDES[li], PADS[li], t_out[li]
            T_prev = t_out[li - 1]
            base = ACT_BASE - p_i          # scratch row of padded index 0
            # Stage previous activation at the 8-aligned offset.
            src[ACT_BASE:ACT_BASE + T_prev, :] = act
            # Zero only the right-pad rows the strided taps actually read.
            r = rpads[li]
            if r > 0:
                src[ACT_BASE + T_prev:ACT_BASE + T_prev + r, :] = (
                    jnp.zeros((r, C_pad), jnp.float32))
            acc = jnp.zeros((T_i, C_pad), jnp.float32)
            for p in range(s_i):
                # Direct strided sublane reads (no value-slice relayouts).
                lhs0 = src[pl.ds(base + p, T_i, stride=s_i), :]         # tap j=p
                lhs1 = src[pl.ds(base + s_i + p, T_i, stride=s_i), :]   # tap j=s+p
                lhs = jnp.concatenate([lhs0, lhs1], axis=-1)            # (T_i, 2*C_pad)
                acc = acc + jnp.dot(lhs, wt_ref[phase_off[li - 1] + p],
                                    preferred_element_type=jnp.float32)
            act = jnp.maximum(acc + sh_ref[li], 0.0)
            act = se_apply(act, li)

        # ---- fc over channels (lane-dense padded logits) ----
        y = jnp.dot(act, fw_ref[...], preferred_element_type=jnp.float32)
        out_ref[0] = y + fb_ref[...]                                    # (T5, NC_pad)

    grid = (B,)
    in_specs = [
        pl.BlockSpec((1, T1, K0_pad), lambda b: (b, 0, 0)),          # layer-1 patches
        pl.BlockSpec((K0_pad, C_pad), lambda b: (0, 0)),             # layer-1 folded W
        pl.BlockSpec((NPH, 2 * C_pad, C_pad), lambda b: (0, 0, 0)),  # merged taps 2..5
        pl.BlockSpec((N_LAYERS, 1, C_pad), lambda b: (0, 0, 0)),     # folded BN shift
        pl.BlockSpec((N_LAYERS, C_pad, Cm_pad), lambda b: (0, 0, 0)),  # SE w1
        pl.BlockSpec((N_LAYERS, 1, Cm_pad), lambda b: (0, 0, 0)),      # SE b1
        pl.BlockSpec((N_LAYERS, Cm_pad, C_pad), lambda b: (0, 0, 0)),  # SE w2
        pl.BlockSpec((N_LAYERS, 1, C_pad), lambda b: (0, 0, 0)),       # SE b2
        pl.BlockSpec((C_pad, NC_pad), lambda b: (0, 0)),             # fc W^T (padded)
        pl.BlockSpec((1, NC_pad), lambda b: (0, 0)),                 # fc b (padded)
    ]
    out_specs = pl.BlockSpec((1, t_out[-1], NC_pad), lambda b: (b, 0, 0))
    out_shape = jax.ShapeDtypeStruct((B, t_out[-1], NC_pad), jnp.float32)
    scratch_shapes = [pltpu.VMEM((t_buf, C_pad), jnp.float32)]

    # Rough cost estimate (helps XLA schedule the fused call).
    flops = 2 * T1 * K0_pad * C_pad
    for i in range(1, N_LAYERS):
        flops += 2 * t_out[i] * (2 * C_pad) * C_pad * STRIDES[i]
    for i in range(N_LAYERS):
        flops += 4 * C_pad * Cm_pad + 2 * t_out[i] * C_pad
    flops += 2 * t_out[-1] * C_pad * NC_pad
    flops *= B
    weight_bytes = 4 * (K0_pad * C_pad + NPH * 2 * C_pad * C_pad
                        + N_LAYERS * (2 * C_pad + Cm_pad + 2 * C_pad * Cm_pad)
                        + C_pad * NC_pad + NC_pad)
    bytes_accessed = weight_bytes + 4 * B * (T1 * K0_pad + t_out[-1] * NC_pad)
    cost = pl.CostEstimate(flops=flops,
                           transcendentals=B * N_LAYERS * (C_pad + Cm_pad),
                           bytes_accessed=bytes_accessed)

    call = pl.pallas_call(
        kernel,
        grid=grid,
        in_specs=in_specs,
        out_specs=out_specs,
        out_shape=out_shape,
        scratch_shapes=scratch_shapes,
        compiler_params=pltpu.CompilerParams(
            dimension_semantics=("parallel",)),
        cost_estimate=cost,
    )
    return call, K0_pad


# ---------------------------------------------------------------------------
# Parameters (mimic PyTorch init; BN uses "trained-like" stats so the
# eval-mode folding is actually exercised).
# ---------------------------------------------------------------------------
def init_params(key, C=80, n_classes=39):
    C_mid = C // 16
    p = {'conv_w': [], 'bn_gamma': [], 'bn_beta': [], 'bn_mean': [], 'bn_var': [],
         'se_w1': [], 'se_b1': [], 'se_w2': [], 'se_b2': []}
    in_d = 1
    for i in range(N_LAYERS):
        key, k1, k2, k3, k4, k5, k6, k7, k8, k9 = jax.random.split(key, 10)
        k = KERNELS[i]
        std = math.sqrt(2.0 / (in_d * k))                       # kaiming_normal_
        p['conv_w'].append(std * jax.random.normal(k1, (C, in_d, k), jnp.float32))
        p['bn_gamma'].append(jax.random.uniform(k2, (C,), jnp.float32, 0.5, 1.5))
        p['bn_beta'].append(0.1 * jax.random.normal(k3, (C,), jnp.float32))
        p['bn_mean'].append(0.1 * jax.random.normal(k4, (C,), jnp.float32))
        p['bn_var'].append(jax.random.uniform(k5, (C,), jnp.float32, 0.5, 1.5))
        b1 = 1.0 / math.sqrt(C)
        p['se_w1'].append(jax.random.uniform(k6, (C_mid, C, 1), jnp.float32, -b1, b1))
        p['se_b1'].append(jax.random.uniform(k7, (C_mid,), jnp.float32, -b1, b1))
        b2 = 1.0 / math.sqrt(C_mid)
        p['se_w2'].append(jax.random.uniform(k8, (C, C_mid, 1), jnp.float32, -b2, b2))
        p['se_b2'].append(jax.random.uniform(k9, (C,), jnp.float32, -b2, b2))
        in_d = C
    key, kf1, kf2 = jax.random.split(key, 3)
    bf = 1.0 / math.sqrt(C)
    p['fc_w'] = jax.random.uniform(kf1, (n_classes, C), jnp.float32, -bf, bf)
    p['fc_b'] = jax.random.uniform(kf2, (n_classes,), jnp.float32, -bf, bf)
    return p


def _fold_inputs(p, C, n_classes):
    """Fold eval-mode BN into conv weights / per-channel shifts and rearrange
    everything into the lane-dense, channel-padded layouts the kernel uses."""
    C_mid = C // 16
    C_pad = _round_up(C, LANE)
    Cm_pad = _round_up(C_mid, LANE)
    NC_pad = _round_up(n_classes, LANE)
    K0_pad = _round_up(KERNELS[0], LANE)

    scales, shifts = [], []
    for i in range(N_LAYERS):
        sc = p['bn_gamma'][i] / jnp.sqrt(p['bn_var'][i] + BN_EPS)
        scales.append(sc)
        shifts.append(p['bn_beta'][i] - p['bn_mean'][i] * sc)

    # Layer 1: (C, 1, k0) -> (k0, C), BN-scaled, zero-padded to (K0_pad, C_pad).
    w1 = (p['conv_w'][0][:, 0, :] * scales[0][:, None]).T
    w1 = jnp.zeros((K0_pad, C_pad), jnp.float32).at[:KERNELS[0], :C].set(w1)

    # Layers 2..5: per phase, the two taps (j=p and j=s+p) stacked along the
    # contraction dim -> (2*C_pad, C_pad) per phase.
    phase_mats = []
    for i in range(1, N_LAYERS):
        w = p['conv_w'][i] * scales[i][:, None, None]            # (C_out, C_in, k)
        s = STRIDES[i]
        for ph in range(s):
            blk = jnp.zeros((2 * C_pad, C_pad), jnp.float32)
            blk = blk.at[:C, :C].set(w[:, :, ph].T)              # tap j = ph
            blk = blk.at[C_pad:C_pad + C, :C].set(w[:, :, s + ph].T)  # tap j = s+ph
            phase_mats.append(blk)
    wt = jnp.stack(phase_mats, axis=0)                           # (NPH, 2*C_pad, C_pad)

    sh = jnp.zeros((N_LAYERS, 1, C_pad), jnp.float32).at[:, 0, :C].set(
        jnp.stack(shifts, axis=0))
    sw1 = jnp.zeros((N_LAYERS, C_pad, Cm_pad), jnp.float32)
    sb1 = jnp.zeros((N_LAYERS, 1, Cm_pad), jnp.float32)
    sw2 = jnp.zeros((N_LAYERS, Cm_pad, C_pad), jnp.float32)
    sb2 = jnp.zeros((N_LAYERS, 1, C_pad), jnp.float32)
    for i in range(N_LAYERS):
        sw1 = sw1.at[i, :C, :C_mid].set(p['se_w1'][i][:, :, 0].T)
        sb1 = sb1.at[i, 0, :C_mid].set(p['se_b1'][i])
        sw2 = sw2.at[i, :C_mid, :C].set(p['se_w2'][i][:, :, 0].T)
        sb2 = sb2.at[i, 0, :C].set(p['se_b2'][i])

    fw = jnp.zeros((C_pad, NC_pad), jnp.float32).at[:C, :n_classes].set(p['fc_w'].T)
    fb = jnp.zeros((1, NC_pad), jnp.float32).at[0, :n_classes].set(p['fc_b'])
    return w1, wt, sh, sw1, sb1, sw2, sb2, fw, fb


def sig_extract_forward(params, x_btc, C=80, n_classes=39):
    """x_btc: dense padded signal (B, T, 1).  Returns (B, n_classes, T_out)."""
    B, T, c_in = x_btc.shape
    assert c_in == 1
    call, K0_pad = _build_kernel(B, T, C, n_classes)

    # Layer-1 im2col in the wrapper: tiny gather, lane-dense (B, T1, K0_pad).
    p0, k0, s0 = PADS[0], KERNELS[0], STRIDES[0]
    T1 = _conv_out_len(T, k0, s0, p0)
    xpad = jnp.pad(x_btc[:, :, 0], ((0, 0), (p0, p0)))               # (B, T+2*p0)
    idx = (jnp.arange(T1) * s0)[:, None] + jnp.arange(k0)[None, :]   # (T1, k0)
    patches = xpad[:, idx]                                           # (B, T1, k0)
    patches = jnp.pad(patches, ((0, 0), (0, 0), (0, K0_pad - k0)))   # (B, T1, K0_pad)

    ins = _fold_inputs(params, C, n_classes)
    y = call(patches, *ins)                                          # (B, T5, NC_pad)
    y = y[:, :, :n_classes]
    return jnp.transpose(y, (0, 2, 1))                               # (B, n_cls, T5)


# ---------------------------------------------------------------------------
# Pure-JAX reference (eval-mode BN), for the correctness check.
# ---------------------------------------------------------------------------
def reference_forward(params, x_btc):
    h = jnp.transpose(x_btc, (0, 2, 1))                              # (B, 1, T)
    for i in range(N_LAYERS):
        w = params['conv_w'][i]
        h = lax.conv_general_dilated(
            h, w, window_strides=(STRIDES[i],),
            padding=[(PADS[i], PADS[i])],
            dimension_numbers=("NCH", "OIH", "NCH"))
        g_ = params['bn_gamma'][i]; b_ = params['bn_beta'][i]
        m_ = params['bn_mean'][i]; v_ = params['bn_var'][i]
        h = (h - m_[None, :, None]) / jnp.sqrt(v_[None, :, None] + BN_EPS)
        h = h * g_[None, :, None] + b_[None, :, None]
        h = jnp.maximum(h, 0.0)
        pooled = jnp.mean(h, axis=2)                                 # (B, C)
        z = jnp.maximum(pooled @ params['se_w1'][i][:, :, 0].T
                        + params['se_b1'][i], 0.0)                   # (B, C_mid)
        gate = jax.nn.sigmoid(z @ params['se_w2'][i][:, :, 0].T
                              + params['se_b2'][i])                  # (B, C)
        h = h * gate[:, :, None]
    h = jnp.transpose(h, (0, 2, 1))                                  # (B, T5, C)
    y = h @ params['fc_w'].T + params['fc_b']
    return jnp.transpose(y, (0, 2, 1))                               # (B, n_cls, T5)


if __name__ == "__main__":
    key = jax.random.PRNGKey(0)
    kp, kx = jax.random.split(key)

    C, n_classes = 80, 39        # module defaults: nHiddenUnits=80, n_classes=39
    B, T = 2, 320
    params = init_params(kp, C=C, n_classes=n_classes)
    x = jax.random.normal(kx, (B, T, 1), dtype=jnp.float32)

    fwd = jax.jit(sig_extract_forward)
    out = jax.block_until_ready(fwd(params, x))

    with jax.default_matmul_precision("highest"):
        ref = jax.block_until_ready(reference_forward(params, x))

    assert out.shape == ref.shape == (B, n_classes, 2), (out.shape, ref.shape)
    err = float(jnp.max(jnp.abs(out - ref)))
    assert jnp.allclose(out, ref, rtol=2e-3, atol=2e-3), err

    print("KERNEL_OK")
</pallas_src>

<mosaic_0001>
module attributes {stable_mosaic.version = 11 : i64} {
  func.func @kernel(%arg0: i32, %arg1: memref<1x64x128xf32, #tpu.memory_space<vmem>>, %arg2: memref<128x128xf32, #tpu.memory_space<vmem>>, %arg3: memref<10x256x128xf32, #tpu.memory_space<vmem>>, %arg4: memref<5x1x128xf32, #tpu.memory_space<vmem>>, %arg5: memref<5x128x128xf32, #tpu.memory_space<vmem>>, %arg6: memref<5x1x128xf32, #tpu.memory_space<vmem>>, %arg7: memref<5x128x128xf32, #tpu.memory_space<vmem>>, %arg8: memref<5x1x128xf32, #tpu.memory_space<vmem>>, %arg9: memref<128x128xf32, #tpu.memory_space<vmem>>, %arg10: memref<1x128xf32, #tpu.memory_space<vmem>>, %arg11: memref<1x2x128xf32, #tpu.memory_space<vmem>>, %arg12: memref<80x128xf32, #tpu.memory_space<vmem>>) attributes {dimension_semantics = [#tpu.dimension_semantics<parallel>], iteration_bounds = array<i64: 2>, scalar_prefetch = 0 : i64, scratch_operands = 1 : i64, tpu.core_type = #tpu.core_type<tc>, window_params = [{transform_indices = @transform_0, window_bounds = array<i64: 1, 64, 128>}, {pipeline_mode = #tpu.pipeline_mode<synchronous>, transform_indices = @transform_1, window_bounds = array<i64: 128, 128>}, {pipeline_mode = #tpu.pipeline_mode<synchronous>, transform_indices = @transform_2, window_bounds = array<i64: 10, 256, 128>}, {pipeline_mode = #tpu.pipeline_mode<synchronous>, transform_indices = @transform_3, window_bounds = array<i64: 5, 1, 128>}, {pipeline_mode = #tpu.pipeline_mode<synchronous>, transform_indices = @transform_4, window_bounds = array<i64: 5, 128, 128>}, {pipeline_mode = #tpu.pipeline_mode<synchronous>, transform_indices = @transform_5, window_bounds = array<i64: 5, 1, 128>}, {pipeline_mode = #tpu.pipeline_mode<synchronous>, transform_indices = @transform_6, window_bounds = array<i64: 5, 128, 128>}, {pipeline_mode = #tpu.pipeline_mode<synchronous>, transform_indices = @transform_7, window_bounds = array<i64: 5, 1, 128>}, {pipeline_mode = #tpu.pipeline_mode<synchronous>, transform_indices = @transform_8, window_bounds = array<i64: 128, 128>}, {pipeline_mode = #tpu.pipeline_mode<synchronous>, transform_indices = @transform_9, window_bounds = array<i64: 1, 128>}, {transform_indices = @transform_10, window_bounds = array<i64: 1, 2, 128>}]} {
    %cst = arith.constant 0.000000e+00 : f32
    %0 = vector.broadcast %cst : f32 to vector<8x128xf32>
    %c0 = arith.constant 0 : index
    %c0_0 = arith.constant 0 : index
    %1 = vector.load %arg12[%c0, %c0_0] : memref<80x128xf32, #tpu.memory_space<vmem>>, vector<8x128xf32>
    tpu.vector_store %arg12[%c0, %c0_0], %0 {strides = array<i32>} : memref<80x128xf32, #tpu.memory_space<vmem>>, vector<8x128xf32>,
    %c0_1 = arith.constant 0 : index
    %c0_2 = arith.constant 0 : index
    %c0_3 = arith.constant 0 : index
    %2 = vector.load %arg1[%c0_1, %c0_2, %c0_3] : memref<1x64x128xf32, #tpu.memory_space<vmem>>, vector<1x64x128xf32>
    %3 = vector.shape_cast %2 : vector<1x64x128xf32> to vector<64x128xf32>
    %c0_4 = arith.constant 0 : index
    %c0_5 = arith.constant 0 : index
    %4 = vector.load %arg2[%c0_4, %c0_5] : memref<128x128xf32, #tpu.memory_space<vmem>>, vector<128x128xf32>
    %cst_6 = arith.constant dense<0.000000e+00> : vector<64x128xf32>
    %5 = tpu.matmul %3, %4, %cst_6 {dimension_numbers = #tpu.dot_dimension_numbers<[1], [0], [0], [1], [0, 0, 1, 1], [], []>} : vector<64x128xf32>, vector<128x128xf32>, vector<64x128xf32> -> vector<64x128xf32>
    %c0_7 = arith.constant 0 : index
    %c0_8 = arith.constant 0 : index
    %c0_9 = arith.constant 0 : index
    %6 = vector.load %arg4[%c0_7, %c0_8, %c0_9] : memref<5x1x128xf32, #tpu.memory_space<vmem>>, vector<1x1x128xf32>
    %7 = vector.shape_cast %6 : vector<1x1x128xf32> to vector<1x128xf32>
    %8 = vector.broadcast %7 : vector<1x128xf32> to vector<64x128xf32>
    %9 = arith.addf %5, %8 : vector<64x128xf32>
    %cst_10 = arith.constant 0.000000e+00 : f32
    %10 = vector.broadcast %cst_10 : f32 to vector<64x128xf32>
    %11 = arith.maximumf %9, %10 : vector<64x128xf32>
    %cst_11 = arith.constant dense<0.000000e+00> : vector<128xf32>
    %12 = vector.multi_reduction <add>, %11, %cst_11 [0] : vector<64x128xf32> to vector<128xf32>
    %13 = vector.shape_cast %12 : vector<128xf32> to vector<1x128xf32>
    %cst_12 = arith.constant 6.400000e+01 : f32
    %14 = vector.broadcast %cst_12 : f32 to vector<1x128xf32>
    %15 = arith.divf %13, %14 : vector<1x128xf32>
    %c0_13 = arith.constant 0 : index
    %c0_14 = arith.constant 0 : index
    %c0_15 = arith.constant 0 : index
    %16 = vector.load %arg5[%c0_13, %c0_14, %c0_15] : memref<5x128x128xf32, #tpu.memory_space<vmem>>, vector<1x128x128xf32>
    %17 = vector.shape_cast %16 : vector<1x128x128xf32> to vector<128x128xf32>
    %cst_16 = arith.constant dense<0.000000e+00> : vector<1x128xf32>
    %18 = tpu.matmul %15, %17, %cst_16 {dimension_numbers = #tpu.dot_dimension_numbers<[1], [0], [0], [1], [0, 0, 1, 1], [], []>} : vector<1x128xf32>, vector<128x128xf32>, vector<1x128xf32> -> vector<1x128xf32>
    %c0_17 = arith.constant 0 : index
    %c0_18 = arith.constant 0 : index
    %c0_19 = arith.constant 0 : index
    %19 = vector.load %arg6[%c0_17, %c0_18, %c0_19] : memref<5x1x128xf32, #tpu.memory_space<vmem>>, vector<1x1x128xf32>
    %20 = vector.shape_cast %19 : vector<1x1x128xf32> to vector<1x128xf32>
    %21 = arith.addf %18, %20 : vector<1x128xf32>
    %cst_20 = arith.constant 0.000000e+00 : f32
    %22 = vector.broadcast %cst_20 : f32 to vector<1x128xf32>
    %23 = arith.maximumf %21, %22 : vector<1x128xf32>
    %c0_21 = arith.constant 0 : index
    %c0_22 = arith.constant 0 : index
    %c0_23 = arith.constant 0 : index
    %24 = vector.load %arg7[%c0_21, %c0_22, %c0_23] : memref<5x128x128xf32, #tpu.memory_space<vmem>>, vector<1x128x128xf32>
    %25 = vector.shape_cast %24 : vector<1x128x128xf32> to vector<128x128xf32>
    %cst_24 = arith.constant dense<0.000000e+00> : vector<1x128xf32>
    %26 = tpu.matmul %23, %25, %cst_24 {dimension_numbers = #tpu.dot_dimension_numbers<[1], [0], [0], [1], [0, 0, 1, 1], [], []>} : vector<1x128xf32>, vector<128x128xf32>, vector<1x128xf32> -> vector<1x128xf32>
    %c0_25 = arith.constant 0 : index
    %c0_26 = arith.constant 0 : index
    %c0_27 = arith.constant 0 : index
    %27 = vector.load %arg8[%c0_25, %c0_26, %c0_27] : memref<5x1x128xf32, #tpu.memory_space<vmem>>, vector<1x1x128xf32>
    %28 = vector.shape_cast %27 : vector<1x1x128xf32> to vector<1x128xf32>
    %29 = arith.addf %26, %28 : vector<1x128xf32>
    %30 = arith.negf %29 : vector<1x128xf32>
    %31 = math.exp %30 : vector<1x128xf32>
    %cst_28 = arith.constant 1.000000e+00 : f32
    %32 = vector.broadcast %cst_28 : f32 to vector<1x128xf32>
    %33 = arith.addf %32, %31 : vector<1x128xf32>
    %34 = arith.divf %32, %33 : vector<1x128xf32>
    %35 = vector.broadcast %34 : vector<1x128xf32> to vector<64x128xf32>
    %36 = arith.mulf %11, %35 : vector<64x128xf32>
    %c8 = arith.constant 8 : index
    %c0_29 = arith.constant 0 : index
    %37 = vector.load %arg12[%c8, %c0_29] : memref<80x128xf32, #tpu.memory_space<vmem>>, vector<64x128xf32>
    tpu.vector_store %arg12[%c8, %c0_29], %36 {strides = array<i32>} : memref<80x128xf32, #tpu.memory_space<vmem>>, vector<64x128xf32>,
    %cst_30 = arith.constant 0.000000e+00 : f32
    %38 = vector.broadcast %cst_30 : f32 to vector<2x128xf32>
    %c72 = arith.constant 72 : index
    %c0_31 = arith.constant 0 : index
    %39 = vector.load %arg12[%c72, %c0_31] : memref<80x128xf32, #tpu.memory_space<vmem>>, vector<2x128xf32>
    tpu.vector_store %arg12[%c72, %c0_31], %38 {strides = array<i32>} : memref<80x128xf32, #tpu.memory_space<vmem>>, vector<2x128xf32>,
    %cst_32 = arith.constant 0.000000e+00 : f32
    %40 = vector.broadcast %cst_32 : f32 to vector<16x128xf32>
    %c6 = arith.constant 6 : index
    %c0_33 = arith.constant 0 : index
    %41 = tpu.strided_load %arg12[%c6, %c0_33] {strides = array<i32: 4, 1>} : memref<80x128xf32, #tpu.memory_space<vmem>>, vector<16x128xf32>
    %c10 = arith.constant 10 : index
    %c0_34 = arith.constant 0 : index
    %42 = tpu.strided_load %arg12[%c10, %c0_34] {strides = array<i32: 4, 1>} : memref<80x128xf32, #tpu.memory_space<vmem>>, vector<16x128xf32>
    %43 = tpu.concatenate %41, %42 in 1 : vector<16x128xf32>, vector<16x128xf32> -> vector<16x256xf32>
    %c0_35 = arith.constant 0 : index
    %c0_36 = arith.constant 0 : index
    %c0_37 = arith.constant 0 : index
    %44 = vector.load %arg3[%c0_35, %c0_36, %c0_37] : memref<10x256x128xf32, #tpu.memory_space<vmem>>, vector<1x256x128xf32>
    %45 = vector.shape_cast %44 : vector<1x256x128xf32> to vector<256x128xf32>
    %cst_38 = arith.constant dense<0.000000e+00> : vector<16x128xf32>
    %46 = tpu.matmul %43, %45, %cst_38 {dimension_numbers = #tpu.dot_dimension_numbers<[1], [0], [0], [1], [0, 0, 1, 1], [], []>} : vector<16x256xf32>, vector<256x128xf32>, vector<16x128xf32> -> vector<16x128xf32>
    %47 = arith.addf %40, %46 : vector<16x128xf32>
    %c7 = arith.constant 7 : index
    %c0_39 = arith.constant 0 : index
    %48 = tpu.strided_load %arg12[%c7, %c0_39] {strides = array<i32: 4, 1>} : memref<80x128xf32, #tpu.memory_space<vmem>>, vector<16x128xf32>
    %c11 = arith.constant 11 : index
    %c0_40 = arith.constant 0 : index
    %49 = tpu.strided_load %arg12[%c11, %c0_40] {strides = array<i32: 4, 1>} : memref<80x128xf32, #tpu.memory_space<vmem>>, vector<16x128xf32>
    %50 = tpu.concatenate %48, %49 in 1 : vector<16x128xf32>, vector<16x128xf32> -> vector<16x256xf32>
    %c1 = arith.constant 1 : index
    %c0_41 = arith.constant 0 : index
    %c0_42 = arith.constant 0 : index
    %51 = vector.load %arg3[%c1, %c0_41, %c0_42] : memref<10x256x128xf32, #tpu.memory_space<vmem>>, vector<1x256x128xf32>
    %52 = vector.shape_cast %51 : vector<1x256x128xf32> to vector<256x128xf32>
    %cst_43 = arith.constant dense<0.000000e+00> : vector<16x128xf32>
    %53 = tpu.matmul %50, %52, %cst_43 {dimension_numbers = #tpu.dot_dimension_numbers<[1], [0], [0], [1], [0, 0, 1, 1], [], []>} : vector<16x256xf32>, vector<256x128xf32>, vector<16x128xf32> -> vector<16x128xf32>
    %54 = arith.addf %47, %53 : vector<16x128xf32>
    %c8_44 = arith.constant 8 : index
    %c0_45 = arith.constant 0 : index
    %55 = tpu.strided_load %arg12[%c8_44, %c0_45] {strides = array<i32: 4, 1>} : memref<80x128xf32, #tpu.memory_space<vmem>>, vector<16x128xf32>
    %c12 = arith.constant 12 : index
    %c0_46 = arith.constant 0 : index
    %56 = tpu.strided_load %arg12[%c12, %c0_46] {strides = array<i32: 4, 1>} : memref<80x128xf32, #tpu.memory_space<vmem>>, vector<16x128xf32>
    %57 = tpu.concatenate %55, %56 in 1 : vector<16x128xf32>, vector<16x128xf32> -> vector<16x256xf32>
    %c2 = arith.constant 2 : index
    %c0_47 = arith.constant 0 : index
    %c0_48 = arith.constant 0 : index
    %58 = vector.load %arg3[%c2, %c0_47, %c0_48] : memref<10x256x128xf32, #tpu.memory_space<vmem>>, vector<1x256x128xf32>
    %59 = vector.shape_cast %58 : vector<1x256x128xf32> to vector<256x128xf32>
    %cst_49 = arith.constant dense<0.000000e+00> : vector<16x128xf32>
    %60 = tpu.matmul %57, %59, %cst_49 {dimension_numbers = #tpu.dot_dimension_numbers<[1], [0], [0], [1], [0, 0, 1, 1], [], []>} : vector<16x256xf32>, vector<256x128xf32>, vector<16x128xf32> -> vector<16x128xf32>
    %61 = arith.addf %54, %60 : vector<16x128xf32>
    %c9 = arith.constant 9 : index
    %c0_50 = arith.constant 0 : index
    %62 = tpu.strided_load %arg12[%c9, %c0_50] {strides = array<i32: 4, 1>} : memref<80x128xf32, #tpu.memory_space<vmem>>, vector<16x128xf32>
    %c13 = arith.constant 13 : index
    %c0_51 = arith.constant 0 : index
    %63 = tpu.strided_load %arg12[%c13, %c0_51] {strides = array<i32: 4, 1>} : memref<80x128xf32, #tpu.memory_space<vmem>>, vector<16x128xf32>
    %64 = tpu.concatenate %62, %63 in 1 : vector<16x128xf32>, vector<16x128xf32> -> vector<16x256xf32>
    %c3 = arith.constant 3 : index
    %c0_52 = arith.constant 0 : index
    %c0_53 = arith.constant 0 : index
    %65 = vector.load %arg3[%c3, %c0_52, %c0_53] : memref<10x256x128xf32, #tpu.memory_space<vmem>>, vector<1x256x128xf32>
    %66 = vector.shape_cast %65 : vector<1x256x128xf32> to vector<256x128xf32>
    %cst_54 = arith.constant dense<0.000000e+00> : vector<16x128xf32>
    %67 = tpu.matmul %64, %66, %cst_54 {dimension_numbers = #tpu.dot_dimension_numbers<[1], [0], [0], [1], [0, 0, 1, 1], [], []>} : vector<16x256xf32>, vector<256x128xf32>, vector<16x128xf32> -> vector<16x128xf32>
    %68 = arith.addf %61, %67 : vector<16x128xf32>
    %c1_55 = arith.constant 1 : index
    %c0_56 = arith.constant 0 : index
    %c0_57 = arith.constant 0 : index
    %69 = vector.load %arg4[%c1_55, %c0_56, %c0_57] : memref<5x1x128xf32, #tpu.memory_space<vmem>>, vector<1x1x128xf32>
    %70 = vector.shape_cast %69 : vector<1x1x128xf32> to vector<1x128xf32>
    %71 = vector.broadcast %70 : vector<1x128xf32> to vector<16x128xf32>
    %72 = arith.addf %68, %71 : vector<16x128xf32>
    %cst_58 = arith.constant 0.000000e+00 : f32
    %73 = vector.broadcast %cst_58 : f32 to vector<16x128xf32>
    %74 = arith.maximumf %72, %73 : vector<16x128xf32>
    %cst_59 = arith.constant dense<0.000000e+00> : vector<128xf32>
    %75 = vector.multi_reduction <add>, %74, %cst_59 [0] : vector<16x128xf32> to vector<128xf32>
    %76 = vector.shape_cast %75 : vector<128xf32> to vector<1x128xf32>
    %cst_60 = arith.constant 1.600000e+01 : f32
    %77 = vector.broadcast %cst_60 : f32 to vector<1x128xf32>
    %78 = arith.divf %76, %77 : vector<1x128xf32>
    %c1_61 = arith.constant 1 : index
    %c0_62 = arith.constant 0 : index
    %c0_63 = arith.constant 0 : index
    %79 = vector.load %arg5[%c1_61, %c0_62, %c0_63] : memref<5x128x128xf32, #tpu.memory_space<vmem>>, vector<1x128x128xf32>
    %80 = vector.shape_cast %79 : vector<1x128x128xf32> to vector<128x128xf32>
    %cst_64 = arith.constant dense<0.000000e+00> : vector<1x128xf32>
    %81 = tpu.matmul %78, %80, %cst_64 {dimension_numbers = #tpu.dot_dimension_numbers<[1], [0], [0], [1], [0, 0, 1, 1], [], []>} : vector<1x128xf32>, vector<128x128xf32>, vector<1x128xf32> -> vector<1x128xf32>
    %c1_65 = arith.constant 1 : index
    %c0_66 = arith.constant 0 : index
    %c0_67 = arith.constant 0 : index
    %82 = vector.load %arg6[%c1_65, %c0_66, %c0_67] : memref<5x1x128xf32, #tpu.memory_space<vmem>>, vector<1x1x128xf32>
    %83 = vector.shape_cast %82 : vector<1x1x128xf32> to vector<1x128xf32>
    %84 = arith.addf %81, %83 : vector<1x128xf32>
    %cst_68 = arith.constant 0.000000e+00 : f32
    %85 = vector.broadcast %cst_68 : f32 to vector<1x128xf32>
    %86 = arith.maximumf %84, %85 : vector<1x128xf32>
    %c1_69 = arith.constant 1 : index
    %c0_70 = arith.constant 0 : index
    %c0_71 = arith.constant 0 : index
    %87 = vector.load %arg7[%c1_69, %c0_70, %c0_71] : memref<5x128x128xf32, #tpu.memory_space<vmem>>, vector<1x128x128xf32>
    %88 = vector.shape_cast %87 : vector<1x128x128xf32> to vector<128x128xf32>
    %cst_72 = arith.constant dense<0.000000e+00> : vector<1x128xf32>
    %89 = tpu.matmul %86, %88, %cst_72 {dimension_numbers = #tpu.dot_dimension_numbers<[1], [0], [0], [1], [0, 0, 1, 1], [], []>} : vector<1x128xf32>, vector<128x128xf32>, vector<1x128xf32> -> vector<1x128xf32>
    %c1_73 = arith.constant 1 : index
    %c0_74 = arith.constant 0 : index
    %c0_75 = arith.constant 0 : index
    %90 = vector.load %arg8[%c1_73, %c0_74, %c0_75] : memref<5x1x128xf32, #tpu.memory_space<vmem>>, vector<1x1x128xf32>
    %91 = vector.shape_cast %90 : vector<1x1x128xf32> to vector<1x128xf32>
    %92 = arith.addf %89, %91 : vector<1x128xf32>
    %93 = arith.negf %92 : vector<1x128xf32>
    %94 = math.exp %93 : vector<1x128xf32>
    %cst_76 = arith.constant 1.000000e+00 : f32
    %95 = vector.broadcast %cst_76 : f32 to vector<1x128xf32>
    %96 = arith.addf %95, %94 : vector<1x128xf32>
    %97 = arith.divf %95, %96 : vector<1x128xf32>
    %98 = vector.broadcast %97 : vector<1x128xf32> to vector<16x128xf32>
    %99 = arith.mulf %74, %98 : vector<16x128xf32>
    %c8_77 = arith.constant 8 : index
    %c0_78 = arith.constant 0 : index
    %100 = vector.load %arg12[%c8_77, %c0_78] : memref<80x128xf32, #tpu.memory_space<vmem>>, vector<16x128xf32>
    tpu.vector_store %arg12[%c8_77, %c0_78], %99 {strides = array<i32>} : memref<80x128xf32, #tpu.memory_space<vmem>>, vector<16x128xf32>,
    %cst_79 = arith.constant 0.000000e+00 : f32
    %101 = vector.broadcast %cst_79 : f32 to vector<1x128xf32>
    %c24 = arith.constant 24 : index
    %c0_80 = arith.constant 0 : index
    %102 = vector.load %arg12[%c24, %c0_80] : memref<80x128xf32, #tpu.memory_space<vmem>>, vector<1x128xf32>
    tpu.vector_store %arg12[%c24, %c0_80], %101 {strides = array<i32>} : memref<80x128xf32, #tpu.memory_space<vmem>>, vector<1x128xf32>,
    %cst_81 = arith.constant 0.000000e+00 : f32
    %103 = vector.broadcast %cst_81 : f32 to vector<8x128xf32>
    %c7_82 = arith.constant 7 : index
    %c0_83 = arith.constant 0 : index
    %104 = tpu.strided_load %arg12[%c7_82, %c0_83] {strides = array<i32: 2, 1>} : memref<80x128xf32, #tpu.memory_space<vmem>>, vector<8x128xf32>
    %c9_84 = arith.constant 9 : index
    %c0_85 = arith.constant 0 : index
    %105 = tpu.strided_load %arg12[%c9_84, %c0_85] {strides = array<i32: 2, 1>} : memref<80x128xf32, #tpu.memory_space<vmem>>, vector<8x128xf32>
    %106 = tpu.concatenate %104, %105 in 1 : vector<8x128xf32>, vector<8x128xf32> -> vector<8x256xf32>
    %c4 = arith.constant 4 : index
    %c0_86 = arith.constant 0 : index
    %c0_87 = arith.constant 0 : index
    %107 = vector.load %arg3[%c4, %c0_86, %c0_87] : memref<10x256x128xf32, #tpu.memory_space<vmem>>, vector<1x256x128xf32>
    %108 = vector.shape_cast %107 : vector<1x256x128xf32> to vector<256x128xf32>
    %cst_88 = arith.constant dense<0.000000e+00> : vector<8x128xf32>
    %109 = tpu.matmul %106, %108, %cst_88 {dimension_numbers = #tpu.dot_dimension_numbers<[1], [0], [0], [1], [0, 0, 1, 1], [], []>} : vector<8x256xf32>, vector<256x128xf32>, vector<8x128xf32> -> vector<8x128xf32>
    %110 = arith.addf %103, %109 : vector<8x128xf32>
    %c8_89 = arith.constant 8 : index
    %c0_90 = arith.constant 0 : index
    %111 = tpu.strided_load %arg12[%c8_89, %c0_90] {strides = array<i32: 2, 1>} : memref<80x128xf32, #tpu.memory_space<vmem>>, vector<8x128xf32>
    %c10_91 = arith.constant 10 : index
    %c0_92 = arith.constant 0 : index
    %112 = tpu.strided_load %arg12[%c10_91, %c0_92] {strides = array<i32: 2, 1>} : memref<80x128xf32, #tpu.memory_space<vmem>>, vector<8x128xf32>
    %113 = tpu.concatenate %111, %112 in 1 : vector<8x128xf32>, vector<8x128xf32> -> vector<8x256xf32>
    %c5 = arith.constant 5 : index
    %c0_93 = arith.constant 0 : index
    %c0_94 = arith.constant 0 : index
    %114 = vector.load %arg3[%c5, %c0_93, %c0_94] : memref<10x256x128xf32, #tpu.memory_space<vmem>>, vector<1x256x128xf32>
    %115 = vector.shape_cast %114 : vector<1x256x128xf32> to vector<256x128xf32>
    %cst_95 = arith.constant dense<0.000000e+00> : vector<8x128xf32>
    %116 = tpu.matmul %113, %115, %cst_95 {dimension_numbers = #tpu.dot_dimension_numbers<[1], [0], [0], [1], [0, 0, 1, 1], [], []>} : vector<8x256xf32>, vector<256x128xf32>, vector<8x128xf32> -> vector<8x128xf32>
    %117 = arith.addf %110, %116 : vector<8x128xf32>
    %c2_96 = arith.constant 2 : index
    %c0_97 = arith.constant 0 : index
    %c0_98 = arith.constant 0 : index
    %118 = vector.load %arg4[%c2_96, %c0_97, %c0_98] : memref<5x1x128xf32, #tpu.memory_space<vmem>>, vector<1x1x128xf32>
    %119 = vector.shape_cast %118 : vector<1x1x128xf32> to vector<1x128xf32>
    %120 = vector.broadcast %119 : vector<1x128xf32> to vector<8x128xf32>
    %121 = arith.addf %117, %120 : vector<8x128xf32>
    %cst_99 = arith.constant 0.000000e+00 : f32
    %122 = vector.broadcast %cst_99 : f32 to vector<8x128xf32>
    %123 = arith.maximumf %121, %122 : vector<8x128xf32>
    %cst_100 = arith.constant dense<0.000000e+00> : vector<128xf32>
    %124 = vector.multi_reduction <add>, %123, %cst_100 [0] : vector<8x128xf32> to vector<128xf32>
    %125 = vector.shape_cast %124 : vector<128xf32> to vector<1x128xf32>
    %cst_101 = arith.constant 8.000000e+00 : f32
    %126 = vector.broadcast %cst_101 : f32 to vector<1x128xf32>
    %127 = arith.divf %125, %126 : vector<1x128xf32>
    %c2_102 = arith.constant 2 : index
    %c0_103 = arith.constant 0 : index
    %c0_104 = arith.constant 0 : index
    %128 = vector.load %arg5[%c2_102, %c0_103, %c0_104] : memref<5x128x128xf32, #tpu.memory_space<vmem>>, vector<1x128x128xf32>
    %129 = vector.shape_cast %128 : vector<1x128x128xf32> to vector<128x128xf32>
    %cst_105 = arith.constant dense<0.000000e+00> : vector<1x128xf32>
    %130 = tpu.matmul %127, %129, %cst_105 {dimension_numbers = #tpu.dot_dimension_numbers<[1], [0], [0], [1], [0, 0, 1, 1], [], []>} : vector<1x128xf32>, vector<128x128xf32>, vector<1x128xf32> -> vector<1x128xf32>
    %c2_106 = arith.constant 2 : index
    %c0_107 = arith.constant 0 : index
    %c0_108 = arith.constant 0 : index
    %131 = vector.load %arg6[%c2_106, %c0_107, %c0_108] : memref<5x1x128xf32, #tpu.memory_space<vmem>>, vector<1x1x128xf32>
    %132 = vector.shape_cast %131 : vector<1x1x128xf32> to vector<1x128xf32>
    %133 = arith.addf %130, %132 : vector<1x128xf32>
    %cst_109 = arith.constant 0.000000e+00 : f32
    %134 = vector.broadcast %cst_109 : f32 to vector<1x128xf32>
    %135 = arith.maximumf %133, %134 : vector<1x128xf32>
    %c2_110 = arith.constant 2 : index
    %c0_111 = arith.constant 0 : index
    %c0_112 = arith.constant 0 : index
    %136 = vector.load %arg7[%c2_110, %c0_111, %c0_112] : memref<5x128x128xf32, #tpu.memory_space<vmem>>, vector<1x128x128xf32>
    %137 = vector.shape_cast %136 : vector<1x128x128xf32> to vector<128x128xf32>
    %cst_113 = arith.constant dense<0.000000e+00> : vector<1x128xf32>
    %138 = tpu.matmul %135, %137, %cst_113 {dimension_numbers = #tpu.dot_dimension_numbers<[1], [0], [0], [1], [0, 0, 1, 1], [], []>} : vector<1x128xf32>, vector<128x128xf32>, vector<1x128xf32> -> vector<1x128xf32>
    %c2_114 = arith.constant 2 : index
    %c0_115 = arith.constant 0 : index
    %c0_116 = arith.constant 0 : index
    %139 = vector.load %arg8[%c2_114, %c0_115, %c0_116] : memref<5x1x128xf32, #tpu.memory_space<vmem>>, vector<1x1x128xf32>
    %140 = vector.shape_cast %139 : vector<1x1x128xf32> to vector<1x128xf32>
    %141 = arith.addf %138, %140 : vector<1x128xf32>
    %142 = arith.negf %141 : vector<1x128xf32>
    %143 = math.exp %142 : vector<1x128xf32>
    %cst_117 = arith.constant 1.000000e+00 : f32
    %144 = vector.broadcast %cst_117 : f32 to vector<1x128xf32>
    %145 = arith.addf %144, %143 : vector<1x128xf32>
    %146 = arith.divf %144, %145 : vector<1x128xf32>
    %147 = vector.broadcast %146 : vector<1x128xf32> to vector<8x128xf32>
    %148 = arith.mulf %123, %147 : vector<8x128xf32>
    %c8_118 = arith.constant 8 : index
    %c0_119 = arith.constant 0 : index
    %149 = vector.load %arg12[%c8_118, %c0_119] : memref<80x128xf32, #tpu.memory_space<vmem>>, vector<8x128xf32>
    tpu.vector_store %arg12[%c8_118, %c0_119], %148 {strides = array<i32>} : memref<80x128xf32, #tpu.memory_space<vmem>>, vector<8x128xf32>,
    %cst_120 = arith.constant 0.000000e+00 : f32
    %150 = vector.broadcast %cst_120 : f32 to vector<1x128xf32>
    %c16 = arith.constant 16 : index
    %c0_121 = arith.constant 0 : index
    %151 = vector.load %arg12[%c16, %c0_121] : memref<80x128xf32, #tpu.memory_space<vmem>>, vector<1x128xf32>
    tpu.vector_store %arg12[%c16, %c0_121], %150 {strides = array<i32>} : memref<80x128xf32, #tpu.memory_space<vmem>>, vector<1x128xf32>,
    %cst_122 = arith.constant 0.000000e+00 : f32
    %152 = vector.broadcast %cst_122 : f32 to vector<4x128xf32>
    %c7_123 = arith.constant 7 : index
    %c0_124 = arith.constant 0 : index
    %153 = tpu.strided_load %arg12[%c7_123, %c0_124] {strides = array<i32: 2, 1>} : memref<80x128xf32, #tpu.memory_space<vmem>>, vector<4x128xf32>
    %c9_125 = arith.constant 9 : index
    %c0_126 = arith.constant 0 : index
    %154 = tpu.strided_load %arg12[%c9_125, %c0_126] {strides = array<i32: 2, 1>} : memref<80x128xf32, #tpu.memory_space<vmem>>, vector<4x128xf32>
    %155 = tpu.concatenate %153, %154 in 1 : vector<4x128xf32>, vector<4x128xf32> -> vector<4x256xf32>
    %c6_127 = arith.constant 6 : index
    %c0_128 = arith.constant 0 : index
    %c0_129 = arith.constant 0 : index
    %156 = vector.load %arg3[%c6_127, %c0_128, %c0_129] : memref<10x256x128xf32, #tpu.memory_space<vmem>>, vector<1x256x128xf32>
    %157 = vector.shape_cast %156 : vector<1x256x128xf32> to vector<256x128xf32>
    %cst_130 = arith.constant dense<0.000000e+00> : vector<4x128xf32>
    %158 = tpu.matmul %155, %157, %cst_130 {dimension_numbers = #tpu.dot_dimension_numbers<[1], [0], [0], [1], [0, 0, 1, 1], [], []>} : vector<4x256xf32>, vector<256x128xf32>, vector<4x128xf32> -> vector<4x128xf32>
    %159 = arith.addf %152, %158 : vector<4x128xf32>
    %c8_131 = arith.constant 8 : index
    %c0_132 = arith.constant 0 : index
    %160 = tpu.strided_load %arg12[%c8_131, %c0_132] {strides = array<i32: 2, 1>} : memref<80x128xf32, #tpu.memory_space<vmem>>, vector<4x128xf32>
    %c10_133 = arith.constant 10 : index
    %c0_134 = arith.constant 0 : index
    %161 = tpu.strided_load %arg12[%c10_133, %c0_134] {strides = array<i32: 2, 1>} : memref<80x128xf32, #tpu.memory_space<vmem>>, vector<4x128xf32>
    %162 = tpu.concatenate %160, %161 in 1 : vector<4x128xf32>, vector<4x128xf32> -> vector<4x256xf32>
    %c7_135 = arith.constant 7 : index
    %c0_136 = arith.constant 0 : index
    %c0_137 = arith.constant 0 : index
    %163 = vector.load %arg3[%c7_135, %c0_136, %c0_137] : memref<10x256x128xf32, #tpu.memory_space<vmem>>, vector<1x256x128xf32>
    %164 = vector.shape_cast %163 : vector<1x256x128xf32> to vector<256x128xf32>
    %cst_138 = arith.constant dense<0.000000e+00> : vector<4x128xf32>
    %165 = tpu.matmul %162, %164, %cst_138 {dimension_numbers = #tpu.dot_dimension_numbers<[1], [0], [0], [1], [0, 0, 1, 1], [], []>} : vector<4x256xf32>, vector<256x128xf32>, vector<4x128xf32> -> vector<4x128xf32>
    %166 = arith.addf %159, %165 : vector<4x128xf32>
    %c3_139 = arith.constant 3 : index
    %c0_140 = arith.constant 0 : index
    %c0_141 = arith.constant 0 : index
    %167 = vector.load %arg4[%c3_139, %c0_140, %c0_141] : memref<5x1x128xf32, #tpu.memory_space<vmem>>, vector<1x1x128xf32>
    %168 = vector.shape_cast %167 : vector<1x1x128xf32> to vector<1x128xf32>
    %169 = vector.broadcast %168 : vector<1x128xf32> to vector<4x128xf32>
    %170 = arith.addf %166, %169 : vector<4x128xf32>
    %cst_142 = arith.constant 0.000000e+00 : f32
    %171 = vector.broadcast %cst_142 : f32 to vector<4x128xf32>
    %172 = arith.maximumf %170, %171 : vector<4x128xf32>
    %cst_143 = arith.constant dense<0.000000e+00> : vector<128xf32>
    %173 = vector.multi_reduction <add>, %172, %cst_143 [0] : vector<4x128xf32> to vector<128xf32>
    %174 = vector.shape_cast %173 : vector<128xf32> to vector<1x128xf32>
    %cst_144 = arith.constant 4.000000e+00 : f32
    %175 = vector.broadcast %cst_144 : f32 to vector<1x128xf32>
    %176 = arith.divf %174, %175 : vector<1x128xf32>
    %c3_145 = arith.constant 3 : index
    %c0_146 = arith.constant 0 : index
    %c0_147 = arith.constant 0 : index
    %177 = vector.load %arg5[%c3_145, %c0_146, %c0_147] : memref<5x128x128xf32, #tpu.memory_space<vmem>>, vector<1x128x128xf32>
    %178 = vector.shape_cast %177 : vector<1x128x128xf32> to vector<128x128xf32>
    %cst_148 = arith.constant dense<0.000000e+00> : vector<1x128xf32>
    %179 = tpu.matmul %176, %178, %cst_148 {dimension_numbers = #tpu.dot_dimension_numbers<[1], [0], [0], [1], [0, 0, 1, 1], [], []>} : vector<1x128xf32>, vector<128x128xf32>, vector<1x128xf32> -> vector<1x128xf32>
    %c3_149 = arith.constant 3 : index
    %c0_150 = arith.constant 0 : index
    %c0_151 = arith.constant 0 : index
    %180 = vector.load %arg6[%c3_149, %c0_150, %c0_151] : memref<5x1x128xf32, #tpu.memory_space<vmem>>, vector<1x1x128xf32>
    %181 = vector.shape_cast %180 : vector<1x1x128xf32> to vector<1x128xf32>
    %182 = arith.addf %179, %181 : vector<1x128xf32>
    %cst_152 = arith.constant 0.000000e+00 : f32
    %183 = vector.broadcast %cst_152 : f32 to vector<1x128xf32>
    %184 = arith.maximumf %182, %183 : vector<1x128xf32>
    %c3_153 = arith.constant 3 : index
    %c0_154 = arith.constant 0 : index
    %c0_155 = arith.constant 0 : index
    %185 = vector.load %arg7[%c3_153, %c0_154, %c0_155] : memref<5x128x128xf32, #tpu.memory_space<vmem>>, vector<1x128x128xf32>
    %186 = vector.shape_cast %185 : vector<1x128x128xf32> to vector<128x128xf32>
    %cst_156 = arith.constant dense<0.000000e+00> : vector<1x128xf32>
    %187 = tpu.matmul %184, %186, %cst_156 {dimension_numbers = #tpu.dot_dimension_numbers<[1], [0], [0], [1], [0, 0, 1, 1], [], []>} : vector<1x128xf32>, vector<128x128xf32>, vector<1x128xf32> -> vector<1x128xf32>
    %c3_157 = arith.constant 3 : index
    %c0_158 = arith.constant 0 : index
    %c0_159 = arith.constant 0 : index
    %188 = vector.load %arg8[%c3_157, %c0_158, %c0_159] : memref<5x1x128xf32, #tpu.memory_space<vmem>>, vector<1x1x128xf32>
    %189 = vector.shape_cast %188 : vector<1x1x128xf32> to vector<1x128xf32>
    %190 = arith.addf %187, %189 : vector<1x128xf32>
    %191 = arith.negf %190 : vector<1x128xf32>
    %192 = math.exp %191 : vector<1x128xf32>
    %cst_160 = arith.constant 1.000000e+00 : f32
    %193 = vector.broadcast %cst_160 : f32 to vector<1x128xf32>
    %194 = arith.addf %193, %192 : vector<1x128xf32>
    %195 = arith.divf %193, %194 : vector<1x128xf32>
    %196 = vector.broadcast %195 : vector<1x128xf32> to vector<4x128xf32>
    %197 = arith.mulf %172, %196 : vector<4x128xf32>
    %c8_161 = arith.constant 8 : index
    %c0_162 = arith.constant 0 : index
    %198 = vector.load %arg12[%c8_161, %c0_162] : memref<80x128xf32, #tpu.memory_space<vmem>>, vector<4x128xf32>
    tpu.vector_store %arg12[%c8_161, %c0_162], %197 {strides = array<i32>} : memref<80x128xf32, #tpu.memory_space<vmem>>, vector<4x128xf32>,
    %cst_163 = arith.constant 0.000000e+00 : f32
    %199 = vector.broadcast %cst_163 : f32 to vector<1x128xf32>
    %c12_164 = arith.constant 12 : index
    %c0_165 = arith.constant 0 : index
    %200 = vector.load %arg12[%c12_164, %c0_165] : memref<80x128xf32, #tpu.memory_space<vmem>>, vector<1x128xf32>
    tpu.vector_store %arg12[%c12_164, %c0_165], %199 {strides = array<i32>} : memref<80x128xf32, #tpu.memory_space<vmem>>, vector<1x128xf32>,
    %cst_166 = arith.constant 0.000000e+00 : f32
    %201 = vector.broadcast %cst_166 : f32 to vector<2x128xf32>
    %c7_167 = arith.constant 7 : index
    %c0_168 = arith.constant 0 : index
    %202 = tpu.strided_load %arg12[%c7_167, %c0_168] {strides = array<i32: 2, 1>} : memref<80x128xf32, #tpu.memory_space<vmem>>, vector<2x128xf32>
    %c9_169 = arith.constant 9 : index
    %c0_170 = arith.constant 0 : index
    %203 = tpu.strided_load %arg12[%c9_169, %c0_170] {strides = array<i32: 2, 1>} : memref<80x128xf32, #tpu.memory_space<vmem>>, vector<2x128xf32>
    %204 = tpu.concatenate %202, %203 in 1 : vector<2x128xf32>, vector<2x128xf32> -> vector<2x256xf32>
    %c8_171 = arith.constant 8 : index
    %c0_172 = arith.constant 0 : index
    %c0_173 = arith.constant 0 : index
    %205 = vector.load %arg3[%c8_171, %c0_172, %c0_173] : memref<10x256x128xf32, #tpu.memory_space<vmem>>, vector<1x256x128xf32>
    %206 = vector.shape_cast %205 : vector<1x256x128xf32> to vector<256x128xf32>
    %cst_174 = arith.constant dense<0.000000e+00> : vector<2x128xf32>
    %207 = tpu.matmul %204, %206, %cst_174 {dimension_numbers = #tpu.dot_dimension_numbers<[1], [0], [0], [1], [0, 0, 1, 1], [], []>} : vector<2x256xf32>, vector<256x128xf32>, vector<2x128xf32> -> vector<2x128xf32>
    %208 = arith.addf %201, %207 : vector<2x128xf32>
    %c8_175 = arith.constant 8 : index
    %c0_176 = arith.constant 0 : index
    %209 = tpu.strided_load %arg12[%c8_175, %c0_176] {strides = array<i32: 2, 1>} : memref<80x128xf32, #tpu.memory_space<vmem>>, vector<2x128xf32>
    %c10_177 = arith.constant 10 : index
    %c0_178 = arith.constant 0 : index
    %210 = tpu.strided_load %arg12[%c10_177, %c0_178] {strides = array<i32: 2, 1>} : memref<80x128xf32, #tpu.memory_space<vmem>>, vector<2x128xf32>
    %211 = tpu.concatenate %209, %210 in 1 : vector<2x128xf32>, vector<2x128xf32> -> vector<2x256xf32>
    %c9_179 = arith.constant 9 : index
    %c0_180 = arith.constant 0 : index
    %c0_181 = arith.constant 0 : index
    %212 = vector.load %arg3[%c9_179, %c0_180, %c0_181] : memref<10x256x128xf32, #tpu.memory_space<vmem>>, vector<1x256x128xf32>
    %213 = vector.shape_cast %212 : vector<1x256x128xf32> to vector<256x128xf32>
    %cst_182 = arith.constant dense<0.000000e+00> : vector<2x128xf32>
    %214 = tpu.matmul %211, %213, %cst_182 {dimension_numbers = #tpu.dot_dimension_numbers<[1], [0], [0], [1], [0, 0, 1, 1], [], []>} : vector<2x256xf32>, vector<256x128xf32>, vector<2x128xf32> -> vector<2x128xf32>
    %215 = arith.addf %208, %214 : vector<2x128xf32>
    %c4_183 = arith.constant 4 : index
    %c0_184 = arith.constant 0 : index
    %c0_185 = arith.constant 0 : index
    %216 = vector.load %arg4[%c4_183, %c0_184, %c0_185] : memref<5x1x128xf32, #tpu.memory_space<vmem>>, vector<1x1x128xf32>
    %217 = vector.shape_cast %216 : vector<1x1x128xf32> to vector<1x128xf32>
    %218 = vector.broadcast %217 : vector<1x128xf32> to vector<2x128xf32>
    %219 = arith.addf %215, %218 : vector<2x128xf32>
    %cst_186 = arith.constant 0.000000e+00 : f32
    %220 = vector.broadcast %cst_186 : f32 to vector<2x128xf32>
    %221 = arith.maximumf %219, %220 : vector<2x128xf32>
    %cst_187 = arith.constant dense<0.000000e+00> : vector<128xf32>
    %222 = vector.multi_reduction <add>, %221, %cst_187 [0] : vector<2x128xf32> to vector<128xf32>
    %223 = vector.shape_cast %222 : vector<128xf32> to vector<1x128xf32>
    %cst_188 = arith.constant 2.000000e+00 : f32
    %224 = vector.broadcast %cst_188 : f32 to vector<1x128xf32>
    %225 = arith.divf %223, %224 : vector<1x128xf32>
    %c4_189 = arith.constant 4 : index
    %c0_190 = arith.constant 0 : index
    %c0_191 = arith.constant 0 : index
    %226 = vector.load %arg5[%c4_189, %c0_190, %c0_191] : memref<5x128x128xf32, #tpu.memory_space<vmem>>, vector<1x128x128xf32>
    %227 = vector.shape_cast %226 : vector<1x128x128xf32> to vector<128x128xf32>
    %cst_192 = arith.constant dense<0.000000e+00> : vector<1x128xf32>
    %228 = tpu.matmul %225, %227, %cst_192 {dimension_numbers = #tpu.dot_dimension_numbers<[1], [0], [0], [1], [0, 0, 1, 1], [], []>} : vector<1x128xf32>, vector<128x128xf32>, vector<1x128xf32> -> vector<1x128xf32>
    %c4_193 = arith.constant 4 : index
    %c0_194 = arith.constant 0 : index
    %c0_195 = arith.constant 0 : index
    %229 = vector.load %arg6[%c4_193, %c0_194, %c0_195] : memref<5x1x128xf32, #tpu.memory_space<vmem>>, vector<1x1x128xf32>
    %230 = vector.shape_cast %229 : vector<1x1x128xf32> to vector<1x128xf32>
    %231 = arith.addf %228, %230 : vector<1x128xf32>
    %cst_196 = arith.constant 0.000000e+00 : f32
    %232 = vector.broadcast %cst_196 : f32 to vector<1x128xf32>
    %233 = arith.maximumf %231, %232 : vector<1x128xf32>
    %c4_197 = arith.constant 4 : index
    %c0_198 = arith.constant 0 : index
    %c0_199 = arith.constant 0 : index
    %234 = vector.load %arg7[%c4_197, %c0_198, %c0_199] : memref<5x128x128xf32, #tpu.memory_space<vmem>>, vector<1x128x128xf32>
    %235 = vector.shape_cast %234 : vector<1x128x128xf32> to vector<128x128xf32>
    %cst_200 = arith.constant dense<0.000000e+00> : vector<1x128xf32>
    %236 = tpu.matmul %233, %235, %cst_200 {dimension_numbers = #tpu.dot_dimension_numbers<[1], [0], [0], [1], [0, 0, 1, 1], [], []>} : vector<1x128xf32>, vector<128x128xf32>, vector<1x128xf32> -> vector<1x128xf32>
    %c4_201 = arith.constant 4 : index
    %c0_202 = arith.constant 0 : index
    %c0_203 = arith.constant 0 : index
    %237 = vector.load %arg8[%c4_201, %c0_202, %c0_203] : memref<5x1x128xf32, #tpu.memory_space<vmem>>, vector<1x1x128xf32>
    %238 = vector.shape_cast %237 : vector<1x1x128xf32> to vector<1x128xf32>
    %239 = arith.addf %236, %238 : vector<1x128xf32>
    %240 = arith.negf %239 : vector<1x128xf32>
    %241 = math.exp %240 : vector<1x128xf32>
    %cst_204 = arith.constant 1.000000e+00 : f32
    %242 = vector.broadcast %cst_204 : f32 to vector<1x128xf32>
    %243 = arith.addf %242, %241 : vector<1x128xf32>
    %244 = arith.divf %242, %243 : vector<1x128xf32>
    %245 = vector.broadcast %244 : vector<1x128xf32> to vector<2x128xf32>
    %246 = arith.mulf %221, %245 : vector<2x128xf32>
    %c0_205 = arith.constant 0 : index
    %c0_206 = arith.constant 0 : index
    %247 = vector.load %arg9[%c0_205, %c0_206] : memref<128x128xf32, #tpu.memory_space<vmem>>, vector<128x128xf32>
    %cst_207 = arith.constant dense<0.000000e+00> : vector<2x128xf32>
    %248 = tpu.matmul %246, %247, %cst_207 {dimension_numbers = #tpu.dot_dimension_numbers<[1], [0], [0], [1], [0, 0, 1, 1], [], []>} : vector<2x128xf32>, vector<128x128xf32>, vector<2x128xf32> -> vector<2x128xf32>
    %c0_208 = arith.constant 0 : index
    %c0_209 = arith.constant 0 : index
    %249 = vector.load %arg10[%c0_208, %c0_209] : memref<1x128xf32, #tpu.memory_space<vmem>>, vector<1x128xf32>
    %250 = vector.broadcast %249 : vector<1x128xf32> to vector<2x128xf32>
    %251 = arith.addf %248, %250 : vector<2x128xf32>
    %c0_210 = arith.constant 0 : index
    %c0_211 = arith.constant 0 : index
    %c0_212 = arith.constant 0 : index
    %252 = vector.load %arg11[%c0_210, %c0_211, %c0_212] : memref<1x2x128xf32, #tpu.memory_space<vmem>>, vector<1x2x128xf32>
    %253 = vector.shape_cast %252 : vector<1x2x128xf32> to vector<2x128xf32>
    %254 = vector.shape_cast %251 : vector<2x128xf32> to vector<1x2x128xf32>
    tpu.vector_store %arg11[%c0_210, %c0_211, %c0_212], %254 {strides = array<i32>} : memref<1x2x128xf32, #tpu.memory_space<vmem>>, vector<1x2x128xf32>,
    return
  }
  func.func @transform_0(%arg0: i32) -> (i32, i32, i32) {
    %c0_i32 = arith.constant 0 : i32
    %c0_i32_0 = arith.constant 0 : i32
    %c0_i32_1 = arith.constant 0 : i32
    return %arg0, %c0_i32, %c0_i32_0 : i32, i32, i32
  }
  func.func @transform_1(%arg0: i32) -> (i32, i32) {
    %c0_i32 = arith.constant 0 : i32
    %c0_i32_0 = arith.constant 0 : i32
    %c0_i32_1 = arith.constant 0 : i32
    return %c0_i32, %c0_i32_0 : i32, i32
  }
  func.func @transform_2(%arg0: i32) -> (i32, i32, i32) {
    %c0_i32 = arith.constant 0 : i32
    %c0_i32_0 = arith.constant 0 : i32
    %c0_i32_1 = arith.constant 0 : i32
    %c0_i32_2 = arith.constant 0 : i32
    return %c0_i32, %c0_i32_0, %c0_i32_1 : i32, i32, i32
  }
  func.func @transform_3(%arg0: i32) -> (i32, i32, i32) {
    %c0_i32 = arith.constant 0 : i32
    %c0_i32_0 = arith.constant 0 : i32
    %c0_i32_1 = arith.constant 0 : i32
    %c0_i32_2 = arith.constant 0 : i32
    return %c0_i32, %c0_i32_0, %c0_i32_1 : i32, i32, i32
  }
  func.func @transform_4(%arg0: i32) -> (i32, i32, i32) {
    %c0_i32 = arith.constant 0 : i32
    %c0_i32_0 = arith.constant 0 : i32
    %c0_i32_1 = arith.constant 0 : i32
    %c0_i32_2 = arith.constant 0 : i32
    return %c0_i32, %c0_i32_0, %c0_i32_1 : i32, i32, i32
  }
  func.func @transform_5(%arg0: i32) -> (i32, i32, i32) {
    %c0_i32 = arith.constant 0 : i32
    %c0_i32_0 = arith.constant 0 : i32
    %c0_i32_1 = arith.constant 0 : i32
    %c0_i32_2 = arith.constant 0 : i32
    return %c0_i32, %c0_i32_0, %c0_i32_1 : i32, i32, i32
  }
  func.func @transform_6(%arg0: i32) -> (i32, i32, i32) {
    %c0_i32 = arith.constant 0 : i32
    %c0_i32_0 = arith.constant 0 : i32
    %c0_i32_1 = arith.constant 0 : i32
    %c0_i32_2 = arith.constant 0 : i32
    return %c0_i32, %c0_i32_0, %c0_i32_1 : i32, i32, i32
  }
  func.func @transform_7(%arg0: i32) -> (i32, i32, i32) {
    %c0_i32 = arith.constant 0 : i32
    %c0_i32_0 = arith.constant 0 : i32
    %c0_i32_1 = arith.constant 0 : i32
    %c0_i32_2 = arith.constant 0 : i32
    return %c0_i32, %c0_i32_0, %c0_i32_1 : i32, i32, i32
  }
  func.func @transform_8(%arg0: i32) -> (i32, i32) {
    %c0_i32 = arith.constant 0 : i32
    %c0_i32_0 = arith.constant 0 : i32
    %c0_i32_1 = arith.constant 0 : i32
    return %c0_i32, %c0_i32_0 : i32, i32
  }
  func.func @transform_9(%arg0: i32) -> (i32, i32) {
    %c0_i32 = arith.constant 0 : i32
    %c0_i32_0 = arith.constant 0 : i32
    %c0_i32_1 = arith.constant 0 : i32
    return %c0_i32, %c0_i32_0 : i32, i32
  }
  func.func @transform_10(%arg0: i32) -> (i32, i32, i32) {
    %c0_i32 = arith.constant 0 : i32
    %c0_i32_0 = arith.constant 0 : i32
    %c0_i32_1 = arith.constant 0 : i32
    return %arg0, %c0_i32, %c0_i32_0 : i32, i32, i32
  }
}

</mosaic_0001>

<bundles_post_ra>
// kernel: sig_extract_forward.1
= control target key start
LH: loop header
LB: loop body
LE: loop exit
PB: predicated region body
PF: predicated region fallthrough
CT: control target
= control target key end

     0   :  { %s4360_s13 = smov 0   ;;  %s6281_s0 = inlined_call_operand.vmem [shape: f32[2,64,128], index: 0, kind: input, shape index: {}]   ;;  %s6282_s1 = inlined_call_operand.vmem [shape: f32[128,128], index: 1, kind: input, shape index: {}]   ;;  %s6283_s2 = inlined_call_operand.vmem [shape: f32[10,256,128], index: 2, kind: input, shape index: {}]   ;;  %s6284_s3 = inlined_call_operand.vmem [shape: f32[5,1,128], index: 3, kind: input, shape index: {}]   ;;  %s6285_s4 = inlined_call_operand.vmem [shape: f32[5,128,128], index: 4, kind: input, shape index: {}]   ;;  %s6286_s5 = inlined_call_operand.vmem [shape: f32[5,1,128], index: 5, kind: input, shape index: {}]   ;;  %s6287_s6 = inlined_call_operand.vmem [shape: f32[5,128,128], index: 6, kind: input, shape index: {}]   ;;  %s6288_s7 = inlined_call_operand.vmem [shape: f32[5,1,128], index: 7, kind: input, shape index: {}]   ;;  %s6289_s8 = inlined_call_operand.vmem [shape: f32[128,128], index: 8, kind: input, shape index: {}]   ;;  %s6290_s9 = inlined_call_operand.vmem [shape: f32[1,128], index: 9, kind: input, shape index: {}]   ;;  %s6291_s10 = inlined_call_operand.vmem [shape: f32[2,2,128], index: 10, kind: output, shape index: {}]  }
   0x1 LB: > { %s2811_s14 = sadd.s32 4294967295, %s4301_s13   ;;  %p2815_p0 = scmp.ge.s32.totalorder %s4301_s13, 1  ;;  %s4301_s13 = sphi %s4360_s13, %s20_s13  }
   0x2   : > { %p312_p1 = scmp.lt.s32.totalorder %s4301_s13, 3 }
   0x4   : > { %p313_p2 = pnand %p2815_p0, %p312_p1 }
   0x5   : > { %p349_p3 = scmp.lt.s32.totalorder (!%p313_p2), %s2811_s14, 1 }
   0x6   : > { %316 = sbr.rel (%p313_p2) target bundleno = 3559 (0xde7), region = 60 }
   0xb   : > { %v382_v0 = vld [vmem:[%s6282_s1 + $0x78] sm:$0xff]  ;;  %v381_v1 = vld [vmem:[%s6282_s1 + $0x70] sm:$0xff]  ;;  %v380_v2 = vld [vmem:[%s6282_s1 + $0x68] sm:$0xff]  ;;  %s6293_s14 = smov (!%p349_p3, %s2811_s14), 1  ;;  %v4303_v24 = vmov 0.0   ;;  %vm4304_vm0 = vmmov 0  }
   0xc   : > { %3834 = vmatprep.subr.mxu0 %v382_v0  ;;  %v379_v3 = vld [vmem:[%s6282_s1 + $0x60] sm:$0xff]  ;;  %s3260_s23 = sshll.u32 %s6293_s14, 6  ;;  %v378_v4 = vld [vmem:[%s6282_s1 + $0x58] sm:$0xff]  ;;  %v377_v6 = vld [vmem:[%s6282_s1 + $0x50] sm:$0xff]  ;;  %3878 = vmatprep.subr.mxu1 %v4303_v24  ;;  %358 = vst [vmem:[#allocation2] sm:$0xff] %v4303_v24  ;;  %vm2042_vm1 = vcmask 1043456  }
   0xd   : > { %3835 = vmatpush3.msra.mxu0 %v382_v0  ;;  %s4386_s26 = scalar_lea.vmem %s6281_s0, %s3260_s23  ;;  %v376_v7 = vld [vmem:[%s6282_s1 + $0x48] sm:$0xff]  ;;  %v375_v8 = vld [vmem:[%s6282_s1 + $0x40] sm:$0xff]  ;;  %v374_v9 = vld [vmem:[%s6282_s1 + $0x38] sm:$0xff]  ;;  %719 = vst [vmem:[#allocation2 + $0x48] sm:$0x3] %v4303_v24  ;;  %3910 = vmatprep.mubr.msk.f32.mxu1 %vm4304_vm0, %v4303_v24  ;;  %vm2464_vm2 = vcmask 1041408  }
   0xe   : > { %3836 = vmatprep.subr.mxu0 %v381_v1  ;;  %v359_v5 = vld [vmem:[%s4386_s26] sm:$0xff]  ;;  %v373_v10 = vld [vmem:[%s6282_s1 + $0x30] sm:$0xff]  ;;  %v372_v11 = vld [vmem:[%s6282_s1 + $0x28] sm:$0xff]  ;;  %s2818_s30 = sshll.u32 %s6293_s14, 1 }
   0xf   : > { %3837 = vmatpush3.msra.mxu0 %v381_v1  ;;  %3866 = vmatprep.mubr.f32.mxu0 %v359_v5  ;;  %v371_v12 = vld [vmem:[%s6282_s1 + $0x20] sm:$0xff]  ;;  %v370_v13 = vld [vmem:[%s6282_s1 + $0x18] sm:$0xff]  ;;  %v369_v14 = vld [vmem:[%s6282_s1 + $0x10] sm:$0xff]  ;;  %s357_s17 = scalar_lea.vmem %s6291_s10, %s2818_s30 }
  0x10   : > { %3838 = vmatprep.subr.mxu0 %v380_v2  ;;  %v368_v15 = vld [vmem:[%s6282_s1 + $0x8] sm:$0xff]  ;;  %v367_v16 = vld [vmem:[%s6282_s1] sm:$0xff]  ;;  %v361_v18 = vld [vmem:[%s4386_s26 + $0x10] sm:$0xff] }
  0x11   : > { %3839 = vmatpush3.msra.mxu0 %v380_v2  ;;  %v360_v17 = vld [vmem:[%s4386_s26 + $0x8] sm:$0xff]  ;;  %v362_v19 = vld [vmem:[%s4386_s26 + $0x18] sm:$0xff]  ;;  %v363_v20 = vld [vmem:[%s4386_s26 + $0x20] sm:$0xff] }
  0x12   : > { %3840 = vmatprep.subr.mxu0 %v379_v3  ;;  %v364_v21 = vld [vmem:[%s4386_s26 + $0x28] sm:$0xff]  ;;  %v365_v22 = vld [vmem:[%s4386_s26 + $0x30] sm:$0xff]  ;;  %v366_v23 = vld [vmem:[%s4386_s26 + $0x38] sm:$0xff] }
  0x13   : > { %3841 = vmatpush3.msra.mxu0 %v379_v3  ;;  %v533_v25 = vld [vmem:[%s6285_s4 + $0x78] sm:$0xff]  ;;  %v532_v26 = vld [vmem:[%s6285_s4 + $0x70] sm:$0xff]  ;;  %v531_v27 = vld [vmem:[%s6285_s4 + $0x68] sm:$0xff] }
  0x14   : > { %3842 = vmatprep.subr.mxu0 %v378_v4  ;;  %3879 = vmatpush3.msra.mxu1 %v533_v25  ;;  %v530_v28 = vld [vmem:[%s6285_s4 + $0x60] sm:$0xff]  ;;  %v529_v29 = vld [vmem:[%s6285_s4 + $0x58] sm:$0xff]  ;;  %v528_v30 = vld [vmem:[%s6285_s4 + $0x50] sm:$0xff] }
  0x15   : > { %3843 = vmatpush3.msra.mxu0 %v378_v4  ;;  %3880 = vmatprep.subr.mxu1 %v4303_v24  ;;  %v527_v31 = vld [vmem:[%s6285_s4 + $0x48] sm:$0xff]  ;;  %v526_v32 = vld [vmem:[%s6285_s4 + $0x40] sm:$0xff]  ;;  %v525_v33 = vld [vmem:[%s6285_s4 + $0x38] sm:$0xff] }
  0x16   : > { %3844 = vmatprep.subr.mxu0 %v377_v6  ;;  %3881 = vmatpush3.msra.mxu1 %v532_v26  ;;  %v524_v34 = vld [vmem:[%s6285_s4 + $0x30] sm:$0xff]  ;;  %v523_v35 = vld [vmem:[%s6285_s4 + $0x28] sm:$0xff]  ;;  %v522_v36 = vld [vmem:[%s6285_s4 + $0x20] sm:$0xff] }
  0x17   : > { %3845 = vmatpush3.msra.mxu0 %v377_v6  ;;  %3882 = vmatprep.subr.mxu1 %v4303_v24  ;;  %v521_v37 = vld [vmem:[%s6285_s4 + $0x18] sm:$0xff]  ;;  %v520_v38 = vld [vmem:[%s6285_s4 + $0x10] sm:$0xff]  ;;  %v519_v39 = vld [vmem:[%s6285_s4 + $0x8] sm:$0xff] }
  0x18   : > { %3846 = vmatprep.subr.mxu0 %v376_v7  ;;  %3883 = vmatpush3.msra.mxu1 %v531_v27  ;;  %v518_v40 = vld [vmem:[%s6285_s4] sm:$0xff]  ;;  %v621_v41 = vld [vmem:[%s6287_s6 + $0x78] sm:$0xff]  ;;  %v620_v42 = vld [vmem:[%s6287_s6 + $0x70] sm:$0xff] }
  0x19   : > { %3847 = vmatpush3.msra.mxu0 %v376_v7  ;;  %3884 = vmatprep.subr.mxu1 %v4303_v24  ;;  %v619_v43 = vld [vmem:[%s6287_s6 + $0x68] sm:$0xff]  ;;  %v618_v44 = vld [vmem:[%s6287_s6 + $0x60] sm:$0xff]  ;;  %v617_v45 = vld [vmem:[%s6287_s6 + $0x58] sm:$0xff] }
  0x1a   : > { %3848 = vmatprep.subr.mxu0 %v375_v8  ;;  %3885 = vmatpush3.msra.mxu1 %v530_v28  ;;  %v616_v46 = vld [vmem:[%s6287_s6 + $0x50] sm:$0xff]  ;;  %v615_v47 = vld [vmem:[%s6287_s6 + $0x48] sm:$0xff]  ;;  %v614_v48 = vld [vmem:[%s6287_s6 + $0x40] sm:$0xff] }
  0x1b   : > { %3849 = vmatpush3.msra.mxu0 %v375_v8  ;;  %3886 = vmatprep.subr.mxu1 %v4303_v24  ;;  %v613_v49 = vld [vmem:[%s6287_s6 + $0x38] sm:$0xff]  ;;  %v612_v50 = vld [vmem:[%s6287_s6 + $0x30] sm:$0xff]  ;;  %v611_v51 = vld [vmem:[%s6287_s6 + $0x28] sm:$0xff] }
  0x1c   : > { %3850 = vmatprep.subr.mxu0 %v374_v9  ;;  %3887 = vmatpush3.msra.mxu1 %v529_v29  ;;  %v610_v52 = vld [vmem:[%s6287_s6 + $0x20] sm:$0xff]  ;;  %v609_v53 = vld [vmem:[%s6287_s6 + $0x18] sm:$0xff] }
  0x1d   : > { %3851 = vmatpush3.msra.mxu0 %v374_v9  ;;  %3888 = vmatprep.subr.mxu1 %v4303_v24  ;;  %v2819_v55 = vld [vmem:[%s6284_s3] ss:$0 sm:$0xff] }
  0x1e   : > { %3852 = vmatprep.subr.mxu0 %v373_v10  ;;  %3889 = vmatpush3.msra.mxu1 %v528_v30  ;;  %v608_v30 = vld [vmem:[%s6287_s6 + $0x10] sm:$0xff] }
  0x1f   : > { %3853 = vmatpush3.msra.mxu0 %v373_v10  ;;  %3890 = vmatprep.subr.mxu1 %v4303_v24 }
  0x20   : > { %3854 = vmatprep.subr.mxu0 %v372_v11  ;;  %3891 = vmatpush3.msra.mxu1 %v527_v31  ;;  %v607_v31 = vld [vmem:[%s6287_s6 + $0x8] sm:$0xff] }
  0x21   : > { %3855 = vmatpush3.msra.mxu0 %v372_v11  ;;  %3892 = vmatprep.subr.mxu1 %v4303_v24 }
  0x22   : > { %3856 = vmatprep.subr.mxu0 %v371_v12  ;;  %3893 = vmatpush3.msra.mxu1 %v526_v32  ;;  %v606_v32 = vld [vmem:[%s6287_s6] sm:$0xff] }
  0x23   : > { %3857 = vmatpush3.msra.mxu0 %v371_v12  ;;  %3894 = vmatprep.subr.mxu1 %v4303_v24 }
  0x24   : > { %3858 = vmatprep.subr.mxu0 %v370_v13  ;;  %3895 = vmatpush3.msra.mxu1 %v525_v33  ;;  %v534_v33 = vld [vmem:[%s6286_s5] sm:$0x1] }
  0x25   : > { %3859 = vmatpush3.msra.mxu0 %v370_v13  ;;  %3896 = vmatprep.subr.mxu1 %v4303_v24 }
  0x26   : > { %3860 = vmatprep.subr.mxu0 %v369_v14  ;;  %3897 = vmatpush3.msra.mxu1 %v524_v34 }
  0x27   : > { %3861 = vmatpush3.msra.mxu0 %v369_v14  ;;  %3898 = vmatprep.subr.mxu1 %v4303_v24 }
  0x28   : > { %3862 = vmatprep.subr.mxu0 %v368_v15  ;;  %3899 = vmatpush3.msra.mxu1 %v523_v35 }
  0x29   : > { %3863 = vmatpush3.msra.mxu0 %v368_v15  ;;  %3900 = vmatprep.subr.mxu1 %v4303_v24 }
  0x2a   : > { %3864 = vmatprep.subr.mxu0 %v367_v16  ;;  %3901 = vmatpush3.msra.mxu1 %v522_v36 }
  0x2b   : > { %3865 = vmatpush3.msra.mxu0 %v367_v16  ;;  %3902 = vmatprep.subr.mxu1 %v4303_v24 }
  0x2c   : > { %3867 = vmatmul.mubr.f32.vlgmr.msra.gmra.mxu0 %v360_v17  ;;  %3913 = vmatprep.subr.mxu0 %v4303_v24 }
  0x2d   : > { %3869 = vmatprep.mubr.f32.mxu0 %v361_v18  ;;  %3903 = vmatpush3.msra.mxu1 %v521_v37 }
  0x2e   : > { %3904 = vmatprep.subr.mxu1 %v4303_v24  ;;  %3914 = vmatpush3.msra.mxu0 %v621_v41  ;;  %v743_v41 = vld [vmem:[%s6283_s2 + $0x78] sm:$0xff] }
  0x2f   : > { %3905 = vmatpush3.msra.mxu1 %v520_v38  ;;  %3915 = vmatprep.subr.mxu0 %v4303_v24  ;;  %v2852_v38 = vld [vmem:[%s6283_s2 + $0x1f8] sm:$0xff] }
  0x30   : > { %3870 = vmatmul.mubr.f32.gmra.mxu0 %v362_v19  ;;  %3906 = vmatprep.subr.mxu1 %v4303_v24 }
  0x31   : > { %3872 = vmatprep.mubr.f32.mxu0 %v363_v20  ;;  %3907 = vmatpush3.msra.mxu1 %v519_v39  ;;  %v759_v39 = vld [vmem:[%s6283_s2 + $0xf8] sm:$0xff] }
  0x32   : > { %3908 = vmatprep.subr.mxu1 %v4303_v24  ;;  %3916 = vmatpush3.msra.mxu0 %v620_v42  ;;  %v2851_v42 = vld [vmem:[%s6283_s2 + $0x1f0] sm:$0xff] }
  0x33   : > { %3909 = vmatpush3.msra.mxu1 %v518_v40  ;;  %3917 = vmatprep.subr.mxu0 %v4303_v24  ;;  %v2836_v40 = vld [vmem:[%s6283_s2 + $0x178] sm:$0xff] }
  0x34   : > { %3873 = vmatmul.mubr.f32.gmra.mxu0 %v364_v21  ;;  %3319 = vmatprep.subr.mxu1 %v2852_v38  ;;  %v732_v38 = vld [vmem:[%s6283_s2 + $0x20] sm:$0xff] }
  0x35   : > { %3875 = vmatprep.mubr.f32.mxu0 %v365_v22  ;;  %3918 = vmatpush3.msra.mxu0 %v619_v43  ;;  %v758_v43 = vld [vmem:[%s6283_s2 + $0xf0] sm:$0xff] }
  0x36   : > { %3919 = vmatprep.subr.mxu0 %v4303_v24 }
  0x37   : > { %3920 = vmatpush3.msra.mxu0 %v618_v44  ;;  %v2835_v44 = vld [vmem:[%s6283_s2 + $0x170] sm:$0xff] }
  0x38   : > { %3876 = vmatmul.mubr.f32.gmra.mxu0 %v366_v23  ;;  %3921 = vmatprep.subr.mxu0 %v4303_v24 }
  0x39   : > { %3945 = vmatprep.mubr.msk.f32.mxu0 %vm4304_vm0, %v4303_v24  ;;  %3922 = vmatpush3.msra.mxu0 %v617_v45  ;;  %v742_v45 = vld [vmem:[%s6283_s2 + $0x70] sm:$0xff] }
  0x3a   : > { %3923 = vmatprep.subr.mxu0 %v4303_v24 }
  0x3b   : > { %3924 = vmatpush3.msra.mxu0 %v616_v46  ;;  %v2850_v46 = vld [vmem:[%s6283_s2 + $0x1e8] sm:$0xff] }
  0x3c   : > { %3925 = vmatprep.subr.mxu0 %v4303_v24 }
  0x3d   : > { %3926 = vmatpush3.msra.mxu0 %v615_v47  ;;  %v757_v47 = vld [vmem:[%s6283_s2 + $0xe8] sm:$0xff] }
  0x3e   : > { %3927 = vmatprep.subr.mxu0 %v4303_v24 }
  0x3f   : > { %3928 = vmatpush3.msra.mxu0 %v614_v48  ;;  %v2834_v48 = vld [vmem:[%s6283_s2 + $0x168] sm:$0xff] }
  0x40   : > { %3929 = vmatprep.subr.mxu0 %v4303_v24 }
  0x41   : > { %3930 = vmatpush3.msra.mxu0 %v613_v49  ;;  %v741_v49 = vld [vmem:[%s6283_s2 + $0x68] sm:$0xff] }
  0x42   : > { %3931 = vmatprep.subr.mxu0 %v4303_v24 }
  0x43   : > { %3932 = vmatpush3.msra.mxu0 %v612_v50  ;;  %v2849_v50 = vld [vmem:[%s6283_s2 + $0x1e0] sm:$0xff] }
  0x44   : > { %3933 = vmatprep.subr.mxu0 %v4303_v24 }
  0x45   : > { %3934 = vmatpush3.msra.mxu0 %v611_v51  ;;  %v756_v51 = vld [vmem:[%s6283_s2 + $0xe0] sm:$0xff] }
  0x46   : > { %3935 = vmatprep.subr.mxu0 %v4303_v24 }
  0x47   : > { %3936 = vmatpush3.msra.mxu0 %v610_v52  ;;  %v2833_v52 = vld [vmem:[%s6283_s2 + $0x160] sm:$0xff] }
  0x48   : > { %3937 = vmatprep.subr.mxu0 %v4303_v24 }
  0x49   : > { %3938 = vmatpush3.msra.mxu0 %v609_v53  ;;  %v740_v53 = vld [vmem:[%s6283_s2 + $0x60] sm:$0xff] }
  0x4a   : > { %3939 = vmatprep.subr.mxu0 %v4303_v24 }
  0x4b   : > { %3940 = vmatpush3.msra.mxu0 %v608_v30  ;;  %v734_v30 = vld [vmem:[%s6283_s2 + $0x30] sm:$0xff] }
  0x4c   : > { %3941 = vmatprep.subr.mxu0 %v4303_v24 }
  0x4d   : > { %3942 = vmatpush3.msra.mxu0 %v607_v31  ;;  %v2842_v31 = vld [vmem:[%s6283_s2 + $0x1a8] sm:$0xff] }
  0x4e   : > { %3943 = vmatprep.subr.mxu0 %v4303_v24 }
  0x4f   : > { %3944 = vmatpush3.msra.mxu0 %v606_v32  ;;  %v749_v32 = vld [vmem:[%s6283_s2 + $0xa8] sm:$0xff] }
  0x50   : > { %3357 = vmatprep.subr.mxu0 %v759_v39  ;;  %v2840_v39 = vld [vmem:[%s6283_s2 + $0x198] sm:$0xff] }
  0xec   : > { %v3868_v54 = vpop.f32.mrf.mxu0 }
  0xed   : > { %v4558_v57 = vadd.f32 %v3868_v54, %v2819_v55  ;;  %v2848_v54 = vld [vmem:[%s6283_s2 + $0x1d8] sm:$0xff] }
  0xee   : > { %v456_v56 = vpop.f32.mrf.mxu0 }
  0xef   : > { %v4560_v58 = vadd.f32 %v2819_v55, %v456_v56  ;;  %v496_v62 = vmax.f32 %v4558_v57, 0.0  ;;  %v2832_v56 = vld [vmem:[%s6283_s2 + $0x158] sm:$0xff] }
  0xf0   : > { %v3871_v59 = vpop.f32.mrf.mxu0  ;;  %v2868_v57 = vld [vmem:[%s6283_s2 + $0x278] sm:$0xff] }
  0xf1   : > { %v495_v60 = vmax.f32 %v4560_v58, 0.0  ;;  %v4564_v63 = vadd.f32 %v3871_v59, %v2819_v55  ;;  %v739_v59 = vld [vmem:[%s6283_s2 + $0x58] sm:$0xff] }
  0xf2   : > { %v466_v61 = vpop.f32.mrf.mxu0 }
  0xf3   : > { %v4566_v0 = vadd.f32 %v2819_v55, %v466_v61  ;;  %v503_v2 = vadd.f32 %v496_v62, %v495_v60  ;;  %v498_v5 = vmax.f32 %v4564_v63, 0.0  ;;  %v2847_v61 = vld [vmem:[%s6283_s2 + $0x1d0] sm:$0xff] }
  0xf4   : > { %v3874_v1 = vpop.f32.mrf.mxu0 }
  0xf5   : > { %v497_v3 = vmax.f32 %v4566_v0, 0.0  ;;  %v4576_v7 = vadd.f32 %v3874_v1, %v2819_v55  ;;  %v754_v1 = vld [vmem:[%s6283_s2 + $0xd0] sm:$0xff] }
  0xf6   : > { %v476_v4 = vpop.f32.mrf.mxu0 }
  0xf7   : > { %v504_v6 = vadd.f32 %v503_v2, %v497_v3  ;;  %v4578_v8 = vadd.f32 %v2819_v55, %v476_v4  ;;  %v500_v13 = vmax.f32 %v4576_v7, 0.0  ;;  %v2831_v2 = vld [vmem:[%s6283_s2 + $0x150] sm:$0xff] }
  0xf8   : > { %v3877_v9 = vpop.f32.mrf.mxu0  ;;  %v738_v4 = vld [vmem:[%s6283_s2 + $0x50] sm:$0xff] }
  0xf9   : > { %v499_v10 = vmax.f32 %v4578_v8, 0.0  ;;  %v505_v11 = vadd.f32 %v504_v6, %v498_v5  ;;  %v4586_v15 = vadd.f32 %v3877_v9, %v2819_v55  ;;  %v2846_v6 = vld [vmem:[%s6283_s2 + $0x1c8] sm:$0xff]  ;;  %v2915_v7 = vld [vmem:[%s6283_s2 + $0x3f0] sm:$0xff] }
  0xfa   : > { %v486_v12 = vpop.f32.mrf.mxu0  ;;  %v753_v9 = vld [vmem:[%s6283_s2 + $0xc8] sm:$0xff] }
  0xfb   : > { %v506_v14 = vadd.f32 %v505_v11, %v499_v10  ;;  %v4588_v16 = vadd.f32 %v2819_v55, %v486_v12  ;;  %v502_v19 = vmax.f32 %v4586_v15, 0.0  ;;  %v755_v55 = vld [vmem:[%s6283_s2 + $0xd8] sm:$0xff]  ;;  %v2830_v11 = vld [vmem:[%s6283_s2 + $0x148] sm:$0xff] }
  0xfc   : > { %v737_v12 = vld [vmem:[%s6283_s2 + $0x48] sm:$0xff] }
  0xfd   : > { %v501_v17 = vmax.f32 %v4588_v16, 0.0  ;;  %v507_v18 = vadd.f32 %v506_v14, %v500_v13  ;;  %v2845_v14 = vld [vmem:[%s6283_s2 + $0x1c0] sm:$0xff] }
  0xff   : > { %v508_v20 = vadd.f32 %v507_v18, %v501_v17  ;;  %v752_v18 = vld [vmem:[%s6283_s2 + $0xc0] sm:$0xff] }
 0x101   : > { %v509_v21 = vadd.f32 %v508_v20, %v502_v19  ;;  %v2829_v20 = vld [vmem:[%s6283_s2 + $0x140] sm:$0xff] }
 0x103   : > { %v510_v22 = vrot.slane %v509_v21, 4 }
 0x105   : > { %v511_v23 = vadd.f32 %v510_v22, %v509_v21  ;;  %v736_v21 = vld [vmem:[%s6283_s2 + $0x40] sm:$0xff]  ;;  %v2844_v22 = vld [vmem:[%s6283_s2 + $0x1b8] sm:$0xff] }
 0x107   : > { %v512_v25 = vrot.slane %v511_v23, 2 }
 0x109   : > { %v513_v26 = vadd.f32 %v512_v25, %v511_v23  ;;  %v751_v23 = vld [vmem:[%s6283_s2 + $0xb8] sm:$0xff] }
 0x10a   : > { %v2828_v25 = vld [vmem:[%s6283_s2 + $0x138] sm:$0xff] }
 0x10b   : > { %v514_v27 = vrot.slane %v513_v26, 1 }
 0x10d   : > { %v515_v28 = vadd.f32 %v514_v27, %v513_v26  ;;  %v735_v26 = vld [vmem:[%s6283_s2 + $0x38] sm:$0xff]  ;;  %v2843_v27 = vld [vmem:[%s6283_s2 + $0x1b0] sm:$0xff] }
 0x10f   : > { %v517_v29 = vmul.f32 0.015625, %v515_v28  ;;  %v750_v28 = vld [vmem:[%s6283_s2 + $0xb0] sm:$0xff] }
 0x111   : > { %3911 = vmatmul.mubr.f32.vlgmr.msra.gmra.mxu1 %v517_v29  ;;  %v2827_v29 = vld [vmem:[%s6283_s2 + $0x130] sm:$0xff] }
 0x112   : > { %3320 = vmatpush3.msra.mxu1 %v2836_v40  ;;  %v747_v40 = vld [vmem:[%s6283_s2 + $0x98] sm:$0xff] }
 0x113   : > { %3321 = vmatprep.subr.mxu1 %v2851_v42  ;;  %v731_v42 = vld [vmem:[%s6283_s2 + $0x18] sm:$0xff] }
 0x114   : > { %3322 = vmatpush3.msra.mxu1 %v2835_v44  ;;  %v746_v44 = vld [vmem:[%s6283_s2 + $0x90] sm:$0xff] }
 0x115   : > { %3323 = vmatprep.subr.mxu1 %v2850_v46  ;;  %v730_v46 = vld [vmem:[%s6283_s2 + $0x10] sm:$0xff] }
 0x116   : > { %3324 = vmatpush3.msra.mxu1 %v2834_v48  ;;  %v745_v48 = vld [vmem:[%s6283_s2 + $0x88] sm:$0xff] }
 0x117   : > { %3325 = vmatprep.subr.mxu1 %v2849_v50  ;;  %v729_v50 = vld [vmem:[%s6283_s2 + $0x8] sm:$0xff] }
 0x118   : > { %3326 = vmatpush3.msra.mxu1 %v2833_v52  ;;  %v744_v52 = vld [vmem:[%s6283_s2 + $0x80] sm:$0xff] }
 0x119   : > { %3327 = vmatprep.subr.mxu1 %v2848_v54  ;;  %v728_v54 = vld [vmem:[%s6283_s2] sm:$0xff] }
 0x11a   : > { %3328 = vmatpush3.msra.mxu1 %v2832_v56  ;;  %v2916_v56 = vld [vmem:[%s6283_s2 + $0x3f8] sm:$0xff] }
 0x11b   : > { %3329 = vmatprep.subr.mxu1 %v2847_v61 }
 0x11c   : > { %3330 = vmatpush3.msra.mxu1 %v2831_v2 }
 0x11d   : > { %3331 = vmatprep.subr.mxu1 %v2846_v6 }
 0x11e   : > { %3332 = vmatpush3.msra.mxu1 %v2830_v11  ;;  %v699_v11 = vlaneseq }
 0x11f   : > { %3333 = vmatprep.subr.mxu1 %v2845_v14 }
 0x120   : > { %3334 = vmatpush3.msra.mxu1 %v2829_v20 }
 0x121   : > { %3335 = vmatprep.subr.mxu1 %v2844_v22 }
 0x122   : > { %3336 = vmatpush3.msra.mxu1 %v2828_v25 }
 0x123   : > { %3337 = vmatprep.subr.mxu1 %v2843_v27 }
 0x124   : > { %3338 = vmatpush3.msra.mxu1 %v2827_v29  ;;  %v2914_v29 = vld [vmem:[%s6283_s2 + $0x3e8] sm:$0xff] }
 0x125   : > { %3339 = vmatprep.subr.mxu1 %v2842_v31  ;;  %v2898_v31 = vld [vmem:[%s6283_s2 + $0x368] sm:$0xff] }
 0x1d1   : > { %v601_v34 = vpop.f32.mrf.mxu1 }
 0x1d2   : > { %v602_v35 = vadd.f32 %v601_v34, %v534_v33  ;;  %v2826_v33 = vld [vmem:[%s6283_s2 + $0x128] sm:$0xff] }
 0x1d3   : > { %v3912_v36 = vpop.f32.mrf.mxu1  ;;  %v733_v34 = vld [vmem:[%s6283_s2 + $0x28] sm:$0xff]  ;;  %3340 = vmatpush3.msra.mxu1 %v2826_v33 }
 0x1d4   : > { %v605_v37 = vmax.f32 %v602_v35, 0.0  ;;  %v2841_v35 = vld [vmem:[%s6283_s2 + $0x1a0] sm:$0xff] }
 0x1d5   : > { %v748_v36 = vld [vmem:[%s6283_s2 + $0xa0] sm:$0xff]  ;;  %3341 = vmatprep.subr.mxu1 %v2841_v35 }
 0x1d6   : > { %3946 = vmatmul.mubr.f32.vlgmr.msra.gmra.mxu0 %v605_v37  ;;  %v2825_v37 = vld [vmem:[%s6283_s2 + $0x120] sm:$0xff] }
 0x1d7   : > { %3358 = vmatpush3.msra.mxu0 %v743_v41  ;;  %v2824_v41 = vld [vmem:[%s6283_s2 + $0x118] sm:$0xff]  ;;  %3342 = vmatpush3.msra.mxu1 %v2825_v37  ;;  %v2913_v35 = vld [vmem:[%s6283_s2 + $0x3e0] sm:$0xff] }
 0x1d8   : > { %3359 = vmatprep.subr.mxu0 %v758_v43  ;;  %v2839_v43 = vld [vmem:[%s6283_s2 + $0x190] sm:$0xff]  ;;  %3343 = vmatprep.subr.mxu1 %v2840_v39  ;;  %v2897_v37 = vld [vmem:[%s6283_s2 + $0x360] sm:$0xff]  ;;  %v2880_v39 = vld [vmem:[%s6283_s2 + $0x2d8] sm:$0xff] }
 0x1d9   : > { %3360 = vmatpush3.msra.mxu0 %v742_v45  ;;  %v2823_v45 = vld [vmem:[%s6283_s2 + $0x110] sm:$0xff]  ;;  %3344 = vmatpush3.msra.mxu1 %v2824_v41  ;;  %v2864_v41 = vld [vmem:[%s6283_s2 + $0x258] sm:$0xff] }
 0x1da   : > { %3361 = vmatprep.subr.mxu0 %v757_v47  ;;  %v2838_v47 = vld [vmem:[%s6283_s2 + $0x188] sm:$0xff]  ;;  %3345 = vmatprep.subr.mxu1 %v2839_v43  ;;  %v2879_v43 = vld [vmem:[%s6283_s2 + $0x2d0] sm:$0xff] }
 0x1db   : > { %3362 = vmatpush3.msra.mxu0 %v741_v49  ;;  %v2822_v49 = vld [vmem:[%s6283_s2 + $0x108] sm:$0xff]  ;;  %3346 = vmatpush3.msra.mxu1 %v2823_v45  ;;  %v2863_v45 = vld [vmem:[%s6283_s2 + $0x250] sm:$0xff] }
 0x1dc   : > { %3363 = vmatprep.subr.mxu0 %v756_v51  ;;  %v2837_v51 = vld [vmem:[%s6283_s2 + $0x180] sm:$0xff]  ;;  %3347 = vmatprep.subr.mxu1 %v2838_v47  ;;  %v2878_v47 = vld [vmem:[%s6283_s2 + $0x2c8] sm:$0xff] }
 0x1dd   : > { %3364 = vmatpush3.msra.mxu0 %v740_v53  ;;  %v2821_v53 = vld [vmem:[%s6283_s2 + $0x100] sm:$0xff]  ;;  %3348 = vmatpush3.msra.mxu1 %v2822_v49  ;;  %v2862_v49 = vld [vmem:[%s6283_s2 + $0x248] sm:$0xff] }
 0x1de   : > { %3365 = vmatprep.subr.mxu0 %v755_v55  ;;  %3349 = vmatprep.subr.mxu1 %v2837_v51  ;;  %v2884_v55 = vld [vmem:[%s6283_s2 + $0x2f8] sm:$0xff]  ;;  %v2877_v51 = vld [vmem:[%s6283_s2 + $0x2c0] sm:$0xff] }
 0x1df   : > { %3366 = vmatpush3.msra.mxu0 %v739_v59  ;;  %3350 = vmatpush3.msra.mxu1 %v2821_v53  ;;  %v622_v59 = vld [vmem:[%s6288_s7] sm:$0x1] }
 0x1e0   : > { %3367 = vmatprep.subr.mxu0 %v754_v1  ;;  %3395 = vmatprep.subr.mxu1 %v2884_v55  ;;  %v2861_v53 = vld [vmem:[%s6283_s2 + $0x240] sm:$0xff]  ;;  %v2876_v55 = vld [vmem:[%s6283_s2 + $0x2b8] sm:$0xff] }
 0x1e1   : > { %3368 = vmatpush3.msra.mxu0 %v738_v4 }
 0x1e2   : > { %3369 = vmatprep.subr.mxu0 %v753_v9 }
 0x1e3   : > { %3370 = vmatpush3.msra.mxu0 %v737_v12  ;;  %v700_v12 = vshrl.u32 %v699_v11, 7  ;;  %v2906_v11 = vld [vmem:[%s6283_s2 + $0x3a8] sm:$0xff] }
 0x1e4   : > { %3371 = vmatprep.subr.mxu0 %v752_v18 }
 0x1e5   : > { %3372 = vmatpush3.msra.mxu0 %v736_v21  ;;  %v4813_v14 = vsub.s32 0, %v700_v12  ;;  %v2858_v12 = vld [vmem:[%s6283_s2 + $0x228] sm:$0xff] }
 0x1e6   : > { %3373 = vmatprep.subr.mxu0 %v751_v23 }
 0x1e7   : > { %3374 = vmatpush3.msra.mxu0 %v735_v26 }
 0x1e8   : > { %3375 = vmatprep.subr.mxu0 %v750_v28 }
 0x1e9   : > { %3376 = vmatpush3.msra.mxu0 %v734_v30  ;;  %v2866_v30 = vld [vmem:[%s6283_s2 + $0x268] sm:$0xff] }
 0x1ea   : > { %3377 = vmatprep.subr.mxu0 %v749_v32 }
 0x1eb   : > { %3378 = vmatpush3.msra.mxu0 %v733_v34  ;;  %v2881_v34 = vld [vmem:[%s6283_s2 + $0x2e0] sm:$0xff] }
 0x1ec   : > { %3379 = vmatprep.subr.mxu0 %v748_v36  ;;  %v2865_v36 = vld [vmem:[%s6283_s2 + $0x260] sm:$0xff] }
 0x1ed   : > { %3380 = vmatpush3.msra.mxu0 %v732_v38 }
 0x1ee   : > { %3381 = vmatprep.subr.mxu0 %v747_v40  ;;  %v2912_v40 = vld [vmem:[%s6283_s2 + $0x3d8] sm:$0xff] }
 0x1ef   : > { %3382 = vmatpush3.msra.mxu0 %v731_v42  ;;  %v2896_v42 = vld [vmem:[%s6283_s2 + $0x358] sm:$0xff] }
 0x1f0   : > { %3383 = vmatprep.subr.mxu0 %v746_v44  ;;  %v2911_v44 = vld [vmem:[%s6283_s2 + $0x3d0] sm:$0xff] }
 0x1f1   : > { %3384 = vmatpush3.msra.mxu0 %v730_v46  ;;  %v2895_v46 = vld [vmem:[%s6283_s2 + $0x350] sm:$0xff] }
 0x1f2   : > { %3385 = vmatprep.subr.mxu0 %v745_v48  ;;  %v2910_v48 = vld [vmem:[%s6283_s2 + $0x3c8] sm:$0xff] }
 0x1f3   : > { %3386 = vmatpush3.msra.mxu0 %v729_v50  ;;  %v2894_v50 = vld [vmem:[%s6283_s2 + $0x348] sm:$0xff] }
 0x1f4   : > { %3387 = vmatprep.subr.mxu0 %v744_v52  ;;  %v2909_v52 = vld [vmem:[%s6283_s2 + $0x3c0] sm:$0xff] }
 0x1f5   : > { %3388 = vmatpush3.msra.mxu0 %v728_v54  ;;  %v2893_v54 = vld [vmem:[%s6283_s2 + $0x340] sm:$0xff] }
 0x1f6   : > { %3433 = vmatprep.subr.mxu0 %v2916_v56  ;;  %v2908_v56 = vld [vmem:[%s6283_s2 + $0x3b8] sm:$0xff] }
 0x296   : > { %v689_v61 = vpop.f32.mrf.mxu0 }
 0x297   : > { %v690_v1 = vadd.f32 %v689_v61, %v622_v59  ;;  %v2860_v59 = vld [vmem:[%s6283_s2 + $0x238] sm:$0xff] }
 0x298   : > { %v3947_v2 = vpop.f32.mrf.mxu0  ;;  %v2892_v61 = vld [vmem:[%s6283_s2 + $0x338] sm:$0xff] }
 0x299   : > { %v2820_v4 = vmul.f32 -1.442695, %v690_v1  ;;  %v2875_v1 = vld [vmem:[%s6283_s2 + $0x2b0] sm:$0xff] }
 0x29a   : > { %v2907_v2 = vld [vmem:[%s6283_s2 + $0x3b0] sm:$0xff] }
 0x29b   : > { %4273 = vpow2.f32 %v2820_v4  ;;  %v2859_v4 = vld [vmem:[%s6283_s2 + $0x230] sm:$0xff] }
 0x2a8   : > { %v4274_v6 = vpop.eup %4273 }
 0x2a9   : > { %v696_v9 = vadd.f32 1.0, %v4274_v6  ;;  %v2891_v6 = vld [vmem:[%s6283_s2 + $0x330] sm:$0xff] }
 0x2ab   : > { %4275 = vrcp.f32 %v696_v9  ;;  %v2874_v9 = vld [vmem:[%s6283_s2 + $0x2a8] sm:$0xff] }
 0x2b8   : > { %v4276_v18 = vpop.eup %4275 }
 0x2b9   : > { %v702_v20 = vrot.slane %v4276_v18, %v4813_v14  ;;  %v2890_v18 = vld [vmem:[%s6283_s2 + $0x328] sm:$0xff] }
 0x2bb   : > { %v703_v21 = vmul.f32 %v702_v20, %v495_v60  ;;  %v704_v22 = vmul.f32 %v702_v20, %v496_v62  ;;  %v705_v23 = vmul.f32 %v702_v20, %v497_v3  ;;  %v706_v25 = vmul.f32 %v702_v20, %v498_v5  ;;  %v2900_v60 = vld [vmem:[%s6283_s2 + $0x378] sm:$0xff]  ;;  %v2883_v5 = vld [vmem:[%s6283_s2 + $0x2f0] sm:$0xff] }
 0x2bc   : > { %v707_v26 = vmul.f32 %v702_v20, %v499_v10  ;;  %v708_v27 = vmul.f32 %v702_v20, %v500_v13  ;;  %v709_v28 = vmul.f32 %v702_v20, %v501_v17  ;;  %v710_v58 = vmul.f32 %v702_v20, %v502_v19  ;;  %v2867_v10 = vld [vmem:[%s6283_s2 + $0x270] sm:$0xff]  ;;  %v2882_v19 = vld [vmem:[%s6283_s2 + $0x2e8] sm:$0xff]  ;;  %v2873_v20 = vld [vmem:[%s6283_s2 + $0x2a0] sm:$0xff] }
 0x2bd   : > { %711 = vst [vmem:[#allocation2 + $0x8] sm:$0xff] %v703_v21  ;;  %712 = vst [vmem:[#allocation2 + $0x10] sm:$0xff] %v704_v22  ;;  %v2899_v13 = vld [vmem:[%s6283_s2 + $0x370] sm:$0xff]  ;;  %v2905_v21 = vld [vmem:[%s6283_s2 + $0x3a0] sm:$0xff] }
 0x2be   : > { %713 = vst [vmem:[#allocation2 + $0x18] sm:$0xff] %v705_v23  ;;  %714 = vst [vmem:[#allocation2 + $0x20] sm:$0xff] %v706_v25  ;;  %v2857_v22 = vld [vmem:[%s6283_s2 + $0x220] sm:$0xff]  ;;  %v2872_v25 = vld [vmem:[%s6283_s2 + $0x298] sm:$0xff] }
 0x2bf   : > { %715 = vst [vmem:[#allocation2 + $0x28] sm:$0xff] %v707_v26  ;;  %716 = vst [vmem:[#allocation2 + $0x30] sm:$0xff] %v708_v27  ;;  %v2889_v23 = vld [vmem:[%s6283_s2 + $0x320] sm:$0xff]  ;;  %v2904_v26 = vld [vmem:[%s6283_s2 + $0x398] sm:$0xff] }
 0x2c0   : > { %717 = vst [vmem:[#allocation2 + $0x38] sm:$0xff] %v709_v28  ;;  %718 = vst [vmem:[#allocation2 + $0x40] sm:$0xff] %v710_v58  ;;  %v2856_v27 = vld [vmem:[%s6283_s2 + $0x218] sm:$0xff]  ;;  %v2871_v58 = vld [vmem:[%s6283_s2 + $0x290] sm:$0xff] }
 0x2c1   : > { %v2888_v28 = vld [vmem:[%s6283_s2 + $0x318] sm:$0xff] }
 0x2c5   : > { %v765_v62 = vld [vmem:[#allocation2 + $0xb] ss:$4 sm:$0xff]  ;;  %v725_v63 = vld [vmem:[#allocation2 + $0xa] ss:$4 sm:$0xff]  ;;  %v4850_v17 = vld [vmem:[#allocation2 + $0x8] ss:$4 sm:$0xff] }
 0x2c6   : > { %v761_v0 = vld [vmem:[#allocation2 + $0x7] ss:$4 sm:$0xff]  ;;  %865 = vmatprep.mubr.f32.mxu1 %v765_v62  ;;  %940 = vmatprep.mubr.f32.mxu0 %v725_v63  ;;  %v721_v3 = vld [vmem:[#allocation2 + $0x6] ss:$4 sm:$0xff]  ;;  %v956_v16 = vld [vmem:[#allocation2 + $0xc] ss:$4 sm:$0xff] }
 0x2c7   : > { %866 = vmatmul.mubr.f32.vlgmr.msra.gmra.mxu1 %v761_v0  ;;  %941 = vmatmul.mubr.f32.vlgmr.msra.gmra.mxu0 %v721_v3  ;;  %v767_v8 = vld [vmem:[#allocation2 + $0x2b] ss:$4 sm:$0xff]  ;;  %v727_v15 = vld [vmem:[#allocation2 + $0x2a] ss:$4 sm:$0xff]  ;;  %1401 = vst [vmem:[#allocation2 + $0x18] sm:$0x1] %v4303_v24 }
 0x2c8   : > { %3396 = vmatpush3.msra.mxu1 %v2868_v57  ;;  %3434 = vmatpush3.msra.mxu0 %v2900_v60  ;;  %v763_v32 = vld [vmem:[#allocation2 + $0x27] ss:$4 sm:$0xff]  ;;  %v723_v33 = vld [vmem:[#allocation2 + $0x26] ss:$4 sm:$0xff]  ;;  %v1074_v38 = vld [vmem:[#allocation2 + $0xd] ss:$4 sm:$0xff] }
 0x2c9   : > { %870 = vmatprep.mubr.f32.mxu1 %v767_v8  ;;  %945 = vmatprep.mubr.f32.mxu0 %v727_v15  ;;  %v2903_v57 = vld [vmem:[%s6283_s2 + $0x390] sm:$0xff]  ;;  %v2870_v63 = vld [vmem:[%s6283_s2 + $0x288] sm:$0xff]  ;;  %v2901_v8 = vld [vmem:[%s6283_s2 + $0x380] sm:$0xff] }
 0x2ca   : > { %3397 = vmatprep.subr.mxu1 %v2883_v5  ;;  %3435 = vmatprep.subr.mxu0 %v2915_v7  ;;  %v2855_v60 = vld [vmem:[%s6283_s2 + $0x210] sm:$0xff]  ;;  %v2902_v0 = vld [vmem:[%s6283_s2 + $0x388] sm:$0xff]  ;;  %v2869_v7 = vld [vmem:[%s6283_s2 + $0x280] sm:$0xff] }
 0x2cb   : > { %3398 = vmatpush3.msra.mxu1 %v2867_v10  ;;  %3436 = vmatpush3.msra.mxu0 %v2899_v13  ;;  %v2887_v62 = vld [vmem:[%s6283_s2 + $0x310] sm:$0xff]  ;;  %v2854_v3 = vld [vmem:[%s6283_s2 + $0x208] sm:$0xff]  ;;  %v2853_v10 = vld [vmem:[%s6283_s2 + $0x200] sm:$0xff] }
 0x2cc   : > { %3399 = vmatprep.subr.mxu1 %v2882_v19  ;;  %3437 = vmatprep.subr.mxu0 %v2914_v29  ;;  %v2886_v5 = vld [vmem:[%s6283_s2 + $0x308] sm:$0xff]  ;;  %v2885_v13 = vld [vmem:[%s6283_s2 + $0x300] sm:$0xff] }
 0x2cd   : > { %871 = vmatmul.mubr.f32.gmra.mxu1 %v763_v32  ;;  %946 = vmatmul.mubr.f32.gmra.mxu0 %v723_v33  ;;  %v1070_v15 = vld [vmem:[#allocation2 + $0x9] ss:$4 sm:$0xff]  ;;  %v954_v29 = vld [vmem:[#allocation2 + $0x28] ss:$4 sm:$0xff] }
 0x2ce   : > { %3400 = vmatpush3.msra.mxu1 %v2866_v30  ;;  %3438 = vmatpush3.msra.mxu0 %v2898_v31  ;;  %v1076_v19 = vld [vmem:[#allocation2 + $0x2d] ss:$4 sm:$0xff] }
 0x2cf   : > { %3401 = vmatprep.subr.mxu1 %v2881_v34  ;;  %1056 = vmatprep.mubr.f32.mxu1 %v956_v16  ;;  %v958_v16 = vld [vmem:[#allocation2 + $0x2c] ss:$4 sm:$0xff]  ;;  %v1072_v30 = vld [vmem:[#allocation2 + $0x29] ss:$4 sm:$0xff] }
 0x2d0   : > { %3439 = vmatprep.subr.mxu0 %v2913_v35  ;;  %1174 = vmatprep.mubr.f32.mxu0 %v1074_v38  ;;  %v2933_v31 = vld [vmem:[%s6285_s4 + $0xf0] sm:$0xff]  ;;  %v2932_v32 = vld [vmem:[%s6285_s4 + $0xe8] sm:$0xff]  ;;  %v2931_v33 = vld [vmem:[%s6285_s4 + $0xe0] sm:$0xff] }
 0x2d1   : > { %3402 = vmatpush3.msra.mxu1 %v2865_v36  ;;  %3440 = vmatpush3.msra.mxu0 %v2897_v37  ;;  %v2930_v34 = vld [vmem:[%s6285_s4 + $0xd8] sm:$0xff]  ;;  %v2929_v35 = vld [vmem:[%s6285_s4 + $0xd0] sm:$0xff]  ;;  %v2928_v36 = vld [vmem:[%s6285_s4 + $0xc8] sm:$0xff] }
 0x2d2   : > { %3403 = vmatprep.subr.mxu1 %v2880_v39  ;;  %3441 = vmatprep.subr.mxu0 %v2912_v40  ;;  %v2927_v37 = vld [vmem:[%s6285_s4 + $0xc0] sm:$0xff]  ;;  %v2926_v38 = vld [vmem:[%s6285_s4 + $0xb8] sm:$0xff]  ;;  %v2925_v39 = vld [vmem:[%s6285_s4 + $0xb0] sm:$0xff] }
 0x2d3   : > { %3404 = vmatpush3.msra.mxu1 %v2864_v41  ;;  %3442 = vmatpush3.msra.mxu0 %v2896_v42  ;;  %v2924_v40 = vld [vmem:[%s6285_s4 + $0xa8] sm:$0xff]  ;;  %v2923_v41 = vld [vmem:[%s6285_s4 + $0xa0] sm:$0xff]  ;;  %v2922_v42 = vld [vmem:[%s6285_s4 + $0x98] sm:$0xff] }
 0x2d4   : > { %3405 = vmatprep.subr.mxu1 %v2879_v43  ;;  %3443 = vmatprep.subr.mxu0 %v2911_v44  ;;  %v2921_v43 = vld [vmem:[%s6285_s4 + $0x90] sm:$0xff]  ;;  %v2920_v44 = vld [vmem:[%s6285_s4 + $0x88] sm:$0xff] }
 0x2d5   : > { %3406 = vmatpush3.msra.mxu1 %v2863_v45  ;;  %3444 = vmatpush3.msra.mxu0 %v2895_v46  ;;  %v2919_v45 = vld [vmem:[%s6285_s4 + $0x80] sm:$0xff] }
 0x2d6   : > { %3407 = vmatprep.subr.mxu1 %v2878_v47  ;;  %3445 = vmatprep.subr.mxu0 %v2910_v48  ;;  %v5090_v46 = vld [vmem:[#allocation2] sm:$0xff]  ;;  %v2951_v47 = vld [vmem:[%s6287_s6 + $0xf8] sm:$0xff]  ;;  %v2950_v48 = vld [vmem:[%s6287_s6 + $0xf0] sm:$0xff] }
 0x2d7   : > { %3408 = vmatpush3.msra.mxu1 %v2862_v49  ;;  %3446 = vmatpush3.msra.mxu0 %v2894_v50  ;;  %v2948_v49 = vld [vmem:[%s6287_s6 + $0xe0] sm:$0xff]  ;;  %v2947_v50 = vld [vmem:[%s6287_s6 + $0xd8] sm:$0xff] }
 0x2d8   : > { %3409 = vmatprep.subr.mxu1 %v2877_v51  ;;  %3447 = vmatprep.subr.mxu0 %v2909_v52  ;;  %v2946_v51 = vld [vmem:[%s6287_s6 + $0xd0] sm:$0xff]  ;;  %v2945_v52 = vld [vmem:[%s6287_s6 + $0xc8] sm:$0xff] }
 0x2d9   : > { %3410 = vmatpush3.msra.mxu1 %v2861_v53  ;;  %3448 = vmatpush3.msra.mxu0 %v2893_v54  ;;  %v2944_v53 = vld [vmem:[%s6287_s6 + $0xc0] sm:$0xff]  ;;  %v2943_v54 = vld [vmem:[%s6287_s6 + $0xb8] sm:$0xff] }
 0x2da   : > { %3411 = vmatprep.subr.mxu1 %v2876_v55  ;;  %3449 = vmatprep.subr.mxu0 %v2908_v56  ;;  %v2942_v55 = vld [vmem:[%s6287_s6 + $0xb0] sm:$0xff]  ;;  %v2941_v56 = vld [vmem:[%s6287_s6 + $0xa8] sm:$0xff] }
 0x2db   : > { %3412 = vmatpush3.msra.mxu1 %v2860_v59  ;;  %3450 = vmatpush3.msra.mxu0 %v2892_v61  ;;  %v2940_v59 = vld [vmem:[%s6287_s6 + $0xa0] sm:$0xff]  ;;  %v2939_v61 = vld [vmem:[%s6287_s6 + $0x98] sm:$0xff] }
 0x2dc   : > { %3413 = vmatprep.subr.mxu1 %v2875_v1  ;;  %3451 = vmatprep.subr.mxu0 %v2907_v2 }
 0x2dd   : > { %3414 = vmatpush3.msra.mxu1 %v2859_v4  ;;  %3452 = vmatpush3.msra.mxu0 %v2891_v6 }
 0x2de   : > { %3415 = vmatprep.subr.mxu1 %v2874_v9  ;;  %3453 = vmatprep.subr.mxu0 %v2906_v11 }
 0x2df   : > { %3416 = vmatpush3.msra.mxu1 %v2858_v12  ;;  %3454 = vmatpush3.msra.mxu0 %v2890_v18 }
 0x2e0   : > { %3417 = vmatprep.subr.mxu1 %v2873_v20  ;;  %3455 = vmatprep.subr.mxu0 %v2905_v21 }
 0x2e1   : > { %3418 = vmatpush3.msra.mxu1 %v2857_v22  ;;  %3456 = vmatpush3.msra.mxu0 %v2889_v23 }
 0x2e2   : > { %3419 = vmatprep.subr.mxu1 %v2872_v25  ;;  %3457 = vmatprep.subr.mxu0 %v2904_v26 }
 0x2e3   : > { %3420 = vmatpush3.msra.mxu1 %v2856_v27  ;;  %3458 = vmatpush3.msra.mxu0 %v2888_v28 }
 0x2e4   : > { %3421 = vmatprep.subr.mxu1 %v2871_v58  ;;  %3459 = vmatprep.subr.mxu0 %v2903_v57 }
 0x2e5   : > { %3422 = vmatpush3.msra.mxu1 %v2855_v60  ;;  %3460 = vmatpush3.msra.mxu0 %v2887_v62 }
 0x2e6   : > { %3423 = vmatprep.subr.mxu1 %v2870_v63  ;;  %3461 = vmatprep.subr.mxu0 %v2902_v0 }
 0x2e7   : > { %3424 = vmatpush3.msra.mxu1 %v2854_v3  ;;  %3462 = vmatpush3.msra.mxu0 %v2886_v5 }
 0x2e8   : > { %3425 = vmatprep.subr.mxu1 %v2869_v7  ;;  %3463 = vmatprep.subr.mxu0 %v2901_v8 }
 0x2e9   : > { %3426 = vmatpush3.msra.mxu1 %v2853_v10  ;;  %3464 = vmatpush3.msra.mxu0 %v2885_v13  ;;  %v2918_v13 = vld [vmem:[%s6284_s3 + $0x1] ss:$0 sm:$0xff] }
 0x2ea   : > { %1057 = vmatmul.mubr.f32.vlgmr.msra.gmra.mxu1 %v4850_v17  ;;  %1175 = vmatmul.mubr.f32.vlgmr.msra.gmra.mxu0 %v1070_v15  ;;  %v2934_v17 = vld [vmem:[%s6285_s4 + $0xf8] sm:$0xff] }
 0x2eb   : > { %1061 = vmatprep.mubr.f32.mxu1 %v958_v16  ;;  %1179 = vmatprep.mubr.f32.mxu0 %v1076_v19 }
 0x2ec   : > { %3948 = vmatprep.subr.mxu1 %v4303_v24  ;;  %3983 = vmatprep.subr.mxu0 %v4303_v24 }
 0x2ed   : > { %3949 = vmatpush3.msra.mxu1 %v2934_v17  ;;  %3984 = vmatpush3.msra.mxu0 %v2951_v47 }
 0x2ee   : > { %1062 = vmatmul.mubr.f32.gmra.mxu1 %v954_v29  ;;  %1180 = vmatmul.mubr.f32.gmra.mxu0 %v1072_v30 }
 0x2ef   : > { %3980 = vmatprep.mubr.msk.f32.mxu1 %vm4304_vm0, %v4303_v24  ;;  %4015 = vmatprep.mubr.msk.f32.mxu0 %vm4304_vm0, %v4303_v24 }
 0x2f0   : > { %3950 = vmatprep.subr.mxu1 %v4303_v24  ;;  %3985 = vmatprep.subr.mxu0 %v5090_v46 }
 0x2f1   : > { %3951 = vmatpush3.msra.mxu1 %v2933_v31  ;;  %3986 = vmatpush3.msra.mxu0 %v2950_v48 }
 0x2f2   : > { %3952 = vmatprep.subr.mxu1 %v4303_v24  ;;  %3987 = vmatprep.subr.mxu0 %v5090_v46 }
 0x2f3   : > { %3953 = vmatpush3.msra.mxu1 %v2932_v32 }
 0x2f4   : > { %3954 = vmatprep.subr.mxu1 %v4303_v24 }
 0x2f5   : > { %3955 = vmatpush3.msra.mxu1 %v2931_v33 }
 0x2f6   : > { %3956 = vmatprep.subr.mxu1 %v4303_v24 }
 0x2f7   : > { %3957 = vmatpush3.msra.mxu1 %v2930_v34 }
 0x2f8   : > { %3958 = vmatprep.subr.mxu1 %v4303_v24 }
 0x2f9   : > { %3959 = vmatpush3.msra.mxu1 %v2929_v35 }
 0x2fa   : > { %3960 = vmatprep.subr.mxu1 %v4303_v24 }
 0x2fb   : > { %3961 = vmatpush3.msra.mxu1 %v2928_v36 }
 0x2fc   : > { %3962 = vmatprep.subr.mxu1 %v4303_v24 }
 0x2fd   : > { %3963 = vmatpush3.msra.mxu1 %v2927_v37 }
 0x2fe   : > { %3964 = vmatprep.subr.mxu1 %v4303_v24 }
 0x2ff   : > { %3965 = vmatpush3.msra.mxu1 %v2926_v38 }
 0x300   : > { %3966 = vmatprep.subr.mxu1 %v4303_v24 }
 0x301   : > { %3967 = vmatpush3.msra.mxu1 %v2925_v39 }
 0x302   : > { %3968 = vmatprep.subr.mxu1 %v4303_v24 }
 0x303   : > { %3969 = vmatpush3.msra.mxu1 %v2924_v40  ;;  %v2938_v40 = vld [vmem:[%s6287_s6 + $0x90] sm:$0xff] }
 0x304   : > { %3970 = vmatprep.subr.mxu1 %v4303_v24 }
 0x305   : > { %3971 = vmatpush3.msra.mxu1 %v2923_v41  ;;  %v2937_v41 = vld [vmem:[%s6287_s6 + $0x88] sm:$0xff] }
 0x306   : > { %3972 = vmatprep.subr.mxu1 %v4303_v24 }
 0x307   : > { %3973 = vmatpush3.msra.mxu1 %v2922_v42  ;;  %v2936_v42 = vld [vmem:[%s6287_s6 + $0x80] sm:$0xff] }
 0x308   : > { %3974 = vmatprep.subr.mxu1 %v4303_v24 }
 0x309   : > { %3975 = vmatpush3.msra.mxu1 %v2921_v43  ;;  %v2935_v43 = vld [vmem:[%s6286_s5 + $0x1] sm:$0x1] }
 0x30a   : > { %3976 = vmatprep.subr.mxu1 %v4303_v24  ;;  %v2949_v24 = vld [vmem:[%s6287_s6 + $0xe8] sm:$0xff] }
 0x30b   : > { %3977 = vmatpush3.msra.mxu1 %v2920_v44  ;;  %3988 = vmatpush3.msra.mxu0 %v2949_v24  ;;  %v3017_v24 = vld [vmem:[%s6283_s2 + $0x5f8] sm:$0xff] }
 0x30c   : > { %3978 = vmatprep.subr.mxu1 %v5090_v46  ;;  %3989 = vmatprep.subr.mxu0 %v5090_v46 }
 0x30d   : > { %3979 = vmatpush3.msra.mxu1 %v2919_v45  ;;  %3990 = vmatpush3.msra.mxu0 %v2948_v49  ;;  %v2985_v49 = vld [vmem:[%s6283_s2 + $0x4f8] sm:$0xff] }
 0x30e   : > { %3991 = vmatprep.subr.mxu0 %v5090_v46  ;;  %3505 = vmatprep.subr.mxu1 %v3017_v24  ;;  %v2987_v24 = vld [vmem:[%s6283_s2 + $0x508] sm:$0xff] }
 0x30f   : > { %3992 = vmatpush3.msra.mxu0 %v2947_v50  ;;  %v3001_v50 = vld [vmem:[%s6283_s2 + $0x578] sm:$0xff] }
 0x310   : > { %3993 = vmatprep.subr.mxu0 %v5090_v46 }
 0x311   : > { %3994 = vmatpush3.msra.mxu0 %v2946_v51  ;;  %v2969_v51 = vld [vmem:[%s6283_s2 + $0x478] sm:$0xff] }
 0x312   : > { %3995 = vmatprep.subr.mxu0 %v5090_v46 }
 0x313   : > { %3996 = vmatpush3.msra.mxu0 %v2945_v52  ;;  %v3016_v52 = vld [vmem:[%s6283_s2 + $0x5f0] sm:$0xff] }
 0x314   : > { %3997 = vmatprep.subr.mxu0 %v5090_v46 }
 0x315   : > { %3998 = vmatpush3.msra.mxu0 %v2944_v53  ;;  %v2984_v53 = vld [vmem:[%s6283_s2 + $0x4f0] sm:$0xff] }
 0x316   : > { %3999 = vmatprep.subr.mxu0 %v5090_v46 }
 0x317   : > { %4000 = vmatpush3.msra.mxu0 %v2943_v54  ;;  %v3000_v54 = vld [vmem:[%s6283_s2 + $0x570] sm:$0xff] }
 0x318   : > { %4001 = vmatprep.subr.mxu0 %v5090_v46 }
 0x319   : > { %4002 = vmatpush3.msra.mxu0 %v2942_v55  ;;  %v2968_v55 = vld [vmem:[%s6283_s2 + $0x470] sm:$0xff] }
 0x31a   : > { %4003 = vmatprep.subr.mxu0 %v5090_v46 }
 0x31b   : > { %4004 = vmatpush3.msra.mxu0 %v2941_v56  ;;  %v3015_v56 = vld [vmem:[%s6283_s2 + $0x5e8] sm:$0xff] }
 0x31c   : > { %4005 = vmatprep.subr.mxu0 %v5090_v46 }
 0x31d   : > { %4006 = vmatpush3.msra.mxu0 %v2940_v59  ;;  %v2983_v59 = vld [vmem:[%s6283_s2 + $0x4e8] sm:$0xff] }
 0x31e   : > { %4007 = vmatprep.subr.mxu0 %v5090_v46 }
 0x31f   : > { %4008 = vmatpush3.msra.mxu0 %v2939_v61  ;;  %v2999_v61 = vld [vmem:[%s6283_s2 + $0x568] sm:$0xff] }
 0x320   : > { %4009 = vmatprep.subr.mxu0 %v5090_v46 }
 0x321   : > { %4010 = vmatpush3.msra.mxu0 %v2938_v40  ;;  %v2989_v40 = vld [vmem:[%s6283_s2 + $0x518] sm:$0xff] }
 0x322   : > { %4011 = vmatprep.subr.mxu0 %v5090_v46 }
 0x323   : > { %4012 = vmatpush3.msra.mxu0 %v2937_v41  ;;  %v2957_v41 = vld [vmem:[%s6283_s2 + $0x418] sm:$0xff] }
 0x324   : > { %4013 = vmatprep.subr.mxu0 %v5090_v46 }
 0x325   : > { %4014 = vmatpush3.msra.mxu0 %v2936_v42  ;;  %v3004_v42 = vld [vmem:[%s6283_s2 + $0x590] sm:$0xff] }
 0x326   : > { %3540 = vmatprep.subr.mxu0 %v2985_v49  ;;  %v2955_v49 = vld [vmem:[%s6283_s2 + $0x408] sm:$0xff] }
 0x387   : > { %v3351_v1 = vpop.f32.mrf.mxu1  ;;  %v3389_v2 = vpop.f32.mrf.mxu0 }
 0x389   : > { %v3352_v4 = vpop.f32.mrf.mxu1  ;;  %v3390_v6 = vpop.f32.mrf.mxu0 }
 0x38a   : > { %v3353_v20 = vadd.f32 %v3352_v4, %v3351_v1  ;;  %v3391_v21 = vadd.f32 %v3390_v6, %v3389_v2  ;;  %v2967_v1 = vld [vmem:[%s6283_s2 + $0x468] sm:$0xff]  ;;  %v3014_v2 = vld [vmem:[%s6283_s2 + $0x5e0] sm:$0xff] }
 0x38b   : > { %v2982_v4 = vld [vmem:[%s6283_s2 + $0x4e0] sm:$0xff] }
 0x38c   : > { %v943_v27 = vadd.f32 %v3391_v21, %v3353_v20  ;;  %v2998_v6 = vld [vmem:[%s6283_s2 + $0x560] sm:$0xff]  ;;  %v2965_v20 = vld [vmem:[%s6283_s2 + $0x458] sm:$0xff]  ;;  %v3012_v21 = vld [vmem:[%s6283_s2 + $0x5d0] sm:$0xff] }
 0x38d   : > { %v3354_v9 = vpop.f32.mrf.mxu1  ;;  %v3392_v11 = vpop.f32.mrf.mxu0 }
 0x38f   : > { %v3355_v12 = vpop.f32.mrf.mxu1  ;;  %v3393_v18 = vpop.f32.mrf.mxu0 }
 0x390   : > { %v3356_v28 = vadd.f32 %v3355_v12, %v3354_v9  ;;  %v3394_v58 = vadd.f32 %v3393_v18, %v3392_v11  ;;  %v2966_v9 = vld [vmem:[%s6283_s2 + $0x460] sm:$0xff]  ;;  %v3013_v11 = vld [vmem:[%s6283_s2 + $0x5d8] sm:$0xff] }
 0x391   : > { %v2981_v12 = vld [vmem:[%s6283_s2 + $0x4d8] sm:$0xff] }
 0x392   : > { %v948_v7 = vadd.f32 %v3394_v58, %v3356_v28  ;;  %v2997_v18 = vld [vmem:[%s6283_s2 + $0x558] sm:$0xff]  ;;  %v2995_v28 = vld [vmem:[%s6283_s2 + $0x548] sm:$0xff] }
 0x393   : > { %v2963_v58 = vld [vmem:[%s6283_s2 + $0x448] sm:$0xff] }
 0x3aa   : > { %v3427_v22 = vpop.f32.mrf.mxu1  ;;  %v3465_v23 = vpop.f32.mrf.mxu0 }
 0x3ac   : > { %v3428_v25 = vpop.f32.mrf.mxu1  ;;  %v3466_v26 = vpop.f32.mrf.mxu0 }
 0x3ad   : > { %v3429_v57 = vadd.f32 %v3428_v25, %v3427_v22  ;;  %v3467_v0 = vadd.f32 %v3466_v26, %v3465_v23  ;;  %v2980_v22 = vld [vmem:[%s6283_s2 + $0x4d0] sm:$0xff]  ;;  %v3011_v26 = vld [vmem:[%s6283_s2 + $0x5c8] sm:$0xff] }
 0x3ae   : > { %v3430_v60 = vpop.f32.mrf.mxu1  ;;  %v3468_v62 = vpop.f32.mrf.mxu0  ;;  %v2996_v23 = vld [vmem:[%s6283_s2 + $0x550] sm:$0xff] }
 0x3af   : > { %v1067_v63 = vadd.f32 %v3429_v57, %v943_v27  ;;  %v2964_v25 = vld [vmem:[%s6283_s2 + $0x450] sm:$0xff]  ;;  %v2979_v27 = vld [vmem:[%s6283_s2 + $0x4c8] sm:$0xff]  ;;  %v3010_v57 = vld [vmem:[%s6283_s2 + $0x5c0] sm:$0xff] }
 0x3b0   : > { %v3431_v3 = vpop.f32.mrf.mxu1  ;;  %v3469_v5 = vpop.f32.mrf.mxu0 }
 0x3b1   : > { %v1185_v8 = vadd.f32 %v3467_v0, %v1067_v63  ;;  %v3432_v10 = vadd.f32 %v3431_v3, %v3430_v60  ;;  %v3470_v16 = vadd.f32 %v3469_v5, %v3468_v62  ;;  %v2978_v60 = vld [vmem:[%s6283_s2 + $0x4c0] sm:$0xff]  ;;  %v3009_v0 = vld [vmem:[%s6283_s2 + $0x5b8] sm:$0xff] }
 0x3b2   : > { %v2994_v62 = vld [vmem:[%s6283_s2 + $0x540] sm:$0xff]  ;;  %v2977_v3 = vld [vmem:[%s6283_s2 + $0x4b8] sm:$0xff] }
 0x3b3   : > { %v1068_v15 = vadd.f32 %v3432_v10, %v948_v7  ;;  %v5148_v19 = vadd.f32 %v2918_v13, %v1185_v8  ;;  %v2962_v63 = vld [vmem:[%s6283_s2 + $0x440] sm:$0xff]  ;;  %v2993_v5 = vld [vmem:[%s6283_s2 + $0x538] sm:$0xff]  ;;  %v3008_v8 = vld [vmem:[%s6283_s2 + $0x5b0] sm:$0xff] }
 0x3b4   : > { %v2961_v7 = vld [vmem:[%s6283_s2 + $0x438] sm:$0xff]  ;;  %v2976_v10 = vld [vmem:[%s6283_s2 + $0x4b0] sm:$0xff] }
 0x3b5   : > { %v1186_v29 = vadd.f32 %v3470_v16, %v1068_v15  ;;  %v1197_v17 = vmax.f32 %v5148_v19, 0.0  ;;  %v2960_v15 = vld [vmem:[%s6283_s2 + $0x430] sm:$0xff]  ;;  %v3007_v16 = vld [vmem:[%s6283_s2 + $0x5a8] sm:$0xff] }
 0x3b6   : > { %v3034_v19 = vld [vmem:[%s6285_s4 + $0x170] sm:$0xff] }
 0x3b7   : > { %v5150_v30 = vadd.f32 %v2918_v13, %v1186_v29  ;;  %v2992_v13 = vld [vmem:[%s6283_s2 + $0x530] sm:$0xff]  ;;  %v2975_v29 = vld [vmem:[%s6283_s2 + $0x4a8] sm:$0xff] }
 0x3b9   : > { %v1198_v31 = vmax.f32 %v5150_v30, 0.0  ;;  %v3033_v30 = vld [vmem:[%s6285_s4 + $0x168] sm:$0xff] }
 0x3bb   : > { %v1199_v32 = vadd.f32 %v1198_v31, %v1197_v17 }
 0x3bd   : > { %v1200_v33 = vrot.slane %v1199_v32, 4 }
 0x3bf   : > { %v1201_v34 = vadd.f32 %v1200_v33, %v1199_v32  ;;  %v2991_v32 = vld [vmem:[%s6283_s2 + $0x528] sm:$0xff] }
 0x3c0   : > { %v2959_v33 = vld [vmem:[%s6283_s2 + $0x428] sm:$0xff] }
 0x3c1   : > { %v1202_v35 = vrot.slane %v1201_v34, 2 }
 0x3c3   : > { %v1203_v36 = vadd.f32 %v1202_v35, %v1201_v34  ;;  %v3006_v34 = vld [vmem:[%s6283_s2 + $0x5a0] sm:$0xff] }
 0x3c4   : > { %v2974_v35 = vld [vmem:[%s6283_s2 + $0x4a0] sm:$0xff] }
 0x3c5   : > { %v1204_v37 = vrot.slane %v1203_v36, 1 }
 0x3c7   : > { %v1205_v38 = vadd.f32 %v1204_v37, %v1203_v36  ;;  %v2990_v36 = vld [vmem:[%s6283_s2 + $0x520] sm:$0xff] }
 0x3c8   : > { %v2958_v37 = vld [vmem:[%s6283_s2 + $0x420] sm:$0xff] }
 0x3c9   : > { %v1207_v39 = vmul.f32 0.0625, %v1205_v38  ;;  %v3005_v38 = vld [vmem:[%s6283_s2 + $0x598] sm:$0xff] }
 0x3cb   : > { %3981 = vmatmul.mubr.f32.vlgmr.msra.gmra.mxu1 %v1207_v39  ;;  %v2973_v39 = vld [vmem:[%s6283_s2 + $0x498] sm:$0xff] }
 0x3cc   : > { %3506 = vmatpush3.msra.mxu1 %v3001_v50  ;;  %v3002_v50 = vld [vmem:[%s6283_s2 + $0x580] sm:$0xff] }
 0x3cd   : > { %3507 = vmatprep.subr.mxu1 %v3016_v52  ;;  %v2986_v52 = vld [vmem:[%s6283_s2 + $0x500] sm:$0xff] }
 0x3ce   : > { %3508 = vmatpush3.msra.mxu1 %v3000_v54  ;;  %v2952_v54 = vld [vmem:[%s6288_s7 + $0x1] sm:$0x1] }
 0x3cf   : > { %3509 = vmatprep.subr.mxu1 %v3015_v56 }
 0x3d0   : > { %3510 = vmatpush3.msra.mxu1 %v2999_v61 }
 0x3d1   : > { %3511 = vmatprep.subr.mxu1 %v3014_v2 }
 0x3d2   : > { %3512 = vmatpush3.msra.mxu1 %v2998_v6 }
 0x3d3   : > { %3513 = vmatprep.subr.mxu1 %v3013_v11 }
 0x3d4   : > { %3514 = vmatpush3.msra.mxu1 %v2997_v18 }
 0x3d5   : > { %3515 = vmatprep.subr.mxu1 %v3012_v21 }
 0x3d6   : > { %3516 = vmatpush3.msra.mxu1 %v2996_v23  ;;  %v3030_v23 = vld [vmem:[%s6285_s4 + $0x150] sm:$0xff] }
 0x3d7   : > { %3517 = vmatprep.subr.mxu1 %v3011_v26  ;;  %v3028_v26 = vld [vmem:[%s6285_s4 + $0x140] sm:$0xff] }
 0x3d8   : > { %3518 = vmatpush3.msra.mxu1 %v2995_v28  ;;  %v3026_v28 = vld [vmem:[%s6285_s4 + $0x130] sm:$0xff] }
 0x3d9   : > { %3519 = vmatprep.subr.mxu1 %v3010_v57  ;;  %v3024_v57 = vld [vmem:[%s6285_s4 + $0x120] sm:$0xff] }
 0x3da   : > { %3520 = vmatpush3.msra.mxu1 %v2994_v62  ;;  %v3022_v62 = vld [vmem:[%s6285_s4 + $0x110] sm:$0xff] }
 0x3db   : > { %3521 = vmatprep.subr.mxu1 %v3009_v0  ;;  %v3020_v0 = vld [vmem:[%s6285_s4 + $0x100] sm:$0xff] }
 0x3dc   : > { %3522 = vmatpush3.msra.mxu1 %v2993_v5  ;;  %v3051_v5 = vld [vmem:[%s6287_s6 + $0x170] sm:$0xff] }
 0x3dd   : > { %3523 = vmatprep.subr.mxu1 %v3008_v8  ;;  %v3049_v8 = vld [vmem:[%s6287_s6 + $0x160] sm:$0xff] }
 0x3de   : > { %3524 = vmatpush3.msra.mxu1 %v2992_v13  ;;  %v3047_v13 = vld [vmem:[%s6287_s6 + $0x150] sm:$0xff] }
 0x3df   : > { %3525 = vmatprep.subr.mxu1 %v3007_v16  ;;  %v3045_v16 = vld [vmem:[%s6287_s6 + $0x140] sm:$0xff] }
 0x3e0   : > { %3526 = vmatpush3.msra.mxu1 %v2991_v32  ;;  %v3043_v32 = vld [vmem:[%s6287_s6 + $0x130] sm:$0xff] }
 0x3e1   : > { %3527 = vmatprep.subr.mxu1 %v3006_v34  ;;  %v3041_v34 = vld [vmem:[%s6287_s6 + $0x120] sm:$0xff] }
 0x3e2   : > { %3528 = vmatpush3.msra.mxu1 %v2990_v36 }
 0x3e3   : > { %3529 = vmatprep.subr.mxu1 %v3005_v38 }
 0x3e4   : > { %3530 = vmatpush3.msra.mxu1 %v2989_v40 }
 0x3e5   : > { %3531 = vmatprep.subr.mxu1 %v3004_v42  ;;  %v3019_v42 = vld [vmem:[%s6284_s3 + $0x2] ss:$0 sm:$0xff] }
 0x48b   : > { %v1293_v44 = vpop.f32.mrf.mxu1 }
 0x48c   : > { %v1294_v45 = vadd.f32 %v2935_v43, %v1293_v44  ;;  %v2972_v43 = vld [vmem:[%s6283_s2 + $0x490] sm:$0xff] }
 0x48d   : > { %v3982_v47 = vpop.f32.mrf.mxu1  ;;  %v2988_v44 = vld [vmem:[%s6283_s2 + $0x510] sm:$0xff] }
 0x48e   : > { %v1297_v48 = vmax.f32 %v1294_v45, 0.0  ;;  %v2956_v45 = vld [vmem:[%s6283_s2 + $0x410] sm:$0xff]  ;;  %v3003_v47 = vld [vmem:[%s6283_s2 + $0x588] sm:$0xff]  ;;  %3532 = vmatpush3.msra.mxu1 %v2988_v44 }
 0x48f   : > { %3533 = vmatprep.subr.mxu1 %v3003_v47 }
 0x490   : > { %4016 = vmatmul.mubr.f32.vlgmr.msra.gmra.mxu0 %v1297_v48  ;;  %v2971_v48 = vld [vmem:[%s6283_s2 + $0x488] sm:$0xff]  ;;  %3534 = vmatpush3.msra.mxu1 %v2987_v24 }
 0x491   : > { %3541 = vmatpush3.msra.mxu0 %v2969_v51  ;;  %v2970_v51 = vld [vmem:[%s6283_s2 + $0x480] sm:$0xff]  ;;  %3535 = vmatprep.subr.mxu1 %v3002_v50 }
 0x492   : > { %3542 = vmatprep.subr.mxu0 %v2984_v53  ;;  %v2954_v53 = vld [vmem:[%s6283_s2 + $0x400] sm:$0xff]  ;;  %3536 = vmatpush3.msra.mxu1 %v2986_v52 }
 0x493   : > { %3543 = vmatpush3.msra.mxu0 %v2968_v55  ;;  %4018 = vmatprep.subr.mxu1 %v5090_v46 }
 0x494   : > { %3544 = vmatprep.subr.mxu0 %v2983_v59 }
 0x495   : > { %3545 = vmatpush3.msra.mxu0 %v2967_v1 }
 0x496   : > { %3546 = vmatprep.subr.mxu0 %v2982_v4 }
 0x497   : > { %3547 = vmatpush3.msra.mxu0 %v2966_v9 }
 0x498   : > { %3548 = vmatprep.subr.mxu0 %v2981_v12  ;;  %v3035_v12 = vld [vmem:[%s6285_s4 + $0x178] sm:$0xff] }
 0x499   : > { %3549 = vmatpush3.msra.mxu0 %v2965_v20 }
 0x49a   : > { %3550 = vmatprep.subr.mxu0 %v2980_v22 }
 0x49b   : > { %3551 = vmatpush3.msra.mxu0 %v2964_v25  ;;  %v3029_v25 = vld [vmem:[%s6285_s4 + $0x148] sm:$0xff] }
 0x49c   : > { %3552 = vmatprep.subr.mxu0 %v2979_v27  ;;  %v3027_v27 = vld [vmem:[%s6285_s4 + $0x138] sm:$0xff] }
 0x49d   : > { %3553 = vmatpush3.msra.mxu0 %v2963_v58  ;;  %v3025_v58 = vld [vmem:[%s6285_s4 + $0x128] sm:$0xff] }
 0x49e   : > { %3554 = vmatprep.subr.mxu0 %v2978_v60  ;;  %v3023_v60 = vld [vmem:[%s6285_s4 + $0x118] sm:$0xff] }
 0x49f   : > { %3555 = vmatpush3.msra.mxu0 %v2962_v63  ;;  %v3021_v63 = vld [vmem:[%s6285_s4 + $0x108] sm:$0xff] }
 0x4a0   : > { %3556 = vmatprep.subr.mxu0 %v2977_v3  ;;  %v3052_v3 = vld [vmem:[%s6287_s6 + $0x178] sm:$0xff] }
 0x4a1   : > { %3557 = vmatpush3.msra.mxu0 %v2961_v7  ;;  %v3050_v7 = vld [vmem:[%s6287_s6 + $0x168] sm:$0xff] }
 0x4a2   : > { %3558 = vmatprep.subr.mxu0 %v2976_v10  ;;  %v3048_v10 = vld [vmem:[%s6287_s6 + $0x158] sm:$0xff] }
 0x4a3   : > { %3559 = vmatpush3.msra.mxu0 %v2960_v15  ;;  %v3046_v15 = vld [vmem:[%s6287_s6 + $0x148] sm:$0xff] }
 0x4a4   : > { %3560 = vmatprep.subr.mxu0 %v2975_v29  ;;  %v3044_v29 = vld [vmem:[%s6287_s6 + $0x138] sm:$0xff] }
 0x4a5   : > { %3561 = vmatpush3.msra.mxu0 %v2959_v33  ;;  %v3042_v33 = vld [vmem:[%s6287_s6 + $0x128] sm:$0xff] }
 0x4a6   : > { %3562 = vmatprep.subr.mxu0 %v2974_v35  ;;  %v3040_v35 = vld [vmem:[%s6287_s6 + $0x118] sm:$0xff] }
 0x4a7   : > { %3563 = vmatpush3.msra.mxu0 %v2958_v37 }
 0x4a8   : > { %3564 = vmatprep.subr.mxu0 %v2973_v39 }
 0x4a9   : > { %3565 = vmatpush3.msra.mxu0 %v2957_v41 }
 0x4aa   : > { %3566 = vmatprep.subr.mxu0 %v2972_v43 }
 0x4ab   : > { %3567 = vmatpush3.msra.mxu0 %v2956_v45 }
 0x4ac   : > { %3568 = vmatprep.subr.mxu0 %v2971_v48 }
 0x4ad   : > { %3569 = vmatpush3.msra.mxu0 %v2955_v49 }
 0x4ae   : > { %3570 = vmatprep.subr.mxu0 %v2970_v51 }
 0x4af   : > { %3571 = vmatpush3.msra.mxu0 %v2954_v53  ;;  %v3039_v53 = vld [vmem:[%s6287_s6 + $0x110] sm:$0xff] }
 0x4b0   : > { %4053 = vmatprep.subr.mxu0 %v5090_v46 }
 0x550   : > { %v1383_v55 = vpop.f32.mrf.mxu0 }
 0x551   : > { %v1384_v56 = vadd.f32 %v2952_v54, %v1383_v55  ;;  %v3038_v54 = vld [vmem:[%s6287_s6 + $0x108] sm:$0xff]  ;;  %v3037_v55 = vld [vmem:[%s6287_s6 + $0x100] sm:$0xff] }
 0x552   : > { %v4017_v59 = vpop.f32.mrf.mxu0 }
 0x553   : > { %v2953_v61 = vmul.f32 -1.442695, %v1384_v56  ;;  %v3036_v56 = vld [vmem:[%s6286_s5 + $0x2] sm:$0x1] }
 0x555   : > { %4277 = vpow2.f32 %v2953_v61 }
 0x562   : > { %v4278_v1 = vpop.eup %4277 }
 0x563   : > { %v1390_v2 = vadd.f32 1.0, %v4278_v1 }
 0x565   : > { %4279 = vrcp.f32 %v1390_v2 }
 0x572   : > { %v4280_v4 = vpop.eup %4279 }
 0x573   : > { %v1396_v6 = vrot.slane %v4280_v4, %v4813_v14  ;;  %v3118_v4 = vld [vmem:[%s6283_s2 + $0x7f8] sm:$0xff] }
 0x575   : > { %v1397_v9 = vmul.f32 %v1396_v6, %v1197_v17  ;;  %v1398_v11 = vmul.f32 %v1396_v6, %v1198_v31  ;;  %v3032_v17 = vld [vmem:[%s6285_s4 + $0x160] sm:$0xff]  ;;  %v3031_v31 = vld [vmem:[%s6285_s4 + $0x158] sm:$0xff] }
 0x576   : > { %v3086_v6 = vld [vmem:[%s6283_s2 + $0x6f8] sm:$0xff] }
 0x577   : > { %1399 = vst [vmem:[#allocation2 + $0x8] sm:$0xff] %v1397_v9  ;;  %1400 = vst [vmem:[#allocation2 + $0x10] sm:$0xff] %v1398_v11  ;;  %v3102_v9 = vld [vmem:[%s6283_s2 + $0x778] sm:$0xff] }
 0x578   : > { %v3070_v11 = vld [vmem:[%s6283_s2 + $0x678] sm:$0xff] }
 0x57e   : > { %v1438_v18 = vld [vmem:[#allocation2 + $0xa] ss:$2 sm:$0xff]  ;;  %v1403_v20 = vld [vmem:[#allocation2 + $0x9] ss:$2 sm:$0xff] }
 0x57f   : > { %v1437_v21 = vld [vmem:[#allocation2 + $0x8] ss:$2 sm:$0xff]  ;;  %1536 = vmatprep.mubr.f32.mxu1 %v1438_v18  ;;  %1606 = vmatprep.mubr.f32.mxu0 %v1403_v20  ;;  %v1402_v22 = vld [vmem:[#allocation2 + $0x7] ss:$2 sm:$0xff] }
 0x580   : > { %1821 = vst [vmem:[#allocation2 + $0x10] sm:$0x1] %v5090_v46  ;;  %1537 = vmatmul.mubr.f32.vlgmr.msra.gmra.mxu1 %v1437_v21  ;;  %1607 = vmatmul.mubr.f32.vlgmr.msra.gmra.mxu0 %v1402_v22  ;;  %v3085_v18 = vld [vmem:[%s6283_s2 + $0x6f0] sm:$0xff]  ;;  %v3116_v22 = vld [vmem:[%s6283_s2 + $0x7e8] sm:$0xff] }
 0x581   : > { %4019 = vmatpush3.msra.mxu1 %v3035_v12  ;;  %4050 = vmatprep.mubr.msk.f32.mxu1 %vm4304_vm0, %v5090_v46  ;;  %v3117_v12 = vld [vmem:[%s6283_s2 + $0x7f0] sm:$0xff] }
 0x582   : > { %4020 = vmatprep.subr.mxu1 %v5090_v46  ;;  %4085 = vmatprep.mubr.msk.f32.mxu0 %vm4304_vm0, %v5090_v46  ;;  %v3101_v20 = vld [vmem:[%s6283_s2 + $0x770] sm:$0xff] }
 0x583   : > { %4021 = vmatpush3.msra.mxu1 %v3034_v19  ;;  %4054 = vmatpush3.msra.mxu0 %v3052_v3  ;;  %v3069_v21 = vld [vmem:[%s6283_s2 + $0x670] sm:$0xff]  ;;  %v3084_v19 = vld [vmem:[%s6283_s2 + $0x6e8] sm:$0xff] }
 0x584   : > { %4022 = vmatprep.subr.mxu1 %v5090_v46  ;;  %4055 = vmatprep.subr.mxu0 %v5090_v46  ;;  %v3112_v3 = vld [vmem:[%s6283_s2 + $0x7c8] sm:$0xff] }
 0x585   : > { %4023 = vmatpush3.msra.mxu1 %v3033_v30  ;;  %4056 = vmatpush3.msra.mxu0 %v3051_v5  ;;  %v3100_v30 = vld [vmem:[%s6283_s2 + $0x768] sm:$0xff] }
 0x586   : > { %4024 = vmatprep.subr.mxu1 %v5090_v46  ;;  %4057 = vmatprep.subr.mxu0 %v5090_v46  ;;  %v3080_v5 = vld [vmem:[%s6283_s2 + $0x6c8] sm:$0xff] }
 0x587   : > { %4025 = vmatpush3.msra.mxu1 %v3032_v17  ;;  %4058 = vmatpush3.msra.mxu0 %v3050_v7  ;;  %v3068_v17 = vld [vmem:[%s6283_s2 + $0x668] sm:$0xff] }
 0x588   : > { %4026 = vmatprep.subr.mxu1 %v5090_v46  ;;  %4059 = vmatprep.subr.mxu0 %v5090_v46  ;;  %v3096_v7 = vld [vmem:[%s6283_s2 + $0x748] sm:$0xff] }
 0x589   : > { %4027 = vmatpush3.msra.mxu1 %v3031_v31  ;;  %4060 = vmatpush3.msra.mxu0 %v3049_v8  ;;  %v3115_v31 = vld [vmem:[%s6283_s2 + $0x7e0] sm:$0xff]  ;;  %v3064_v8 = vld [vmem:[%s6283_s2 + $0x648] sm:$0xff] }
 0x58a   : > { %4028 = vmatprep.subr.mxu1 %v5090_v46  ;;  %4061 = vmatprep.subr.mxu0 %v5090_v46 }
 0x58b   : > { %4029 = vmatpush3.msra.mxu1 %v3030_v23  ;;  %4062 = vmatpush3.msra.mxu0 %v3048_v10  ;;  %v3083_v23 = vld [vmem:[%s6283_s2 + $0x6e0] sm:$0xff] }
 0x58c   : > { %4030 = vmatprep.subr.mxu1 %v5090_v46  ;;  %4063 = vmatprep.subr.mxu0 %v5090_v46  ;;  %v3111_v10 = vld [vmem:[%s6283_s2 + $0x7c0] sm:$0xff] }
 0x58d   : > { %4031 = vmatpush3.msra.mxu1 %v3029_v25  ;;  %4064 = vmatpush3.msra.mxu0 %v3047_v13  ;;  %v3099_v25 = vld [vmem:[%s6283_s2 + $0x760] sm:$0xff] }
 0x58e   : > { %4032 = vmatprep.subr.mxu1 %v5090_v46  ;;  %4065 = vmatprep.subr.mxu0 %v5090_v46  ;;  %v3079_v13 = vld [vmem:[%s6283_s2 + $0x6c0] sm:$0xff] }
 0x58f   : > { %4033 = vmatpush3.msra.mxu1 %v3028_v26  ;;  %4066 = vmatpush3.msra.mxu0 %v3046_v15  ;;  %v3067_v26 = vld [vmem:[%s6283_s2 + $0x660] sm:$0xff] }
 0x590   : > { %4034 = vmatprep.subr.mxu1 %v5090_v46  ;;  %4067 = vmatprep.subr.mxu0 %v5090_v46  ;;  %v3095_v15 = vld [vmem:[%s6283_s2 + $0x740] sm:$0xff] }
 0x591   : > { %4035 = vmatpush3.msra.mxu1 %v3027_v27  ;;  %4068 = vmatpush3.msra.mxu0 %v3045_v16  ;;  %v3114_v27 = vld [vmem:[%s6283_s2 + $0x7d8] sm:$0xff]  ;;  %v3063_v16 = vld [vmem:[%s6283_s2 + $0x640] sm:$0xff] }
 0x592   : > { %4036 = vmatprep.subr.mxu1 %v5090_v46  ;;  %4069 = vmatprep.subr.mxu0 %v5090_v46 }
 0x593   : > { %4037 = vmatpush3.msra.mxu1 %v3026_v28  ;;  %4070 = vmatpush3.msra.mxu0 %v3044_v29  ;;  %v3082_v28 = vld [vmem:[%s6283_s2 + $0x6d8] sm:$0xff] }
 0x594   : > { %4038 = vmatprep.subr.mxu1 %v5090_v46  ;;  %4071 = vmatprep.subr.mxu0 %v5090_v46  ;;  %v3110_v29 = vld [vmem:[%s6283_s2 + $0x7b8] sm:$0xff] }
 0x595   : > { %4039 = vmatpush3.msra.mxu1 %v3025_v58  ;;  %4072 = vmatpush3.msra.mxu0 %v3043_v32  ;;  %v3098_v58 = vld [vmem:[%s6283_s2 + $0x758] sm:$0xff] }
 0x596   : > { %4040 = vmatprep.subr.mxu1 %v5090_v46  ;;  %4073 = vmatprep.subr.mxu0 %v5090_v46  ;;  %v3078_v32 = vld [vmem:[%s6283_s2 + $0x6b8] sm:$0xff] }
 0x597   : > { %4041 = vmatpush3.msra.mxu1 %v3024_v57  ;;  %4074 = vmatpush3.msra.mxu0 %v3042_v33  ;;  %v3066_v57 = vld [vmem:[%s6283_s2 + $0x658] sm:$0xff] }
 0x598   : > { %4042 = vmatprep.subr.mxu1 %v5090_v46  ;;  %4075 = vmatprep.subr.mxu0 %v5090_v46  ;;  %v3094_v33 = vld [vmem:[%s6283_s2 + $0x738] sm:$0xff] }
 0x599   : > { %4043 = vmatpush3.msra.mxu1 %v3023_v60  ;;  %4076 = vmatpush3.msra.mxu0 %v3041_v34  ;;  %v3113_v60 = vld [vmem:[%s6283_s2 + $0x7d0] sm:$0xff]  ;;  %v3062_v34 = vld [vmem:[%s6283_s2 + $0x638] sm:$0xff] }
 0x59a   : > { %4044 = vmatprep.subr.mxu1 %v5090_v46  ;;  %4077 = vmatprep.subr.mxu0 %v5090_v46 }
 0x59b   : > { %4045 = vmatpush3.msra.mxu1 %v3022_v62  ;;  %4078 = vmatpush3.msra.mxu0 %v3040_v35  ;;  %v3081_v62 = vld [vmem:[%s6283_s2 + $0x6d0] sm:$0xff] }
 0x59c   : > { %4046 = vmatprep.subr.mxu1 %v5090_v46  ;;  %4079 = vmatprep.subr.mxu0 %v5090_v46  ;;  %v3109_v35 = vld [vmem:[%s6283_s2 + $0x7b0] sm:$0xff] }
 0x59d   : > { %4047 = vmatpush3.msra.mxu1 %v3021_v63  ;;  %4080 = vmatpush3.msra.mxu0 %v3039_v53  ;;  %v3097_v63 = vld [vmem:[%s6283_s2 + $0x750] sm:$0xff] }
 0x59e   : > { %4048 = vmatprep.subr.mxu1 %v5090_v46  ;;  %4081 = vmatprep.subr.mxu0 %v5090_v46  ;;  %v3073_v53 = vld [vmem:[%s6283_s2 + $0x690] sm:$0xff] }
 0x59f   : > { %4049 = vmatpush3.msra.mxu1 %v3020_v0  ;;  %4082 = vmatpush3.msra.mxu0 %v3038_v54  ;;  %v3065_v0 = vld [vmem:[%s6283_s2 + $0x650] sm:$0xff] }
 0x5a0   : > { %4083 = vmatprep.subr.mxu0 %v5090_v46  ;;  %3609 = vmatprep.subr.mxu1 %v3118_v4  ;;  %v3089_v54 = vld [vmem:[%s6283_s2 + $0x710] sm:$0xff]  ;;  %v3071_v4 = vld [vmem:[%s6283_s2 + $0x680] sm:$0xff] }
 0x5a1   : > { %4084 = vmatpush3.msra.mxu0 %v3037_v55  ;;  %v3057_v55 = vld [vmem:[%s6283_s2 + $0x610] sm:$0xff] }
 0x5a2   : > { %3644 = vmatprep.subr.mxu0 %v3086_v6  ;;  %v3087_v6 = vld [vmem:[%s6283_s2 + $0x700] sm:$0xff] }
 0x640   : > { %v3537_v36 = vpop.f32.mrf.mxu1  ;;  %v3572_v37 = vpop.f32.mrf.mxu0 }
 0x642   : > { %v3538_v38 = vpop.f32.mrf.mxu1  ;;  %v3573_v39 = vpop.f32.mrf.mxu0 }
 0x643   : > { %v3539_v40 = vadd.f32 %v3538_v38, %v3537_v36  ;;  %v3574_v41 = vadd.f32 %v3573_v39, %v3572_v37  ;;  %v3077_v36 = vld [vmem:[%s6283_s2 + $0x6b0] sm:$0xff]  ;;  %v3108_v39 = vld [vmem:[%s6283_s2 + $0x7a8] sm:$0xff] }
 0x644   : > { %v3093_v37 = vld [vmem:[%s6283_s2 + $0x730] sm:$0xff] }
 0x645   : > { %v1609_v43 = vadd.f32 %v3574_v41, %v3539_v40  ;;  %v3061_v38 = vld [vmem:[%s6283_s2 + $0x630] sm:$0xff]  ;;  %v3076_v40 = vld [vmem:[%s6283_s2 + $0x6a8] sm:$0xff] }
 0x646   : > { %v3092_v41 = vld [vmem:[%s6283_s2 + $0x728] sm:$0xff] }
 0x647   : > { %v1620_v44 = vadd.f32 %v3019_v42, %v1609_v43  ;;  %v3060_v42 = vld [vmem:[%s6283_s2 + $0x628] sm:$0xff]  ;;  %v3107_v43 = vld [vmem:[%s6283_s2 + $0x7a0] sm:$0xff] }
 0x649   : > { %v5497_v45 = vmax.f32 %v1620_v44, 0.0  ;;  %v3075_v44 = vld [vmem:[%s6283_s2 + $0x6a0] sm:$0xff] }
 0x64b   : > { %v1622_v47 = vrot.slane %v5497_v45, 4 }
 0x64d   : > { %v1623_v48 = vadd.f32 %v1622_v47, %v5497_v45  ;;  %v3091_v47 = vld [vmem:[%s6283_s2 + $0x720] sm:$0xff] }
 0x64f   : > { %v1624_v24 = vrot.slane %v1623_v48, 2 }
 0x651   : > { %v1625_v49 = vadd.f32 %v1624_v24, %v1623_v48  ;;  %v3059_v48 = vld [vmem:[%s6283_s2 + $0x620] sm:$0xff]  ;;  %v3106_v24 = vld [vmem:[%s6283_s2 + $0x798] sm:$0xff] }
 0x653   : > { %v1626_v50 = vrot.slane %v1625_v49, 1 }
 0x655   : > { %v1627_v51 = vadd.f32 %v1626_v50, %v1625_v49  ;;  %v3074_v49 = vld [vmem:[%s6283_s2 + $0x698] sm:$0xff] }
 0x656   : > { %v3090_v50 = vld [vmem:[%s6283_s2 + $0x718] sm:$0xff] }
 0x657   : > { %v1629_v52 = vmul.f32 0.125, %v1627_v51  ;;  %v3058_v51 = vld [vmem:[%s6283_s2 + $0x618] sm:$0xff] }
 0x659   : > { %4051 = vmatmul.mubr.f32.vlgmr.msra.gmra.mxu1 %v1629_v52  ;;  %v3105_v52 = vld [vmem:[%s6283_s2 + $0x790] sm:$0xff] }
 0x65a   : > { %3610 = vmatpush3.msra.mxu1 %v3102_v9  ;;  %v3055_v9 = vld [vmem:[%s6283_s2 + $0x600] sm:$0xff] }
 0x65b   : > { %3611 = vmatprep.subr.mxu1 %v3117_v12 }
 0x65c   : > { %3612 = vmatpush3.msra.mxu1 %v3101_v20 }
 0x65d   : > { %3613 = vmatprep.subr.mxu1 %v3116_v22 }
 0x65e   : > { %3614 = vmatpush3.msra.mxu1 %v3100_v30 }
 0x65f   : > { %3615 = vmatprep.subr.mxu1 %v3115_v31 }
 0x660   : > { %3616 = vmatpush3.msra.mxu1 %v3099_v25 }
 0x661   : > { %3617 = vmatprep.subr.mxu1 %v3114_v27 }
 0x662   : > { %3618 = vmatpush3.msra.mxu1 %v3098_v58  ;;  %v3134_v58 = vld [vmem:[%s6285_s4 + $0x1e8] sm:$0xff] }
 0x663   : > { %3619 = vmatprep.subr.mxu1 %v3113_v60  ;;  %v3132_v60 = vld [vmem:[%s6285_s4 + $0x1d8] sm:$0xff] }
 0x664   : > { %3620 = vmatpush3.msra.mxu1 %v3097_v63  ;;  %v3130_v63 = vld [vmem:[%s6285_s4 + $0x1c8] sm:$0xff] }
 0x665   : > { %3621 = vmatprep.subr.mxu1 %v3112_v3  ;;  %v3128_v3 = vld [vmem:[%s6285_s4 + $0x1b8] sm:$0xff] }
 0x666   : > { %3622 = vmatpush3.msra.mxu1 %v3096_v7  ;;  %v3126_v7 = vld [vmem:[%s6285_s4 + $0x1a8] sm:$0xff] }
 0x667   : > { %3623 = vmatprep.subr.mxu1 %v3111_v10  ;;  %v3124_v10 = vld [vmem:[%s6285_s4 + $0x198] sm:$0xff] }
 0x668   : > { %3624 = vmatpush3.msra.mxu1 %v3095_v15  ;;  %v3122_v15 = vld [vmem:[%s6285_s4 + $0x188] sm:$0xff] }
 0x669   : > { %3625 = vmatprep.subr.mxu1 %v3110_v29  ;;  %v3153_v29 = vld [vmem:[%s6287_s6 + $0x1f8] sm:$0xff] }
 0x66a   : > { %3626 = vmatpush3.msra.mxu1 %v3094_v33  ;;  %v3151_v33 = vld [vmem:[%s6287_s6 + $0x1e8] sm:$0xff] }
 0x66b   : > { %3627 = vmatprep.subr.mxu1 %v3109_v35  ;;  %v3149_v35 = vld [vmem:[%s6287_s6 + $0x1d8] sm:$0xff] }
 0x66c   : > { %3628 = vmatpush3.msra.mxu1 %v3093_v37  ;;  %v3147_v37 = vld [vmem:[%s6287_s6 + $0x1c8] sm:$0xff] }
 0x66d   : > { %3629 = vmatprep.subr.mxu1 %v3108_v39  ;;  %v3145_v39 = vld [vmem:[%s6287_s6 + $0x1b8] sm:$0xff] }
 0x66e   : > { %3630 = vmatpush3.msra.mxu1 %v3092_v41  ;;  %v3143_v41 = vld [vmem:[%s6287_s6 + $0x1a8] sm:$0xff] }
 0x66f   : > { %3631 = vmatprep.subr.mxu1 %v3107_v43  ;;  %v3141_v43 = vld [vmem:[%s6287_s6 + $0x198] sm:$0xff] }
 0x670   : > { %3632 = vmatpush3.msra.mxu1 %v3091_v47 }
 0x671   : > { %3633 = vmatprep.subr.mxu1 %v3106_v24 }
 0x672   : > { %3634 = vmatpush3.msra.mxu1 %v3090_v50 }
 0x673   : > { %3635 = vmatprep.subr.mxu1 %v3105_v52 }
 0x674   : > { %3636 = vmatpush3.msra.mxu1 %v3089_v54 }
 0x719   : > { %v1715_v59 = vpop.f32.mrf.mxu1 }
 0x71a   : > { %v1716_v61 = vadd.f32 %v3036_v56, %v1715_v59  ;;  %v3104_v56 = vld [vmem:[%s6283_s2 + $0x788] sm:$0xff] }
 0x71b   : > { %v4052_v1 = vpop.f32.mrf.mxu1  ;;  %v3072_v59 = vld [vmem:[%s6283_s2 + $0x688] sm:$0xff]  ;;  %3637 = vmatprep.subr.mxu1 %v3104_v56 }
 0x71c   : > { %v1719_v2 = vmax.f32 %v1716_v61, 0.0  ;;  %v3088_v61 = vld [vmem:[%s6283_s2 + $0x708] sm:$0xff] }
 0x71d   : > { %v3056_v1 = vld [vmem:[%s6283_s2 + $0x608] sm:$0xff]  ;;  %3638 = vmatpush3.msra.mxu1 %v3088_v61 }
 0x71e   : > { %4086 = vmatmul.mubr.f32.vlgmr.msra.gmra.mxu0 %v1719_v2  ;;  %v3103_v2 = vld [vmem:[%s6283_s2 + $0x780] sm:$0xff] }
 0x71f   : > { %3645 = vmatpush3.msra.mxu0 %v3070_v11  ;;  %3639 = vmatprep.subr.mxu1 %v3103_v2  ;;  %v3053_v11 = vld [vmem:[%s6288_s7 + $0x2] sm:$0x1] }
 0x720   : > { %3646 = vmatprep.subr.mxu0 %v3085_v18  ;;  %3640 = vmatpush3.msra.mxu1 %v3087_v6 }
 0x721   : > { %3647 = vmatpush3.msra.mxu0 %v3069_v21  ;;  %4088 = vmatprep.subr.mxu1 %v5090_v46 }
 0x722   : > { %3648 = vmatprep.subr.mxu0 %v3084_v19 }
 0x723   : > { %3649 = vmatpush3.msra.mxu0 %v3068_v17 }
 0x724   : > { %3650 = vmatprep.subr.mxu0 %v3083_v23 }
 0x725   : > { %3651 = vmatpush3.msra.mxu0 %v3067_v26 }
 0x726   : > { %3652 = vmatprep.subr.mxu0 %v3082_v28  ;;  %v5717_v28 = vld [vmem:[#allocation2] sm:$0xff] }
 0x727   : > { %3653 = vmatpush3.msra.mxu0 %v3066_v57  ;;  %v3133_v57 = vld [vmem:[%s6285_s4 + $0x1e0] sm:$0xff] }
 0x728   : > { %3654 = vmatprep.subr.mxu0 %v3081_v62  ;;  %v3131_v62 = vld [vmem:[%s6285_s4 + $0x1d0] sm:$0xff] }
 0x729   : > { %3655 = vmatpush3.msra.mxu0 %v3065_v0  ;;  %v3129_v0 = vld [vmem:[%s6285_s4 + $0x1c0] sm:$0xff] }
 0x72a   : > { %3656 = vmatprep.subr.mxu0 %v3080_v5  ;;  %v3127_v5 = vld [vmem:[%s6285_s4 + $0x1b0] sm:$0xff] }
 0x72b   : > { %3657 = vmatpush3.msra.mxu0 %v3064_v8  ;;  %v3125_v8 = vld [vmem:[%s6285_s4 + $0x1a0] sm:$0xff] }
 0x72c   : > { %3658 = vmatprep.subr.mxu0 %v3079_v13  ;;  %v3123_v13 = vld [vmem:[%s6285_s4 + $0x190] sm:$0xff] }
 0x72d   : > { %3659 = vmatpush3.msra.mxu0 %v3063_v16  ;;  %v3121_v16 = vld [vmem:[%s6285_s4 + $0x180] sm:$0xff] }
 0x72e   : > { %3660 = vmatprep.subr.mxu0 %v3078_v32  ;;  %v3152_v32 = vld [vmem:[%s6287_s6 + $0x1f0] sm:$0xff] }
 0x72f   : > { %3661 = vmatpush3.msra.mxu0 %v3062_v34  ;;  %v3150_v34 = vld [vmem:[%s6287_s6 + $0x1e0] sm:$0xff] }
 0x730   : > { %3662 = vmatprep.subr.mxu0 %v3077_v36  ;;  %v3148_v36 = vld [vmem:[%s6287_s6 + $0x1d0] sm:$0xff] }
 0x731   : > { %3663 = vmatpush3.msra.mxu0 %v3061_v38  ;;  %v3146_v38 = vld [vmem:[%s6287_s6 + $0x1c0] sm:$0xff] }
 0x732   : > { %3664 = vmatprep.subr.mxu0 %v3076_v40  ;;  %v3144_v40 = vld [vmem:[%s6287_s6 + $0x1b0] sm:$0xff] }
 0x733   : > { %3665 = vmatpush3.msra.mxu0 %v3060_v42  ;;  %v3142_v42 = vld [vmem:[%s6287_s6 + $0x1a0] sm:$0xff] }
 0x734   : > { %3666 = vmatprep.subr.mxu0 %v3075_v44 }
 0x735   : > { %3667 = vmatpush3.msra.mxu0 %v3059_v48 }
 0x736   : > { %3668 = vmatprep.subr.mxu0 %v3074_v49 }
 0x737   : > { %3669 = vmatpush3.msra.mxu0 %v3058_v51  ;;  %v3120_v51 = vld [vmem:[%s6284_s3 + $0x3] ss:$0 sm:$0xff] }
 0x738   : > { %3670 = vmatprep.subr.mxu0 %v3073_v53 }
 0x739   : > { %3671 = vmatpush3.msra.mxu0 %v3057_v55 }
 0x73a   : > { %3672 = vmatprep.subr.mxu0 %v3072_v59 }
 0x73b   : > { %3673 = vmatpush3.msra.mxu0 %v3056_v1 }
 0x73c   : > { %3674 = vmatprep.subr.mxu0 %v3071_v4 }
 0x73d   : > { %3675 = vmatpush3.msra.mxu0 %v3055_v9  ;;  %v3140_v9 = vld [vmem:[%s6287_s6 + $0x190] sm:$0xff] }
 0x73e   : > { %4123 = vmatprep.subr.mxu0 %v5090_v46  ;;  %v3136_v46 = vld [vmem:[%s6285_s4 + $0x1f8] sm:$0xff] }
 0x7de   : > { %v1805_v12 = vpop.f32.mrf.mxu0 }
 0x7df   : > { %v1806_v18 = vadd.f32 %v3053_v11, %v1805_v12  ;;  %v3139_v11 = vld [vmem:[%s6287_s6 + $0x188] sm:$0xff]  ;;  %v3138_v12 = vld [vmem:[%s6287_s6 + $0x180] sm:$0xff] }
 0x7e0   : > { %v4087_v20 = vpop.f32.mrf.mxu0 }
 0x7e1   : > { %v3054_v21 = vmul.f32 -1.442695, %v1806_v18  ;;  %v3137_v18 = vld [vmem:[%s6286_s5 + $0x3] sm:$0x1] }
 0x7e3   : > { %4281 = vpow2.f32 %v3054_v21 }
 0x7f0   : > { %v4282_v22 = vpop.eup %4281 }
 0x7f1   : > { %v1812_v19 = vadd.f32 1.0, %v4282_v22 }
 0x7f3   : > { %4283 = vrcp.f32 %v1812_v19 }
 0x800   : > { %v4284_v30 = vpop.eup %4283 }
 0x801   : > { %v1818_v17 = vrot.slane %v4284_v30, %v4813_v14  ;;  %v3219_v30 = vld [vmem:[%s6283_s2 + $0x9f8] sm:$0xff] }
 0x803   : > { %v1819_v31 = vmul.f32 %v1818_v17, %v5497_v45  ;;  %v3135_v45 = vld [vmem:[%s6285_s4 + $0x1f0] sm:$0xff]  ;;  %v3187_v17 = vld [vmem:[%s6283_s2 + $0x8f8] sm:$0xff] }
 0x805   : > { %1820 = vst [vmem:[#allocation2 + $0x8] sm:$0xff] %v1819_v31  ;;  %v3203_v31 = vld [vmem:[%s6283_s2 + $0x978] sm:$0xff] }
 0x80c   : > { %v1858_v23 = vld [vmem:[#allocation2 + $0xa] ss:$2 sm:$0xf]  ;;  %v1823_v25 = vld [vmem:[#allocation2 + $0x9] ss:$2 sm:$0xf] }
 0x80d   : > { %1956 = vmatprep.mubr.f32.mxu1 %v1858_v23  ;;  %2026 = vmatprep.mubr.f32.mxu0 %v1823_v25  ;;  %v1857_v26 = vld [vmem:[#allocation2 + $0x8] ss:$2 sm:$0xf]  ;;  %v1822_v27 = vld [vmem:[#allocation2 + $0x7] ss:$2 sm:$0xf] }
 0x80e   : > { %1957 = vmatmul.mubr.f32.vlgmr.msra.gmra.mxu1 %v1857_v26  ;;  %2243 = vst [vmem:[#allocation2 + $0xc] sm:$0x1] %v5717_v28  ;;  %2027 = vmatmul.mubr.f32.vlgmr.msra.gmra.mxu0 %v1822_v27  ;;  %v3218_v23 = vld [vmem:[%s6283_s2 + $0x9f0] sm:$0xff] }
 0x80f   : > { %4089 = vmatpush3.msra.mxu1 %v3136_v46  ;;  %4120 = vmatprep.mubr.msk.f32.mxu1 %vm4304_vm0, %v5717_v28  ;;  %v3171_v46 = vld [vmem:[%s6283_s2 + $0x878] sm:$0xff]  ;;  %v3186_v25 = vld [vmem:[%s6283_s2 + $0x8f0] sm:$0xff] }
 0x810   : > { %4090 = vmatprep.subr.mxu1 %v5717_v28  ;;  %4155 = vmatprep.mubr.msk.f32.mxu0 %vm4304_vm0, %v5717_v28  ;;  %v3202_v26 = vld [vmem:[%s6283_s2 + $0x970] sm:$0xff] }
 0x811   : > { %4091 = vmatpush3.msra.mxu1 %v3135_v45  ;;  %4124 = vmatpush3.msra.mxu0 %v3153_v29  ;;  %v3170_v27 = vld [vmem:[%s6283_s2 + $0x870] sm:$0xff]  ;;  %v3217_v45 = vld [vmem:[%s6283_s2 + $0x9e8] sm:$0xff] }
 0x812   : > { %4092 = vmatprep.subr.mxu1 %v5717_v28  ;;  %4125 = vmatprep.subr.mxu0 %v5717_v28  ;;  %v3166_v29 = vld [vmem:[%s6283_s2 + $0x850] sm:$0xff] }
 0x813   : > { %4093 = vmatpush3.msra.mxu1 %v3134_v58  ;;  %4126 = vmatpush3.msra.mxu0 %v3152_v32  ;;  %v3185_v58 = vld [vmem:[%s6283_s2 + $0x8e8] sm:$0xff] }
 0x814   : > { %4094 = vmatprep.subr.mxu1 %v5717_v28  ;;  %4127 = vmatprep.subr.mxu0 %v5717_v28  ;;  %v3213_v32 = vld [vmem:[%s6283_s2 + $0x9c8] sm:$0xff] }
 0x815   : > { %4095 = vmatpush3.msra.mxu1 %v3133_v57  ;;  %4128 = vmatpush3.msra.mxu0 %v3151_v33  ;;  %v3201_v57 = vld [vmem:[%s6283_s2 + $0x968] sm:$0xff] }
 0x816   : > { %4096 = vmatprep.subr.mxu1 %v5717_v28  ;;  %4129 = vmatprep.subr.mxu0 %v5717_v28  ;;  %v3181_v33 = vld [vmem:[%s6283_s2 + $0x8c8] sm:$0xff] }
 0x817   : > { %4097 = vmatpush3.msra.mxu1 %v3132_v60  ;;  %4130 = vmatpush3.msra.mxu0 %v3150_v34  ;;  %v3169_v60 = vld [vmem:[%s6283_s2 + $0x868] sm:$0xff] }
 0x818   : > { %4098 = vmatprep.subr.mxu1 %v5717_v28  ;;  %4131 = vmatprep.subr.mxu0 %v5717_v28  ;;  %v3197_v34 = vld [vmem:[%s6283_s2 + $0x948] sm:$0xff] }
 0x819   : > { %4099 = vmatpush3.msra.mxu1 %v3131_v62  ;;  %4132 = vmatpush3.msra.mxu0 %v3149_v35  ;;  %v3216_v62 = vld [vmem:[%s6283_s2 + $0x9e0] sm:$0xff]  ;;  %v3165_v35 = vld [vmem:[%s6283_s2 + $0x848] sm:$0xff] }
 0x81a   : > { %4100 = vmatprep.subr.mxu1 %v5717_v28  ;;  %4133 = vmatprep.subr.mxu0 %v5717_v28 }
 0x81b   : > { %4101 = vmatpush3.msra.mxu1 %v3130_v63  ;;  %4134 = vmatpush3.msra.mxu0 %v3148_v36  ;;  %v3184_v63 = vld [vmem:[%s6283_s2 + $0x8e0] sm:$0xff] }
 0x81c   : > { %4102 = vmatprep.subr.mxu1 %v5717_v28  ;;  %4135 = vmatprep.subr.mxu0 %v5717_v28  ;;  %v3212_v36 = vld [vmem:[%s6283_s2 + $0x9c0] sm:$0xff] }
 0x81d   : > { %4103 = vmatpush3.msra.mxu1 %v3129_v0  ;;  %4136 = vmatpush3.msra.mxu0 %v3147_v37  ;;  %v3200_v0 = vld [vmem:[%s6283_s2 + $0x960] sm:$0xff] }
 0x81e   : > { %4104 = vmatprep.subr.mxu1 %v5717_v28  ;;  %4137 = vmatprep.subr.mxu0 %v5717_v28  ;;  %v3180_v37 = vld [vmem:[%s6283_s2 + $0x8c0] sm:$0xff] }
 0x81f   : > { %4105 = vmatpush3.msra.mxu1 %v3128_v3  ;;  %4138 = vmatpush3.msra.mxu0 %v3146_v38  ;;  %v3168_v3 = vld [vmem:[%s6283_s2 + $0x860] sm:$0xff] }
 0x820   : > { %4106 = vmatprep.subr.mxu1 %v5717_v28  ;;  %4139 = vmatprep.subr.mxu0 %v5717_v28  ;;  %v3196_v38 = vld [vmem:[%s6283_s2 + $0x940] sm:$0xff] }
 0x821   : > { %4107 = vmatpush3.msra.mxu1 %v3127_v5  ;;  %4140 = vmatpush3.msra.mxu0 %v3145_v39  ;;  %v3215_v5 = vld [vmem:[%s6283_s2 + $0x9d8] sm:$0xff]  ;;  %v3164_v39 = vld [vmem:[%s6283_s2 + $0x840] sm:$0xff] }
 0x822   : > { %4108 = vmatprep.subr.mxu1 %v5717_v28  ;;  %4141 = vmatprep.subr.mxu0 %v5717_v28 }
 0x823   : > { %4109 = vmatpush3.msra.mxu1 %v3126_v7  ;;  %4142 = vmatpush3.msra.mxu0 %v3144_v40  ;;  %v3183_v7 = vld [vmem:[%s6283_s2 + $0x8d8] sm:$0xff] }
 0x824   : > { %4110 = vmatprep.subr.mxu1 %v5717_v28  ;;  %4143 = vmatprep.subr.mxu0 %v5717_v28  ;;  %v3211_v40 = vld [vmem:[%s6283_s2 + $0x9b8] sm:$0xff] }
 0x825   : > { %4111 = vmatpush3.msra.mxu1 %v3125_v8  ;;  %4144 = vmatpush3.msra.mxu0 %v3143_v41  ;;  %v3199_v8 = vld [vmem:[%s6283_s2 + $0x958] sm:$0xff] }
 0x826   : > { %4112 = vmatprep.subr.mxu1 %v5717_v28  ;;  %4145 = vmatprep.subr.mxu0 %v5717_v28  ;;  %v3179_v41 = vld [vmem:[%s6283_s2 + $0x8b8] sm:$0xff] }
 0x827   : > { %4113 = vmatpush3.msra.mxu1 %v3124_v10  ;;  %4146 = vmatpush3.msra.mxu0 %v3142_v42  ;;  %v3167_v10 = vld [vmem:[%s6283_s2 + $0x858] sm:$0xff] }
 0x828   : > { %4114 = vmatprep.subr.mxu1 %v5717_v28  ;;  %4147 = vmatprep.subr.mxu0 %v5717_v28  ;;  %v3195_v42 = vld [vmem:[%s6283_s2 + $0x938] sm:$0xff] }
 0x829   : > { %4115 = vmatpush3.msra.mxu1 %v3123_v13  ;;  %4148 = vmatpush3.msra.mxu0 %v3141_v43  ;;  %v3214_v13 = vld [vmem:[%s6283_s2 + $0x9d0] sm:$0xff]  ;;  %v3163_v43 = vld [vmem:[%s6283_s2 + $0x838] sm:$0xff] }
 0x82a   : > { %4116 = vmatprep.subr.mxu1 %v5717_v28  ;;  %4149 = vmatprep.subr.mxu0 %v5717_v28 }
 0x82b   : > { %4117 = vmatpush3.msra.mxu1 %v3122_v15  ;;  %4150 = vmatpush3.msra.mxu0 %v3140_v9  ;;  %v3182_v15 = vld [vmem:[%s6283_s2 + $0x8d0] sm:$0xff] }
 0x82c   : > { %4118 = vmatprep.subr.mxu1 %v5717_v28  ;;  %4151 = vmatprep.subr.mxu0 %v5717_v28  ;;  %v3206_v9 = vld [vmem:[%s6283_s2 + $0x990] sm:$0xff] }
 0x82d   : > { %4119 = vmatpush3.msra.mxu1 %v3121_v16  ;;  %4152 = vmatpush3.msra.mxu0 %v3139_v11  ;;  %v3198_v16 = vld [vmem:[%s6283_s2 + $0x950] sm:$0xff] }
 0x82e   : > { %4153 = vmatprep.subr.mxu0 %v5717_v28  ;;  %3713 = vmatprep.subr.mxu1 %v3219_v30  ;;  %v3174_v11 = vld [vmem:[%s6283_s2 + $0x890] sm:$0xff]  ;;  %v3204_v30 = vld [vmem:[%s6283_s2 + $0x980] sm:$0xff] }
 0x82f   : > { %4154 = vmatpush3.msra.mxu0 %v3138_v12  ;;  %v3190_v12 = vld [vmem:[%s6283_s2 + $0x910] sm:$0xff] }
 0x830   : > { %3748 = vmatprep.subr.mxu0 %v3187_v17  ;;  %v3172_v17 = vld [vmem:[%s6283_s2 + $0x880] sm:$0xff] }
 0x8ce   : > { %v3641_v44 = vpop.f32.mrf.mxu1  ;;  %v3676_v47 = vpop.f32.mrf.mxu0 }
 0x8d0   : > { %v3642_v48 = vpop.f32.mrf.mxu1  ;;  %v3677_v24 = vpop.f32.mrf.mxu0 }
 0x8d1   : > { %v3643_v49 = vadd.f32 %v3642_v48, %v3641_v44  ;;  %v3678_v50 = vadd.f32 %v3677_v24, %v3676_v47  ;;  %v3210_v44 = vld [vmem:[%s6283_s2 + $0x9b0] sm:$0xff] }
 0x8d2   : > { %v3178_v47 = vld [vmem:[%s6283_s2 + $0x8b0] sm:$0xff] }
 0x8d3   : > { %v2029_v52 = vadd.f32 %v3678_v50, %v3643_v49  ;;  %v3194_v48 = vld [vmem:[%s6283_s2 + $0x930] sm:$0xff]  ;;  %v3209_v49 = vld [vmem:[%s6283_s2 + $0x9a8] sm:$0xff] }
 0x8d4   : > { %v3162_v24 = vld [vmem:[%s6283_s2 + $0x830] sm:$0xff]  ;;  %v3177_v50 = vld [vmem:[%s6283_s2 + $0x8a8] sm:$0xff] }
 0x8d5   : > { %v5839_v53 = vadd.f32 %v3120_v51, %v2029_v52  ;;  %v3193_v51 = vld [vmem:[%s6283_s2 + $0x928] sm:$0xff] }
 0x8d6   : > { %v3161_v52 = vld [vmem:[%s6283_s2 + $0x828] sm:$0xff] }
 0x8d7   : > { %v2041_v54 = vmax.f32 %v5839_v53, 0.0  ;;  %v3235_v53 = vld [vmem:[%s6285_s4 + $0x268] sm:$0xff] }
 0x8d9   : > { %v2043_v55 = vsel %vm2042_vm1, %v2041_v54, 0.0 }
 0x8da   : > { %v2044_v56 = vrot.slane %v2043_v55, 4 }
 0x8dc   : > { %v2045_v59 = vadd.f32 %v2044_v56, %v2043_v55  ;;  %v3208_v55 = vld [vmem:[%s6283_s2 + $0x9a0] sm:$0xff] }
 0x8dd   : > { %v3176_v56 = vld [vmem:[%s6283_s2 + $0x8a0] sm:$0xff] }
 0x8de   : > { %v2046_v61 = vrot.slane %v2045_v59, 2 }
 0x8e0   : > { %v2047_v1 = vadd.f32 %v2046_v61, %v2045_v59  ;;  %v3192_v59 = vld [vmem:[%s6283_s2 + $0x920] sm:$0xff] }
 0x8e1   : > { %v3160_v61 = vld [vmem:[%s6283_s2 + $0x820] sm:$0xff] }
 0x8e2   : > { %v2048_v2 = vrot.slane %v2047_v1, 1 }
 0x8e4   : > { %v2049_v4 = vadd.f32 %v2048_v2, %v2047_v1  ;;  %v3207_v1 = vld [vmem:[%s6283_s2 + $0x998] sm:$0xff] }
 0x8e5   : > { %v3175_v2 = vld [vmem:[%s6283_s2 + $0x898] sm:$0xff] }
 0x8e6   : > { %v2051_v6 = vmul.f32 0.25, %v2049_v4  ;;  %v3191_v4 = vld [vmem:[%s6283_s2 + $0x918] sm:$0xff] }
 0x8e8   : > { %4121 = vmatmul.mubr.f32.vlgmr.msra.gmra.mxu1 %v2051_v6  ;;  %v3159_v6 = vld [vmem:[%s6283_s2 + $0x818] sm:$0xff] }
 0x8e9   : > { %3714 = vmatpush3.msra.mxu1 %v3203_v31  ;;  %v3188_v31 = vld [vmem:[%s6283_s2 + $0x900] sm:$0xff] }
 0x8ea   : > { %3715 = vmatprep.subr.mxu1 %v3218_v23  ;;  %v3154_v23 = vld [vmem:[%s6288_s7 + $0x3] sm:$0x1] }
 0x8eb   : > { %3716 = vmatpush3.msra.mxu1 %v3202_v26 }
 0x8ec   : > { %3717 = vmatprep.subr.mxu1 %v3217_v45 }
 0x8ed   : > { %3718 = vmatpush3.msra.mxu1 %v3201_v57 }
 0x8ee   : > { %3719 = vmatprep.subr.mxu1 %v3216_v62 }
 0x8ef   : > { %3720 = vmatpush3.msra.mxu1 %v3200_v0  ;;  %v3237_v0 = vld [vmem:[%s6285_s4 + $0x278] sm:$0xff] }
 0x8f0   : > { %3721 = vmatprep.subr.mxu1 %v3215_v5 }
 0x8f1   : > { %3722 = vmatpush3.msra.mxu1 %v3199_v8 }
 0x8f2   : > { %3723 = vmatprep.subr.mxu1 %v3214_v13  ;;  %v3233_v13 = vld [vmem:[%s6285_s4 + $0x258] sm:$0xff] }
 0x8f3   : > { %3724 = vmatpush3.msra.mxu1 %v3198_v16  ;;  %v3231_v16 = vld [vmem:[%s6285_s4 + $0x248] sm:$0xff] }
 0x8f4   : > { %3725 = vmatprep.subr.mxu1 %v3213_v32  ;;  %v3229_v32 = vld [vmem:[%s6285_s4 + $0x238] sm:$0xff] }
 0x8f5   : > { %3726 = vmatpush3.msra.mxu1 %v3197_v34  ;;  %v3227_v34 = vld [vmem:[%s6285_s4 + $0x228] sm:$0xff] }
 0x8f6   : > { %3727 = vmatprep.subr.mxu1 %v3212_v36  ;;  %v3225_v36 = vld [vmem:[%s6285_s4 + $0x218] sm:$0xff] }
 0x8f7   : > { %3728 = vmatpush3.msra.mxu1 %v3196_v38  ;;  %v3223_v38 = vld [vmem:[%s6285_s4 + $0x208] sm:$0xff] }
 0x8f8   : > { %3729 = vmatprep.subr.mxu1 %v3211_v40  ;;  %v3254_v40 = vld [vmem:[%s6287_s6 + $0x278] sm:$0xff] }
 0x8f9   : > { %3730 = vmatpush3.msra.mxu1 %v3195_v42  ;;  %v3252_v42 = vld [vmem:[%s6287_s6 + $0x268] sm:$0xff] }
 0x8fa   : > { %3731 = vmatprep.subr.mxu1 %v3210_v44  ;;  %v3250_v44 = vld [vmem:[%s6287_s6 + $0x258] sm:$0xff] }
 0x8fb   : > { %3732 = vmatpush3.msra.mxu1 %v3194_v48  ;;  %v3248_v48 = vld [vmem:[%s6287_s6 + $0x248] sm:$0xff] }
 0x8fc   : > { %3733 = vmatprep.subr.mxu1 %v3209_v49  ;;  %v3246_v49 = vld [vmem:[%s6287_s6 + $0x238] sm:$0xff] }
 0x8fd   : > { %3734 = vmatpush3.msra.mxu1 %v3193_v51  ;;  %v3244_v51 = vld [vmem:[%s6287_s6 + $0x228] sm:$0xff] }
 0x8fe   : > { %3735 = vmatprep.subr.mxu1 %v3208_v55  ;;  %v3242_v55 = vld [vmem:[%s6287_s6 + $0x218] sm:$0xff] }
 0x8ff   : > { %3736 = vmatpush3.msra.mxu1 %v3192_v59 }
 0x900   : > { %3737 = vmatprep.subr.mxu1 %v3207_v1 }
 0x901   : > { %3738 = vmatpush3.msra.mxu1 %v3191_v4 }
 0x902   : > { %3739 = vmatprep.subr.mxu1 %v3206_v9 }
 0x903   : > { %3740 = vmatpush3.msra.mxu1 %v3190_v12 }
 0x9a8   : > { %v2137_v20 = vpop.f32.mrf.mxu1 }
 0x9a9   : > { %v2138_v21 = vadd.f32 %v3137_v18, %v2137_v20  ;;  %v3158_v18 = vld [vmem:[%s6283_s2 + $0x810] sm:$0xff]  ;;  %v3205_v20 = vld [vmem:[%s6283_s2 + $0x988] sm:$0xff] }
 0x9aa   : > { %v4122_v22 = vpop.f32.mrf.mxu1  ;;  %3741 = vmatprep.subr.mxu1 %v3205_v20 }
 0x9ab   : > { %v2141_v19 = vmax.f32 %v2138_v21, 0.0  ;;  %v3173_v21 = vld [vmem:[%s6283_s2 + $0x888] sm:$0xff] }
 0x9ac   : > { %v3189_v22 = vld [vmem:[%s6283_s2 + $0x908] sm:$0xff] }
 0x9ad   : > { %4156 = vmatmul.mubr.f32.vlgmr.msra.gmra.mxu0 %v2141_v19  ;;  %v3157_v19 = vld [vmem:[%s6283_s2 + $0x808] sm:$0xff]  ;;  %3742 = vmatpush3.msra.mxu1 %v3189_v22 }
 0x9ae   : > { %3749 = vmatpush3.msra.mxu0 %v3171_v46  ;;  %3743 = vmatprep.subr.mxu1 %v3204_v30  ;;  %v3156_v46 = vld [vmem:[%s6283_s2 + $0x800] sm:$0xff] }
 0x9af   : > { %3750 = vmatprep.subr.mxu0 %v3186_v25  ;;  %3744 = vmatpush3.msra.mxu1 %v3188_v31 }
 0x9b0   : > { %3751 = vmatpush3.msra.mxu0 %v3170_v27  ;;  %4158 = vmatprep.subr.mxu1 %v5717_v28 }
 0x9b1   : > { %3752 = vmatprep.subr.mxu0 %v3185_v58 }
 0x9b2   : > { %3753 = vmatpush3.msra.mxu0 %v3169_v60 }
 0x9b3   : > { %3754 = vmatprep.subr.mxu0 %v3184_v63 }
 0x9b4   : > { %3755 = vmatpush3.msra.mxu0 %v3168_v3 }
 0x9b5   : > { %3756 = vmatprep.subr.mxu0 %v3183_v7 }
 0x9b6   : > { %3757 = vmatpush3.msra.mxu0 %v3167_v10  ;;  %v3236_v10 = vld [vmem:[%s6285_s4 + $0x270] sm:$0xff] }
 0x9b7   : > { %3758 = vmatprep.subr.mxu0 %v3182_v15  ;;  %v3232_v15 = vld [vmem:[%s6285_s4 + $0x250] sm:$0xff] }
 0x9b8   : > { %3759 = vmatpush3.msra.mxu0 %v3166_v29  ;;  %v3230_v29 = vld [vmem:[%s6285_s4 + $0x240] sm:$0xff] }
 0x9b9   : > { %3760 = vmatprep.subr.mxu0 %v3181_v33  ;;  %v3228_v33 = vld [vmem:[%s6285_s4 + $0x230] sm:$0xff] }
 0x9ba   : > { %3761 = vmatpush3.msra.mxu0 %v3165_v35  ;;  %v3226_v35 = vld [vmem:[%s6285_s4 + $0x220] sm:$0xff] }
 0x9bb   : > { %3762 = vmatprep.subr.mxu0 %v3180_v37  ;;  %v3224_v37 = vld [vmem:[%s6285_s4 + $0x210] sm:$0xff] }
 0x9bc   : > { %3763 = vmatpush3.msra.mxu0 %v3164_v39  ;;  %v3222_v39 = vld [vmem:[%s6285_s4 + $0x200] sm:$0xff] }
 0x9bd   : > { %3764 = vmatprep.subr.mxu0 %v3179_v41  ;;  %v3253_v41 = vld [vmem:[%s6287_s6 + $0x270] sm:$0xff] }
 0x9be   : > { %3765 = vmatpush3.msra.mxu0 %v3163_v43  ;;  %v3251_v43 = vld [vmem:[%s6287_s6 + $0x260] sm:$0xff] }
 0x9bf   : > { %3766 = vmatprep.subr.mxu0 %v3178_v47  ;;  %v3249_v47 = vld [vmem:[%s6287_s6 + $0x250] sm:$0xff] }
 0x9c0   : > { %3767 = vmatpush3.msra.mxu0 %v3162_v24  ;;  %v3247_v24 = vld [vmem:[%s6287_s6 + $0x240] sm:$0xff] }
 0x9c1   : > { %3768 = vmatprep.subr.mxu0 %v3177_v50  ;;  %v3245_v50 = vld [vmem:[%s6287_s6 + $0x230] sm:$0xff] }
 0x9c2   : > { %3769 = vmatpush3.msra.mxu0 %v3161_v52  ;;  %v3243_v52 = vld [vmem:[%s6287_s6 + $0x220] sm:$0xff] }
 0x9c3   : > { %3770 = vmatprep.subr.mxu0 %v3176_v56 }
 0x9c4   : > { %3771 = vmatpush3.msra.mxu0 %v3160_v61 }
 0x9c5   : > { %3772 = vmatprep.subr.mxu0 %v3175_v2 }
 0x9c6   : > { %3773 = vmatpush3.msra.mxu0 %v3159_v6  ;;  %v3221_v6 = vld [vmem:[%s6284_s3 + $0x4] ss:$0 sm:$0xff] }
 0x9c7   : > { %3774 = vmatprep.subr.mxu0 %v3174_v11 }
 0x9c8   : > { %3775 = vmatpush3.msra.mxu0 %v3158_v18 }
 0x9c9   : > { %3776 = vmatprep.subr.mxu0 %v3173_v21 }
 0x9ca   : > { %3777 = vmatpush3.msra.mxu0 %v3157_v19 }
 0x9cb   : > { %3778 = vmatprep.subr.mxu0 %v3172_v17 }
 0x9cc   : > { %3779 = vmatpush3.msra.mxu0 %v3156_v46  ;;  %v3241_v46 = vld [vmem:[%s6287_s6 + $0x210] sm:$0xff] }
 0x9cd   : > { %4193 = vmatprep.subr.mxu0 %v5717_v28 }
 0xa6d   : > { %v2227_v25 = vpop.f32.mrf.mxu0 }
 0xa6e   : > { %v2228_v26 = vadd.f32 %v3154_v23, %v2227_v25  ;;  %v3240_v23 = vld [vmem:[%s6287_s6 + $0x208] sm:$0xff]  ;;  %v3239_v25 = vld [vmem:[%s6287_s6 + $0x200] sm:$0xff] }
 0xa6f   : > { %v4157_v27 = vpop.f32.mrf.mxu0 }
 0xa70   : > { %v3155_v45 = vmul.f32 -1.442695, %v2228_v26  ;;  %v3238_v26 = vld [vmem:[%s6286_s5 + $0x4] sm:$0x1] }
 0xa72   : > { %4285 = vpow2.f32 %v3155_v45 }
 0xa7f   : > { %v4286_v58 = vpop.eup %4285 }
 0xa80   : > { %v2234_v57 = vadd.f32 1.0, %v4286_v58 }
 0xa82   : > { %4287 = vrcp.f32 %v2234_v57 }
 0xa8f   : > { %v4288_v60 = vpop.eup %4287 }
 0xa90   : > { %v2240_v62 = vrot.slane %v4288_v60, %v4813_v14  ;;  %v2679_v60 = vld [vmem:[%s6289_s8 + $0x78] sm:$0xff] }
 0xa92   : > { %v2241_v63 = vmul.f32 %v2240_v62, %v2041_v54  ;;  %v3234_v54 = vld [vmem:[%s6285_s4 + $0x260] sm:$0xff]  ;;  %v2678_v62 = vld [vmem:[%s6289_s8 + $0x70] sm:$0xff] }
 0xa94   : > { %2242 = vst [vmem:[#allocation2 + $0x8] sm:$0xf] %v2241_v63  ;;  %v2677_v63 = vld [vmem:[%s6289_s8 + $0x68] sm:$0xff] }
 0xa9b   : > { %v2280_v3 = vld [vmem:[#allocation2 + $0xa] ss:$2 sm:$0x3]  ;;  %v2245_v5 = vld [vmem:[#allocation2 + $0x9] ss:$2 sm:$0x3] }
 0xa9c   : > { %2378 = vmatprep.mubr.f32.mxu1 %v2280_v3  ;;  %2448 = vmatprep.mubr.f32.mxu0 %v2245_v5  ;;  %v2279_v7 = vld [vmem:[#allocation2 + $0x8] ss:$2 sm:$0x3]  ;;  %v2244_v8 = vld [vmem:[#allocation2 + $0x7] ss:$2 sm:$0x3] }
 0xa9d   : > { %2379 = vmatmul.mubr.f32.vlgmr.msra.gmra.mxu1 %v2279_v7  ;;  %2449 = vmatmul.mubr.f32.vlgmr.msra.gmra.mxu0 %v2244_v8  ;;  %v2675_v3 = vld [vmem:[%s6289_s8 + $0x58] sm:$0xff]  ;;  %v2674_v5 = vld [vmem:[%s6289_s8 + $0x50] sm:$0xff]  ;;  %v2673_v7 = vld [vmem:[%s6289_s8 + $0x48] sm:$0xff] }
 0xa9e   : > { %4159 = vmatpush3.msra.mxu1 %v3237_v0  ;;  %4190 = vmatprep.mubr.msk.f32.mxu1 %vm4304_vm0, %v5717_v28  ;;  %v2676_v0 = vld [vmem:[%s6289_s8 + $0x60] sm:$0xff] }
 0xa9f   : > { %4160 = vmatprep.subr.mxu1 %v5717_v28  ;;  %4225 = vmatprep.mubr.msk.f32.mxu0 %vm4304_vm0, %v5717_v28  ;;  %v2672_v8 = vld [vmem:[%s6289_s8 + $0x40] sm:$0xff] }
 0xaa0   : > { %4161 = vmatpush3.msra.mxu1 %v3236_v10  ;;  %4194 = vmatpush3.msra.mxu0 %v3254_v40  ;;  %v2671_v10 = vld [vmem:[%s6289_s8 + $0x38] sm:$0xff] }
 0xaa1   : > { %4162 = vmatprep.subr.mxu1 %v5717_v28  ;;  %4195 = vmatprep.subr.mxu0 %v5717_v28 }
 0xaa2   : > { %4163 = vmatpush3.msra.mxu1 %v3235_v53  ;;  %4196 = vmatpush3.msra.mxu0 %v3253_v41  ;;  %v2670_v53 = vld [vmem:[%s6289_s8 + $0x30] sm:$0xff] }
 0xaa3   : > { %4164 = vmatprep.subr.mxu1 %v5717_v28  ;;  %4197 = vmatprep.subr.mxu0 %v5717_v28 }
 0xaa4   : > { %4165 = vmatpush3.msra.mxu1 %v3234_v54  ;;  %4198 = vmatpush3.msra.mxu0 %v3252_v42  ;;  %v2669_v54 = vld [vmem:[%s6289_s8 + $0x28] sm:$0xff] }
 0xaa5   : > { %4166 = vmatprep.subr.mxu1 %v5717_v28  ;;  %4199 = vmatprep.subr.mxu0 %v5717_v28 }
 0xaa6   : > { %4167 = vmatpush3.msra.mxu1 %v3233_v13  ;;  %4200 = vmatpush3.msra.mxu0 %v3251_v43  ;;  %v2668_v13 = vld [vmem:[%s6289_s8 + $0x20] sm:$0xff] }
 0xaa7   : > { %4168 = vmatprep.subr.mxu1 %v5717_v28  ;;  %4201 = vmatprep.subr.mxu0 %v5717_v28 }
 0xaa8   : > { %4169 = vmatpush3.msra.mxu1 %v3232_v15  ;;  %4202 = vmatpush3.msra.mxu0 %v3250_v44  ;;  %v2667_v15 = vld [vmem:[%s6289_s8 + $0x18] sm:$0xff] }
 0xaa9   : > { %4170 = vmatprep.subr.mxu1 %v5717_v28  ;;  %4203 = vmatprep.subr.mxu0 %v5717_v28 }
 0xaaa   : > { %4171 = vmatpush3.msra.mxu1 %v3231_v16  ;;  %4204 = vmatpush3.msra.mxu0 %v3249_v47  ;;  %v2666_v16 = vld [vmem:[%s6289_s8 + $0x10] sm:$0xff] }
 0xaab   : > { %4172 = vmatprep.subr.mxu1 %v5717_v28  ;;  %4205 = vmatprep.subr.mxu0 %v5717_v28 }
 0xaac   : > { %4173 = vmatpush3.msra.mxu1 %v3230_v29  ;;  %4206 = vmatpush3.msra.mxu0 %v3248_v48  ;;  %v2665_v29 = vld [vmem:[%s6289_s8 + $0x8] sm:$0xff] }
 0xaad   : > { %4174 = vmatprep.subr.mxu1 %v5717_v28  ;;  %4207 = vmatprep.subr.mxu0 %v5717_v28 }
 0xaae   : > { %4175 = vmatpush3.msra.mxu1 %v3229_v32  ;;  %4208 = vmatpush3.msra.mxu0 %v3247_v24  ;;  %v2664_v32 = vld [vmem:[%s6289_s8] sm:$0xff] }
 0xaaf   : > { %4176 = vmatprep.subr.mxu1 %v5717_v28  ;;  %4209 = vmatprep.subr.mxu0 %v5717_v28 }
 0xab0   : > { %4177 = vmatpush3.msra.mxu1 %v3228_v33  ;;  %4210 = vmatpush3.msra.mxu0 %v3246_v49  ;;  %v3255_v33 = vld [vmem:[%s6288_s7 + $0x4] sm:$0x1] }
 0xab1   : > { %4178 = vmatprep.subr.mxu1 %v5717_v28  ;;  %4211 = vmatprep.subr.mxu0 %v5717_v28 }
 0xab2   : > { %4179 = vmatpush3.msra.mxu1 %v3227_v34  ;;  %4212 = vmatpush3.msra.mxu0 %v3245_v50 }
 0xab3   : > { %4180 = vmatprep.subr.mxu1 %v5717_v28  ;;  %4213 = vmatprep.subr.mxu0 %v5717_v28 }
 0xab4   : > { %4181 = vmatpush3.msra.mxu1 %v3226_v35  ;;  %4214 = vmatpush3.msra.mxu0 %v3244_v51 }
 0xab5   : > { %4182 = vmatprep.subr.mxu1 %v5717_v28  ;;  %4215 = vmatprep.subr.mxu0 %v5717_v28 }
 0xab6   : > { %4183 = vmatpush3.msra.mxu1 %v3225_v36  ;;  %4216 = vmatpush3.msra.mxu0 %v3243_v52 }
 0xab7   : > { %4184 = vmatprep.subr.mxu1 %v5717_v28  ;;  %4217 = vmatprep.subr.mxu0 %v5717_v28 }
 0xab8   : > { %4185 = vmatpush3.msra.mxu1 %v3224_v37  ;;  %4218 = vmatpush3.msra.mxu0 %v3242_v55 }
 0xab9   : > { %4186 = vmatprep.subr.mxu1 %v5717_v28  ;;  %4219 = vmatprep.subr.mxu0 %v5717_v28 }
 0xaba   : > { %4187 = vmatpush3.msra.mxu1 %v3223_v38  ;;  %4220 = vmatpush3.msra.mxu0 %v3241_v46 }
 0xabb   : > { %4188 = vmatprep.subr.mxu1 %v5717_v28  ;;  %4221 = vmatprep.subr.mxu0 %v5717_v28 }
 0xabc   : > { %4189 = vmatpush3.msra.mxu1 %v3222_v39  ;;  %4222 = vmatpush3.msra.mxu0 %v3240_v23 }
 0xabd   : > { %4228 = vmatprep.subr.mxu1 %v5717_v28  ;;  %4223 = vmatprep.subr.mxu0 %v5717_v28 }
 0xabe   : > { %4224 = vmatpush3.msra.mxu0 %v3239_v25 }
 0xb5d   : > { %v3745_v56 = vpop.f32.mrf.mxu1  ;;  %v3780_v59 = vpop.f32.mrf.mxu0 }
 0xb5f   : > { %v3746_v61 = vpop.f32.mrf.mxu1  ;;  %v3781_v1 = vpop.f32.mrf.mxu0 }
 0xb60   : > { %v3747_v2 = vadd.f32 %v3746_v61, %v3745_v56  ;;  %v3782_v4 = vadd.f32 %v3781_v1, %v3780_v59 }
 0xb62   : > { %v2451_v9 = vadd.f32 %v3782_v4, %v3747_v2 }
 0xb64   : > { %v6181_v11 = vadd.f32 %v3221_v6, %v2451_v9 }
 0xb66   : > { %v2463_v12 = vmax.f32 %v6181_v11, 0.0 }
 0xb68   : > { %v2465_v18 = vsel %vm2464_vm2, %v2463_v12, 0.0 }
 0xb69   : > { %v2466_v20 = vrot.slane %v2465_v18, 4 }
 0xb6b   : > { %v2467_v21 = vadd.f32 %v2466_v20, %v2465_v18 }
 0xb6d   : > { %v2468_v22 = vrot.slane %v2467_v21, 2 }
 0xb6f   : > { %v2469_v19 = vadd.f32 %v2468_v22, %v2467_v21 }
 0xb71   : > { %v2470_v30 = vrot.slane %v2469_v19, 1 }
 0xb73   : > { %v2471_v17 = vadd.f32 %v2470_v30, %v2469_v19 }
 0xb75   : > { %v2473_v31 = vmul.f32 0.5, %v2471_v17 }
 0xb77   : > { %4191 = vmatmul.mubr.f32.vlgmr.msra.gmra.mxu1 %v2473_v31 }
 0xb78   : > { %4260 = vmatprep.mubr.msk.f32.mxu1 %vm4304_vm0, %v5717_v28  ;;  %4229 = vmatpush3.msra.mxu1 %v2679_v60 }
 0xb79   : > { %4230 = vmatprep.subr.mxu1 %v5717_v28 }
 0xb7a   : > { %4231 = vmatpush3.msra.mxu1 %v2678_v62 }
 0xb7b   : > { %4232 = vmatprep.subr.mxu1 %v5717_v28 }
 0xb7c   : > { %4233 = vmatpush3.msra.mxu1 %v2677_v63 }
 0xb7d   : > { %4234 = vmatprep.subr.mxu1 %v5717_v28 }
 0xb7e   : > { %4235 = vmatpush3.msra.mxu1 %v2676_v0 }
 0xb7f   : > { %4236 = vmatprep.subr.mxu1 %v5717_v28 }
 0xb80   : > { %4237 = vmatpush3.msra.mxu1 %v2675_v3 }
 0xb81   : > { %4238 = vmatprep.subr.mxu1 %v5717_v28 }
 0xb82   : > { %4239 = vmatpush3.msra.mxu1 %v2674_v5 }
 0xb83   : > { %4240 = vmatprep.subr.mxu1 %v5717_v28 }
 0xb84   : > { %4241 = vmatpush3.msra.mxu1 %v2673_v7 }
 0xb85   : > { %4242 = vmatprep.subr.mxu1 %v5717_v28 }
 0xb86   : > { %4243 = vmatpush3.msra.mxu1 %v2672_v8 }
 0xb87   : > { %4244 = vmatprep.subr.mxu1 %v5717_v28 }
 0xb88   : > { %4245 = vmatpush3.msra.mxu1 %v2671_v10 }
 0xb89   : > { %4246 = vmatprep.subr.mxu1 %v5717_v28 }
 0xb8a   : > { %4247 = vmatpush3.msra.mxu1 %v2670_v53 }
 0xb8b   : > { %4248 = vmatprep.subr.mxu1 %v5717_v28 }
 0xb8c   : > { %4249 = vmatpush3.msra.mxu1 %v2669_v54 }
 0xb8d   : > { %4250 = vmatprep.subr.mxu1 %v5717_v28 }
 0xb8e   : > { %4251 = vmatpush3.msra.mxu1 %v2668_v13 }
 0xb8f   : > { %4252 = vmatprep.subr.mxu1 %v5717_v28 }
 0xb90   : > { %4253 = vmatpush3.msra.mxu1 %v2667_v15 }
 0xb91   : > { %4254 = vmatprep.subr.mxu1 %v5717_v28 }
 0xb92   : > { %4255 = vmatpush3.msra.mxu1 %v2666_v16 }
 0xb93   : > { %4256 = vmatprep.subr.mxu1 %v5717_v28 }
 0xb94   : > { %4257 = vmatpush3.msra.mxu1 %v2665_v29 }
 0xb95   : > { %4258 = vmatprep.subr.mxu1 %v5717_v28  ;;  %v3257_v28 = vld [vmem:[%s6290_s9] ss:$0 sm:$0xff] }
 0xb96   : > { %4259 = vmatpush3.msra.mxu1 %v2664_v32 }
 0xc37   : > { %v2559_v27 = vpop.f32.mrf.mxu1 }
 0xc38   : > { %v2560_v45 = vadd.f32 %v3238_v26, %v2559_v27 }
 0xc39   : > { %v4192_v58 = vpop.f32.mrf.mxu1 }
 0xc3a   : > { %v2563_v57 = vmax.f32 %v2560_v45, 0.0 }
 0xc3c   : > { %4226 = vmatmul.mubr.f32.vlgmr.msra.gmra.mxu0 %v2563_v57 }
 0xcfc   : > { %v2649_v34 = vpop.f32.mrf.mxu0 }
 0xcfd   : > { %v2650_v35 = vadd.f32 %v3255_v33, %v2649_v34 }
 0xcfe   : > { %v4227_v36 = vpop.f32.mrf.mxu0 }
 0xcff   : > { %v3256_v37 = vmul.f32 -1.442695, %v2650_v35 }
 0xd01   : > { %4289 = vpow2.f32 %v3256_v37 }
 0xd0e   : > { %v4290_v38 = vpop.eup %4289 }
 0xd0f   : > { %v2656_v39 = vadd.f32 1.0, %v4290_v38 }
 0xd11   : > { %4291 = vrcp.f32 %v2656_v39 }
 0xd1e   : > { %v4292_v40 = vpop.eup %4291 }
 0xd1f   : > { %v2662_v41 = vrot.slane %v4292_v40, %v4813_v14 }
 0xd21   : > { %v2663_v42 = vmul.f32 %v2662_v41, %v2463_v12 }
 0xd23   : > { %4261 = vmatmul.mubr.f32.vlgmr.msra.gmra.mxu1 %v2663_v42 }
 0xde3   : > { %v2753_v43 = vpop.f32.mrf.mxu1 }
 0xde4   : > { %v2754_v44 = vadd.f32 %v3257_v28, %v2753_v43 }
 0xde5   : > { %v4262_v47 = vpop.f32.mrf.mxu1 }
 0xde6   : > { %2757 = vst [vmem:[%s357_s17] sm:$0x3] %v2754_v44 }
 0xde7 PF: > { %s20_s13 = sadd.s32 1, %s4301_s13  }
 0xde8   : > { %p17_p4 = scmp.ge.s32.totalorder %s20_s13, 4  }
 0xdea   :  { %19 = sbr.rel (!%p17_p4) target bundleno = 1 (0x1), region = 135 }

</bundles_post_ra>
